<compile_context>
chip_gen: v7x
topology: tpu7x:2x2x1
jax: 0.10.0
libtpu: 0.0.40
codegen_flags: <defaults>
</compile_context>

<pallas_src>
import functools

import jax
import jax.numpy as jnp
from jax.experimental import pallas as pl
from jax.experimental.pallas import tpu as pltpu


def _encoder_kernel(num_head, dim_model, hidden_dim, block_b, seq_len, use_4d_einsum,
                    q_ref, k_ref, v_ref,
                    wq_ref, bq_ref, wk_ref, bk_ref, wv_ref, bv_ref,
                    wo_ref, bo_ref, g1_ref, be1_ref,
                    w1_ref, b1_ref, w2_ref, b2_ref, g2_ref, be2_ref,
                    o_ref):
    S = seq_len
    D = dim_model
    dh = D // num_head
    rows = block_b * S
    bf16 = jnp.bfloat16

    # Activations arrive as lane-dense (rows, D) 2-D blocks.
    x = q_ref[...]
    y = k_ref[...]
    z = v_ref[...]

    # QKV projections: bf16 x bf16 -> f32 accumulation on the MXU.
    # NOTE: the 1/sqrt(dh) attention scale is pre-folded into wq/bq by the wrapper.
    Q = jnp.dot(x.astype(bf16), wq_ref[...], preferred_element_type=jnp.float32) + bq_ref[...]
    K = jnp.dot(y.astype(bf16), wk_ref[...], preferred_element_type=jnp.float32) + bk_ref[...]
    V = jnp.dot(z.astype(bf16), wv_ref[...], preferred_element_type=jnp.float32) + bv_ref[...]

    # Head split is a pure reshape (no transpose): (rows, D) -> (block_b, S, H, dh).
    Qh = Q.reshape(block_b, S, num_head, dh).astype(bf16)
    Kh = K.reshape(block_b, S, num_head, dh).astype(bf16)
    Vh = V.reshape(block_b, S, num_head, dh).astype(bf16)

    if use_4d_einsum:
        # Transpose-free head-batched attention: dot_general takes the contraction directly.
        s = jnp.einsum('bqhd,bkhd->bhqk', Qh, Kh, preferred_element_type=jnp.float32)
        s = s - jnp.max(s, axis=-1, keepdims=True)
        e = jnp.exp(s)
        p = e * pl.reciprocal(jnp.sum(e, axis=-1, keepdims=True), approx=True)
        ctx = jnp.einsum('bhqk,bkhd->bqhd', p.astype(bf16), Vh,
                         preferred_element_type=jnp.float32)
        ctx = ctx.reshape(rows, D)
    else:
        # Fallback path: explicit head transpose + leading-batch-dim 3-D einsums (known-good).
        def to_heads(m):
            return m.transpose(0, 2, 1, 3).reshape(block_b * num_head, S, dh)

        Qb, Kb, Vb = to_heads(Qh), to_heads(Kh), to_heads(Vh)
        s = jnp.einsum('bqd,bkd->bqk', Qb, Kb, preferred_element_type=jnp.float32)
        s = s - jnp.max(s, axis=-1, keepdims=True)
        e = jnp.exp(s)
        p = e * pl.reciprocal(jnp.sum(e, axis=-1, keepdims=True), approx=True)
        ctx = jnp.einsum('bqk,bkd->bqd', p.astype(bf16), Vb,
                         preferred_element_type=jnp.float32)
        ctx = (ctx.reshape(block_b, num_head, S, dh)
                  .transpose(0, 2, 1, 3)
                  .reshape(rows, D))

    # Output projection + residual + LayerNorm (rsqrt on the EUP).
    out = jnp.dot(ctx.astype(bf16), wo_ref[...],
                  preferred_element_type=jnp.float32) + bo_ref[...]
    out = out + x
    mu = jnp.mean(out, axis=-1, keepdims=True)
    var = jnp.mean(jnp.square(out - mu), axis=-1, keepdims=True)
    out = (out - mu) * jax.lax.rsqrt(var + 1e-5) * g1_ref[...] + be1_ref[...]

    # Position-wise FFN (hidden kept in bf16 to halve the largest intermediate) + residual + LN.
    h1 = jnp.dot(out.astype(bf16), w1_ref[...],
                 preferred_element_type=jnp.float32) + b1_ref[...]
    h1 = jnp.maximum(h1, 0.0).astype(bf16)
    h2 = jnp.dot(h1, w2_ref[...], preferred_element_type=jnp.float32) + b2_ref[...]
    h2 = h2 + out
    mu2 = jnp.mean(h2, axis=-1, keepdims=True)
    var2 = jnp.mean(jnp.square(h2 - mu2), axis=-1, keepdims=True)
    o_ref[...] = (h2 - mu2) * jax.lax.rsqrt(var2 + 1e-5) * g2_ref[...] + be2_ref[...]


def _vmem_capacity_bytes():
    try:
        return int(pltpu.get_tpu_info().vmem_capacity_bytes)
    except Exception:
        return 64 * 1024 * 1024  # conservative: v7x per-TensorCore VMEM


def _per_step_bytes(bt, S, D, hidden_dim, num_head):
    rows = bt * S
    return (4 * rows * D * 4 * 2               # Q/K/V/out activation blocks, f32, double-buffered
            + 8 * rows * D * 4                 # live f32 intermediates (Q,K,V,ctx,out,h2,...)
            + 3 * bt * num_head * S * S * 4    # scores / exp / probs (f32)
            + rows * hidden_dim * (4 + 2))     # FFN hidden: f32 accumulator + bf16 copy


def _pick_block_b(B, S, D, hidden_dim, num_head, budget_bytes):
    """Largest batch-divisor block that fits the budget, keeping >= 2 grid steps if possible."""
    def valid(bt):
        # 2-D (rows, D) blocks require rows % 8 == 0 unless the block covers the full array.
        return B % bt == 0 and ((bt * S) % 8 == 0 or bt == B)

    fitting = [bt for bt in range(1, B + 1)
               if valid(bt) and _per_step_bytes(bt, S, D, hidden_dim, num_head) <= budget_bytes]
    if not fitting:
        for bt in range(1, B + 1):
            if valid(bt):
                return bt
        return B
    # Keep >= 2 grid steps when possible so v7x megacore can shard the batch axis across 2 TCs.
    capped = [bt for bt in fitting if bt <= max(1, B // 2)]
    return max(capped) if capped else max(fitting)


def _build_encoder_call(B, S, D, hidden_dim, num_head, *, block_b, use_4d_einsum,
                        single_buffer_weights, vmem_capacity):
    kernel = functools.partial(_encoder_kernel, num_head, D, hidden_dim, block_b, S,
                               use_4d_einsum)
    rows = block_b * S
    act_spec = pl.BlockSpec((rows, D), lambda b: (b, 0))

    if single_buffer_weights:
        # Weights never change across the grid -> single-buffer them (halves resident bytes).
        def wspec(shape):
            return pl.BlockSpec(shape, lambda b: (0, 0), pipeline_mode=pl.Buffered(1))
    else:
        def wspec(shape):
            return pl.BlockSpec(shape, lambda b: (0, 0))

    in_specs = [
        act_spec, act_spec, act_spec,                      # Q, K, V  (flattened to (B*S, D))
        wspec((D, D)), wspec((1, D)),                      # Wq, bq
        wspec((D, D)), wspec((1, D)),                      # Wk, bk
        wspec((D, D)), wspec((1, D)),                      # Wv, bv
        wspec((D, D)), wspec((1, D)),                      # Wo, bo
        wspec((1, D)), wspec((1, D)),                      # ln1 gamma, beta
        wspec((D, hidden_dim)), wspec((1, hidden_dim)),    # W1, b1
        wspec((hidden_dim, D)), wspec((1, D)),             # W2, b2
        wspec((1, D)), wspec((1, D)),                      # ln2 gamma, beta
    ]

    # Generation-aware VMEM limit: ~96 MiB ceiling on 128 MiB parts (v5e/v6e), ~56 MiB on v7x.
    w_bytes = (4 * D * D + 2 * D * hidden_dim) * 2 + (7 * D + hidden_dim) * 4
    est = w_bytes + 2 * _per_step_bytes(block_b, S, D, hidden_dim, num_head) + (1 << 20)
    if vmem_capacity >= (100 << 20):
        ceiling = 96 << 20
    else:
        ceiling = min(max(vmem_capacity - (8 << 20), 16 << 20), 56 << 20)
    vmem_limit = int(min(max(32 << 20, est), ceiling))

    flops = B * (8 * S * D * D + 4 * S * S * D + 4 * S * D * hidden_dim)
    transcendentals = B * num_head * S * S + 4 * B * S
    bytes_accessed = ((3 + 1) * B * S * D * 4               # Q, K, V reads + output write (f32)
                      + (4 * D * D + 2 * D * hidden_dim) * 2  # bf16 weights
                      + (8 * D + hidden_dim) * 4)             # biases + LN params
    cost = pl.CostEstimate(flops=flops, transcendentals=transcendentals,
                           bytes_accessed=bytes_accessed)

    return pl.pallas_call(
        kernel,
        out_shape=jax.ShapeDtypeStruct((B * S, D), jnp.float32),
        grid_spec=pltpu.PrefetchScalarGridSpec(
            num_scalar_prefetch=0,
            grid=(B // block_b,),
            in_specs=in_specs,
            out_specs=pl.BlockSpec((rows, D), lambda b: (b, 0)),
        ),
        compiler_params=pltpu.CompilerParams(
            dimension_semantics=("parallel",),
            vmem_limit_bytes=vmem_limit),
        cost_estimate=cost,
    )


def encoder_forward(Q, K, V, params, *, num_head):
    B, S, D = Q.shape
    hidden_dim = params['w1'].shape[1]
    bf16 = jnp.bfloat16
    dh = D // num_head
    scale = dh ** (-0.5)

    # Fold the 1/sqrt(dh) attention scale into the Q projection (one-time, wrapper-side),
    # and cast the big weight matrices to bf16 once (halves weight DMA; MXU-friendly).
    args = (Q.reshape(B * S, D), K.reshape(B * S, D), V.reshape(B * S, D),
            (params['wq'] * scale).astype(bf16), params['bq'] * scale,
            params['wk'].astype(bf16), params['bk'],
            params['wv'].astype(bf16), params['bv'],
            params['wo'].astype(bf16), params['bo'],
            params['ln1_g'], params['ln1_b'],
            params['w1'].astype(bf16), params['b1'],
            params['w2'].astype(bf16), params['b2'],
            params['ln2_g'], params['ln2_b'])

    capacity = _vmem_capacity_bytes()
    # Per-step working-set budget: ~28 MiB on 128 MiB parts (v5e/v6e), ~12 MiB on v7x (64 MiB).
    budget = (28 << 20) if capacity >= (100 << 20) else (12 << 20)
    block_b = _pick_block_b(B, S, D, hidden_dim, num_head, budget)

    # Fast config first; fallbacks only swap the attention contraction form / weight buffering
    # (all configs stay head-batched with the same block_b -- no order-of-magnitude cliff).
    configs = (
        dict(block_b=block_b, use_4d_einsum=True, single_buffer_weights=True),
        dict(block_b=block_b, use_4d_einsum=False, single_buffer_weights=True),
        dict(block_b=block_b, use_4d_einsum=False, single_buffer_weights=False),
    )
    last_err = None
    for cfg in configs:
        try:
            call = _build_encoder_call(B, S, D, hidden_dim, num_head,
                                       vmem_capacity=capacity, **cfg)
            out = jax.block_until_ready(call(*args))
            return out.reshape(B, S, D)
        except Exception as e:  # feature-availability fallback; final error is re-raised
            last_err = e
    raise last_err


def init_params(key, dim_model, num_head, hidden_dim):
    ks = jax.random.split(key, 12)
    f32 = jnp.float32

    def lin(k, fan_in, fan_out):
        return jax.random.normal(k, (fan_in, fan_out), f32) * 0.02

    def bias(k, n):
        return jax.random.normal(k, (1, n), f32) * 0.02

    return {
        'wq': lin(ks[0], dim_model, dim_model), 'bq': bias(ks[1], dim_model),
        'wk': lin(ks[2], dim_model, dim_model), 'bk': bias(ks[3], dim_model),
        'wv': lin(ks[4], dim_model, dim_model), 'bv': bias(ks[5], dim_model),
        'wo': lin(ks[6], dim_model, dim_model), 'bo': bias(ks[7], dim_model),
        'ln1_g': jnp.ones((1, dim_model), f32), 'ln1_b': jnp.zeros((1, dim_model), f32),
        'w1': lin(ks[8], dim_model, hidden_dim), 'b1': bias(ks[9], hidden_dim),
        'w2': lin(ks[10], hidden_dim, dim_model), 'b2': bias(ks[11], dim_model),
        'ln2_g': jnp.ones((1, dim_model), f32), 'ln2_b': jnp.zeros((1, dim_model), f32),
    }


def encoder_reference(Q, K, V, params, *, num_head):
    """Pure-JAX f32 reference mirroring the PyTorch forward (for sanity check)."""
    B, S, D = Q.shape
    dh = D // num_head

    def proj(x, w, b):
        return x @ w + b

    q = proj(Q, params['wq'], params['bq']).reshape(B, S, num_head, dh).transpose(0, 2, 1, 3)
    k = proj(K, params['wk'], params['bk']).reshape(B, S, num_head, dh).transpose(0, 2, 1, 3)
    v = proj(V, params['wv'], params['bv']).reshape(B, S, num_head, dh).transpose(0, 2, 1, 3)
    scale = dh ** (-0.5)
    att = jnp.einsum('bhqd,bhkd->bhqk', q, k) * scale
    att = jax.nn.softmax(att, axis=-1)
    ctx = jnp.einsum('bhqk,bhkd->bhqd', att, v).transpose(0, 2, 1, 3).reshape(B, S, D)
    out = ctx @ params['wo'] + params['bo'] + Q

    def ln(x, g, b):
        mu = jnp.mean(x, axis=-1, keepdims=True)
        var = jnp.mean((x - mu) ** 2, axis=-1, keepdims=True)
        return (x - mu) / jnp.sqrt(var + 1e-5) * g + b

    out = ln(out, params['ln1_g'], params['ln1_b'])
    h = jax.nn.relu(out @ params['w1'] + params['b1'])
    h = h @ params['w2'] + params['b2'] + out
    return ln(h, params['ln2_g'], params['ln2_b'])


if __name__ == "__main__":
    B, S, D, NH, HID = 2, 8, 32, 4, 64

    key = jax.random.PRNGKey(0)
    kq, kk, kv, kp = jax.random.split(key, 4)
    Q = jax.random.normal(kq, (B, S, D), jnp.float32)
    K = jax.random.normal(kk, (B, S, D), jnp.float32)
    V = jax.random.normal(kv, (B, S, D), jnp.float32)
    params = init_params(kp, D, NH, HID)

    out = encoder_forward(Q, K, V, params, num_head=NH)
    out = jax.block_until_ready(out)

    ref = encoder_reference(Q, K, V, params, num_head=NH)
    assert out.shape == (B, S, D)
    max_err = float(jnp.max(jnp.abs(out - ref)))
    # bf16 matmul operands + approx reciprocal -> slightly looser tolerance than pure f32.
    assert max_err < 5e-2, f"mismatch vs reference: max abs err {max_err}"

    print("KERNEL_OK")
</pallas_src>

<mosaic_0001>
module attributes {stable_mosaic.version = 11 : i64} {
  func.func @_encoder_kernel(%arg0: i32, %arg1: memref<8x32xf32, #tpu.memory_space<vmem>>, %arg2: memref<8x32xf32, #tpu.memory_space<vmem>>, %arg3: memref<8x32xf32, #tpu.memory_space<vmem>>, %arg4: memref<32x32xbf16, #tpu.memory_space<vmem>>, %arg5: memref<1x32xf32, #tpu.memory_space<vmem>>, %arg6: memref<32x32xbf16, #tpu.memory_space<vmem>>, %arg7: memref<1x32xf32, #tpu.memory_space<vmem>>, %arg8: memref<32x32xbf16, #tpu.memory_space<vmem>>, %arg9: memref<1x32xf32, #tpu.memory_space<vmem>>, %arg10: memref<32x32xbf16, #tpu.memory_space<vmem>>, %arg11: memref<1x32xf32, #tpu.memory_space<vmem>>, %arg12: memref<1x32xf32, #tpu.memory_space<vmem>>, %arg13: memref<1x32xf32, #tpu.memory_space<vmem>>, %arg14: memref<32x64xbf16, #tpu.memory_space<vmem>>, %arg15: memref<1x64xf32, #tpu.memory_space<vmem>>, %arg16: memref<64x32xbf16, #tpu.memory_space<vmem>>, %arg17: memref<1x32xf32, #tpu.memory_space<vmem>>, %arg18: memref<1x32xf32, #tpu.memory_space<vmem>>, %arg19: memref<1x32xf32, #tpu.memory_space<vmem>>, %arg20: memref<8x32xf32, #tpu.memory_space<vmem>>) attributes {dimension_semantics = [#tpu.dimension_semantics<parallel>], iteration_bounds = array<i64: 2>, scalar_prefetch = 0 : i64, scratch_operands = 0 : i64, tpu.core_type = #tpu.core_type<tc>, window_params = [{transform_indices = @transform_0, window_bounds = array<i64: 8, 32>}, {transform_indices = @transform_1, window_bounds = array<i64: 8, 32>}, {transform_indices = @transform_2, window_bounds = array<i64: 8, 32>}, {pipeline_mode = #tpu.pipeline_mode<synchronous>, transform_indices = @transform_3, window_bounds = array<i64: 32, 32>}, {pipeline_mode = #tpu.pipeline_mode<synchronous>, transform_indices = @transform_4, window_bounds = array<i64: 1, 32>}, {pipeline_mode = #tpu.pipeline_mode<synchronous>, transform_indices = @transform_5, window_bounds = array<i64: 32, 32>}, {pipeline_mode = #tpu.pipeline_mode<synchronous>, transform_indices = @transform_6, window_bounds = array<i64: 1, 32>}, {pipeline_mode = #tpu.pipeline_mode<synchronous>, transform_indices = @transform_7, window_bounds = array<i64: 32, 32>}, {pipeline_mode = #tpu.pipeline_mode<synchronous>, transform_indices = @transform_8, window_bounds = array<i64: 1, 32>}, {pipeline_mode = #tpu.pipeline_mode<synchronous>, transform_indices = @transform_9, window_bounds = array<i64: 32, 32>}, {pipeline_mode = #tpu.pipeline_mode<synchronous>, transform_indices = @transform_10, window_bounds = array<i64: 1, 32>}, {pipeline_mode = #tpu.pipeline_mode<synchronous>, transform_indices = @transform_11, window_bounds = array<i64: 1, 32>}, {pipeline_mode = #tpu.pipeline_mode<synchronous>, transform_indices = @transform_12, window_bounds = array<i64: 1, 32>}, {pipeline_mode = #tpu.pipeline_mode<synchronous>, transform_indices = @transform_13, window_bounds = array<i64: 32, 64>}, {pipeline_mode = #tpu.pipeline_mode<synchronous>, transform_indices = @transform_14, window_bounds = array<i64: 1, 64>}, {pipeline_mode = #tpu.pipeline_mode<synchronous>, transform_indices = @transform_15, window_bounds = array<i64: 64, 32>}, {pipeline_mode = #tpu.pipeline_mode<synchronous>, transform_indices = @transform_16, window_bounds = array<i64: 1, 32>}, {pipeline_mode = #tpu.pipeline_mode<synchronous>, transform_indices = @transform_17, window_bounds = array<i64: 1, 32>}, {pipeline_mode = #tpu.pipeline_mode<synchronous>, transform_indices = @transform_18, window_bounds = array<i64: 1, 32>}, {transform_indices = @transform_19, window_bounds = array<i64: 8, 32>}]} {
    %c0 = arith.constant 0 : index
    %c0_0 = arith.constant 0 : index
    %0 = vector.load %arg1[%c0, %c0_0] : memref<8x32xf32, #tpu.memory_space<vmem>>, vector<8x32xf32>
    %c0_1 = arith.constant 0 : index
    %c0_2 = arith.constant 0 : index
    %1 = vector.load %arg2[%c0_1, %c0_2] : memref<8x32xf32, #tpu.memory_space<vmem>>, vector<8x32xf32>
    %c0_3 = arith.constant 0 : index
    %c0_4 = arith.constant 0 : index
    %2 = vector.load %arg3[%c0_3, %c0_4] : memref<8x32xf32, #tpu.memory_space<vmem>>, vector<8x32xf32>
    %3 = arith.truncf %0 : vector<8x32xf32> to vector<8x32xbf16>
    %c0_5 = arith.constant 0 : index
    %c0_6 = arith.constant 0 : index
    %4 = vector.load %arg4[%c0_5, %c0_6] : memref<32x32xbf16, #tpu.memory_space<vmem>>, vector<32x32xbf16>
    %cst = arith.constant dense<0.000000e+00> : vector<8x32xf32>
    %5 = tpu.matmul %3, %4, %cst {dimension_numbers = #tpu.dot_dimension_numbers<[1], [0], [0], [1], [0, 0, 1, 1], [], []>} : vector<8x32xbf16>, vector<32x32xbf16>, vector<8x32xf32> -> vector<8x32xf32>
    %c0_7 = arith.constant 0 : index
    %c0_8 = arith.constant 0 : index
    %6 = vector.load %arg5[%c0_7, %c0_8] : memref<1x32xf32, #tpu.memory_space<vmem>>, vector<1x32xf32>
    %7 = vector.broadcast %6 : vector<1x32xf32> to vector<8x32xf32>
    %8 = arith.addf %5, %7 : vector<8x32xf32>
    %9 = arith.truncf %1 : vector<8x32xf32> to vector<8x32xbf16>
    %c0_9 = arith.constant 0 : index
    %c0_10 = arith.constant 0 : index
    %10 = vector.load %arg6[%c0_9, %c0_10] : memref<32x32xbf16, #tpu.memory_space<vmem>>, vector<32x32xbf16>
    %cst_11 = arith.constant dense<0.000000e+00> : vector<8x32xf32>
    %11 = tpu.matmul %9, %10, %cst_11 {dimension_numbers = #tpu.dot_dimension_numbers<[1], [0], [0], [1], [0, 0, 1, 1], [], []>} : vector<8x32xbf16>, vector<32x32xbf16>, vector<8x32xf32> -> vector<8x32xf32>
    %c0_12 = arith.constant 0 : index
    %c0_13 = arith.constant 0 : index
    %12 = vector.load %arg7[%c0_12, %c0_13] : memref<1x32xf32, #tpu.memory_space<vmem>>, vector<1x32xf32>
    %13 = vector.broadcast %12 : vector<1x32xf32> to vector<8x32xf32>
    %14 = arith.addf %11, %13 : vector<8x32xf32>
    %15 = arith.truncf %2 : vector<8x32xf32> to vector<8x32xbf16>
    %c0_14 = arith.constant 0 : index
    %c0_15 = arith.constant 0 : index
    %16 = vector.load %arg8[%c0_14, %c0_15] : memref<32x32xbf16, #tpu.memory_space<vmem>>, vector<32x32xbf16>
    %cst_16 = arith.constant dense<0.000000e+00> : vector<8x32xf32>
    %17 = tpu.matmul %15, %16, %cst_16 {dimension_numbers = #tpu.dot_dimension_numbers<[1], [0], [0], [1], [0, 0, 1, 1], [], []>} : vector<8x32xbf16>, vector<32x32xbf16>, vector<8x32xf32> -> vector<8x32xf32>
    %c0_17 = arith.constant 0 : index
    %c0_18 = arith.constant 0 : index
    %18 = vector.load %arg9[%c0_17, %c0_18] : memref<1x32xf32, #tpu.memory_space<vmem>>, vector<1x32xf32>
    %19 = vector.broadcast %18 : vector<1x32xf32> to vector<8x32xf32>
    %20 = arith.addf %17, %19 : vector<8x32xf32>
    %21 = vector.shape_cast %8 : vector<8x32xf32> to vector<1x8x4x8xf32>
    %22 = arith.truncf %21 : vector<1x8x4x8xf32> to vector<1x8x4x8xbf16>
    %23 = vector.shape_cast %14 : vector<8x32xf32> to vector<1x8x4x8xf32>
    %24 = arith.truncf %23 : vector<1x8x4x8xf32> to vector<1x8x4x8xbf16>
    %25 = vector.shape_cast %20 : vector<8x32xf32> to vector<1x8x4x8xf32>
    %26 = arith.truncf %25 : vector<1x8x4x8xf32> to vector<1x8x4x8xbf16>
    %27 = tpu.transpose %22, [0, 2, 1, 3] : vector<1x8x4x8xbf16> -> vector<1x4x8x8xbf16>
    %28 = vector.shape_cast %27 : vector<1x4x8x8xbf16> to vector<4x8x8xbf16>
    %29 = tpu.transpose %24, [0, 2, 1, 3] : vector<1x8x4x8xbf16> -> vector<1x4x8x8xbf16>
    %30 = vector.shape_cast %29 : vector<1x4x8x8xbf16> to vector<4x8x8xbf16>
    %31 = tpu.transpose %26, [0, 2, 1, 3] : vector<1x8x4x8xbf16> -> vector<1x4x8x8xbf16>
    %32 = vector.shape_cast %31 : vector<1x4x8x8xbf16> to vector<4x8x8xbf16>
    "tpu.trace_start"() <{level = 10 : i32, message = "bqd,bkd->bqk"}> : () -> ()
    %cst_19 = arith.constant dense<0.000000e+00> : vector<4x8x8xf32>
    %33 = tpu.matmul %28, %30, %cst_19 {dimension_numbers = #tpu.dot_dimension_numbers<[2], [2], [1], [1], [0, 0, 0, 1, 1, 1], [0], [0]>} : vector<4x8x8xbf16>, vector<4x8x8xbf16>, vector<4x8x8xf32> -> vector<4x8x8xf32>
    "tpu.trace_stop"() : () -> ()
    %cst_20 = arith.constant dense<0xFF800000> : vector<4x8xf32>
    %34 = vector.multi_reduction <maximumf>, %33, %cst_20 [2] : vector<4x8x8xf32> to vector<4x8xf32>
    %35 = vector.shape_cast %34 : vector<4x8xf32> to vector<4x8x1xf32>
    %36 = vector.broadcast %35 : vector<4x8x1xf32> to vector<4x8x8xf32>
    %37 = arith.subf %33, %36 : vector<4x8x8xf32>
    %38 = math.exp %37 : vector<4x8x8xf32>
    %cst_21 = arith.constant dense<0.000000e+00> : vector<4x8xf32>
    %39 = vector.multi_reduction <add>, %38, %cst_21 [2] : vector<4x8x8xf32> to vector<4x8xf32>
    %40 = vector.shape_cast %39 : vector<4x8xf32> to vector<4x8x1xf32>
    %41 = tpu.reciprocal %40 {approx = true} : vector<4x8x1xf32> -> vector<4x8x1xf32>
    %42 = vector.broadcast %41 : vector<4x8x1xf32> to vector<4x8x8xf32>
    %43 = arith.mulf %38, %42 : vector<4x8x8xf32>
    %44 = arith.truncf %43 : vector<4x8x8xf32> to vector<4x8x8xbf16>
    "tpu.trace_start"() <{level = 10 : i32, message = "bqk,bkd->bqd"}> : () -> ()
    %cst_22 = arith.constant dense<0.000000e+00> : vector<4x8x8xf32>
    %45 = tpu.matmul %44, %32, %cst_22 {dimension_numbers = #tpu.dot_dimension_numbers<[2], [1], [1], [2], [0, 0, 0, 1, 1, 2], [0], [0]>} : vector<4x8x8xbf16>, vector<4x8x8xbf16>, vector<4x8x8xf32> -> vector<4x8x8xf32>
    "tpu.trace_stop"() : () -> ()
    %46 = vector.shape_cast %45 : vector<4x8x8xf32> to vector<1x4x8x8xf32>
    %47 = tpu.transpose %46, [0, 2, 1, 3] : vector<1x4x8x8xf32> -> vector<1x8x4x8xf32>
    %48 = vector.shape_cast %47 : vector<1x8x4x8xf32> to vector<8x32xf32>
    %49 = arith.truncf %48 : vector<8x32xf32> to vector<8x32xbf16>
    %c0_23 = arith.constant 0 : index
    %c0_24 = arith.constant 0 : index
    %50 = vector.load %arg10[%c0_23, %c0_24] : memref<32x32xbf16, #tpu.memory_space<vmem>>, vector<32x32xbf16>
    %cst_25 = arith.constant dense<0.000000e+00> : vector<8x32xf32>
    %51 = tpu.matmul %49, %50, %cst_25 {dimension_numbers = #tpu.dot_dimension_numbers<[1], [0], [0], [1], [0, 0, 1, 1], [], []>} : vector<8x32xbf16>, vector<32x32xbf16>, vector<8x32xf32> -> vector<8x32xf32>
    %c0_26 = arith.constant 0 : index
    %c0_27 = arith.constant 0 : index
    %52 = vector.load %arg11[%c0_26, %c0_27] : memref<1x32xf32, #tpu.memory_space<vmem>>, vector<1x32xf32>
    %53 = vector.broadcast %52 : vector<1x32xf32> to vector<8x32xf32>
    %54 = arith.addf %51, %53 : vector<8x32xf32>
    %55 = arith.addf %54, %0 : vector<8x32xf32>
    %cst_28 = arith.constant dense<0.000000e+00> : vector<8xf32>
    %56 = vector.multi_reduction <add>, %55, %cst_28 [1] : vector<8x32xf32> to vector<8xf32>
    %57 = vector.shape_cast %56 : vector<8xf32> to vector<8x1xf32>
    %cst_29 = arith.constant 3.200000e+01 : f32
    %58 = vector.broadcast %cst_29 : f32 to vector<8x1xf32>
    %59 = arith.divf %57, %58 : vector<8x1xf32>
    %60 = vector.broadcast %59 : vector<8x1xf32> to vector<8x32xf32>
    %61 = arith.subf %55, %60 : vector<8x32xf32>
    %62 = arith.mulf %61, %61 : vector<8x32xf32>
    %cst_30 = arith.constant dense<0.000000e+00> : vector<8xf32>
    %63 = vector.multi_reduction <add>, %62, %cst_30 [1] : vector<8x32xf32> to vector<8xf32>
    %64 = vector.shape_cast %63 : vector<8xf32> to vector<8x1xf32>
    %cst_31 = arith.constant 3.200000e+01 : f32
    %65 = vector.broadcast %cst_31 : f32 to vector<8x1xf32>
    %66 = arith.divf %64, %65 : vector<8x1xf32>
    %67 = vector.broadcast %59 : vector<8x1xf32> to vector<8x32xf32>
    %68 = arith.subf %55, %67 : vector<8x32xf32>
    %cst_32 = arith.constant 9.99999974E-6 : f32
    %69 = vector.broadcast %cst_32 : f32 to vector<8x1xf32>
    %70 = arith.addf %66, %69 : vector<8x1xf32>
    %71 = math.rsqrt %70 : vector<8x1xf32>
    %72 = vector.broadcast %71 : vector<8x1xf32> to vector<8x32xf32>
    %73 = arith.mulf %68, %72 : vector<8x32xf32>
    %c0_33 = arith.constant 0 : index
    %c0_34 = arith.constant 0 : index
    %74 = vector.load %arg12[%c0_33, %c0_34] : memref<1x32xf32, #tpu.memory_space<vmem>>, vector<1x32xf32>
    %75 = vector.broadcast %74 : vector<1x32xf32> to vector<8x32xf32>
    %76 = arith.mulf %73, %75 : vector<8x32xf32>
    %c0_35 = arith.constant 0 : index
    %c0_36 = arith.constant 0 : index
    %77 = vector.load %arg13[%c0_35, %c0_36] : memref<1x32xf32, #tpu.memory_space<vmem>>, vector<1x32xf32>
    %78 = vector.broadcast %77 : vector<1x32xf32> to vector<8x32xf32>
    %79 = arith.addf %76, %78 : vector<8x32xf32>
    %80 = arith.truncf %79 : vector<8x32xf32> to vector<8x32xbf16>
    %c0_37 = arith.constant 0 : index
    %c0_38 = arith.constant 0 : index
    %81 = vector.load %arg14[%c0_37, %c0_38] : memref<32x64xbf16, #tpu.memory_space<vmem>>, vector<32x64xbf16>
    %cst_39 = arith.constant dense<0.000000e+00> : vector<8x64xf32>
    %82 = tpu.matmul %80, %81, %cst_39 {dimension_numbers = #tpu.dot_dimension_numbers<[1], [0], [0], [1], [0, 0, 1, 1], [], []>} : vector<8x32xbf16>, vector<32x64xbf16>, vector<8x64xf32> -> vector<8x64xf32>
    %c0_40 = arith.constant 0 : index
    %c0_41 = arith.constant 0 : index
    %83 = vector.load %arg15[%c0_40, %c0_41] : memref<1x64xf32, #tpu.memory_space<vmem>>, vector<1x64xf32>
    %84 = vector.broadcast %83 : vector<1x64xf32> to vector<8x64xf32>
    %85 = arith.addf %82, %84 : vector<8x64xf32>
    %cst_42 = arith.constant 0.000000e+00 : f32
    %86 = vector.broadcast %cst_42 : f32 to vector<8x64xf32>
    %87 = arith.maximumf %85, %86 : vector<8x64xf32>
    %88 = arith.truncf %87 : vector<8x64xf32> to vector<8x64xbf16>
    %c0_43 = arith.constant 0 : index
    %c0_44 = arith.constant 0 : index
    %89 = vector.load %arg16[%c0_43, %c0_44] : memref<64x32xbf16, #tpu.memory_space<vmem>>, vector<64x32xbf16>
    %cst_45 = arith.constant dense<0.000000e+00> : vector<8x32xf32>
    %90 = tpu.matmul %88, %89, %cst_45 {dimension_numbers = #tpu.dot_dimension_numbers<[1], [0], [0], [1], [0, 0, 1, 1], [], []>} : vector<8x64xbf16>, vector<64x32xbf16>, vector<8x32xf32> -> vector<8x32xf32>
    %c0_46 = arith.constant 0 : index
    %c0_47 = arith.constant 0 : index
    %91 = vector.load %arg17[%c0_46, %c0_47] : memref<1x32xf32, #tpu.memory_space<vmem>>, vector<1x32xf32>
    %92 = vector.broadcast %91 : vector<1x32xf32> to vector<8x32xf32>
    %93 = arith.addf %90, %92 : vector<8x32xf32>
    %94 = arith.addf %93, %79 : vector<8x32xf32>
    %cst_48 = arith.constant dense<0.000000e+00> : vector<8xf32>
    %95 = vector.multi_reduction <add>, %94, %cst_48 [1] : vector<8x32xf32> to vector<8xf32>
    %96 = vector.shape_cast %95 : vector<8xf32> to vector<8x1xf32>
    %cst_49 = arith.constant 3.200000e+01 : f32
    %97 = vector.broadcast %cst_49 : f32 to vector<8x1xf32>
    %98 = arith.divf %96, %97 : vector<8x1xf32>
    %99 = vector.broadcast %98 : vector<8x1xf32> to vector<8x32xf32>
    %100 = arith.subf %94, %99 : vector<8x32xf32>
    %101 = arith.mulf %100, %100 : vector<8x32xf32>
    %cst_50 = arith.constant dense<0.000000e+00> : vector<8xf32>
    %102 = vector.multi_reduction <add>, %101, %cst_50 [1] : vector<8x32xf32> to vector<8xf32>
    %103 = vector.shape_cast %102 : vector<8xf32> to vector<8x1xf32>
    %cst_51 = arith.constant 3.200000e+01 : f32
    %104 = vector.broadcast %cst_51 : f32 to vector<8x1xf32>
    %105 = arith.divf %103, %104 : vector<8x1xf32>
    %106 = vector.broadcast %98 : vector<8x1xf32> to vector<8x32xf32>
    %107 = arith.subf %94, %106 : vector<8x32xf32>
    %cst_52 = arith.constant 9.99999974E-6 : f32
    %108 = vector.broadcast %cst_52 : f32 to vector<8x1xf32>
    %109 = arith.addf %105, %108 : vector<8x1xf32>
    %110 = math.rsqrt %109 : vector<8x1xf32>
    %111 = vector.broadcast %110 : vector<8x1xf32> to vector<8x32xf32>
    %112 = arith.mulf %107, %111 : vector<8x32xf32>
    %c0_53 = arith.constant 0 : index
    %c0_54 = arith.constant 0 : index
    %113 = vector.load %arg18[%c0_53, %c0_54] : memref<1x32xf32, #tpu.memory_space<vmem>>, vector<1x32xf32>
    %114 = vector.broadcast %113 : vector<1x32xf32> to vector<8x32xf32>
    %115 = arith.mulf %112, %114 : vector<8x32xf32>
    %c0_55 = arith.constant 0 : index
    %c0_56 = arith.constant 0 : index
    %116 = vector.load %arg19[%c0_55, %c0_56] : memref<1x32xf32, #tpu.memory_space<vmem>>, vector<1x32xf32>
    %117 = vector.broadcast %116 : vector<1x32xf32> to vector<8x32xf32>
    %118 = arith.addf %115, %117 : vector<8x32xf32>
    %c0_57 = arith.constant 0 : index
    %c0_58 = arith.constant 0 : index
    %119 = vector.load %arg20[%c0_57, %c0_58] : memref<8x32xf32, #tpu.memory_space<vmem>>, vector<8x32xf32>
    tpu.vector_store %arg20[%c0_57, %c0_58], %118 {strides = array<i32>} : memref<8x32xf32, #tpu.memory_space<vmem>>, vector<8x32xf32>,
    return
  }
  func.func @transform_0(%arg0: i32) -> (i32, i32) {
    %c0_i32 = arith.constant 0 : i32
    %c0_i32_0 = arith.constant 0 : i32
    return %arg0, %c0_i32 : i32, i32
  }
  func.func @transform_1(%arg0: i32) -> (i32, i32) {
    %c0_i32 = arith.constant 0 : i32
    %c0_i32_0 = arith.constant 0 : i32
    return %arg0, %c0_i32 : i32, i32
  }
  func.func @transform_2(%arg0: i32) -> (i32, i32) {
    %c0_i32 = arith.constant 0 : i32
    %c0_i32_0 = arith.constant 0 : i32
    return %arg0, %c0_i32 : i32, i32
  }
  func.func @transform_3(%arg0: i32) -> (i32, i32) {
    %c0_i32 = arith.constant 0 : i32
    %c0_i32_0 = arith.constant 0 : i32
    %c0_i32_1 = arith.constant 0 : i32
    return %c0_i32, %c0_i32_0 : i32, i32
  }
  func.func @transform_4(%arg0: i32) -> (i32, i32) {
    %c0_i32 = arith.constant 0 : i32
    %c0_i32_0 = arith.constant 0 : i32
    %c0_i32_1 = arith.constant 0 : i32
    return %c0_i32, %c0_i32_0 : i32, i32
  }
  func.func @transform_5(%arg0: i32) -> (i32, i32) {
    %c0_i32 = arith.constant 0 : i32
    %c0_i32_0 = arith.constant 0 : i32
    %c0_i32_1 = arith.constant 0 : i32
    return %c0_i32, %c0_i32_0 : i32, i32
  }
  func.func @transform_6(%arg0: i32) -> (i32, i32) {
    %c0_i32 = arith.constant 0 : i32
    %c0_i32_0 = arith.constant 0 : i32
    %c0_i32_1 = arith.constant 0 : i32
    return %c0_i32, %c0_i32_0 : i32, i32
  }
  func.func @transform_7(%arg0: i32) -> (i32, i32) {
    %c0_i32 = arith.constant 0 : i32
    %c0_i32_0 = arith.constant 0 : i32
    %c0_i32_1 = arith.constant 0 : i32
    return %c0_i32, %c0_i32_0 : i32, i32
  }
  func.func @transform_8(%arg0: i32) -> (i32, i32) {
    %c0_i32 = arith.constant 0 : i32
    %c0_i32_0 = arith.constant 0 : i32
    %c0_i32_1 = arith.constant 0 : i32
    return %c0_i32, %c0_i32_0 : i32, i32
  }
  func.func @transform_9(%arg0: i32) -> (i32, i32) {
    %c0_i32 = arith.constant 0 : i32
    %c0_i32_0 = arith.constant 0 : i32
    %c0_i32_1 = arith.constant 0 : i32
    return %c0_i32, %c0_i32_0 : i32, i32
  }
  func.func @transform_10(%arg0: i32) -> (i32, i32) {
    %c0_i32 = arith.constant 0 : i32
    %c0_i32_0 = arith.constant 0 : i32
    %c0_i32_1 = arith.constant 0 : i32
    return %c0_i32, %c0_i32_0 : i32, i32
  }
  func.func @transform_11(%arg0: i32) -> (i32, i32) {
    %c0_i32 = arith.constant 0 : i32
    %c0_i32_0 = arith.constant 0 : i32
    %c0_i32_1 = arith.constant 0 : i32
    return %c0_i32, %c0_i32_0 : i32, i32
  }
  func.func @transform_12(%arg0: i32) -> (i32, i32) {
    %c0_i32 = arith.constant 0 : i32
    %c0_i32_0 = arith.constant 0 : i32
    %c0_i32_1 = arith.constant 0 : i32
    return %c0_i32, %c0_i32_0 : i32, i32
  }
  func.func @transform_13(%arg0: i32) -> (i32, i32) {
    %c0_i32 = arith.constant 0 : i32
    %c0_i32_0 = arith.constant 0 : i32
    %c0_i32_1 = arith.constant 0 : i32
    return %c0_i32, %c0_i32_0 : i32, i32
  }
  func.func @transform_14(%arg0: i32) -> (i32, i32) {
    %c0_i32 = arith.constant 0 : i32
    %c0_i32_0 = arith.constant 0 : i32
    %c0_i32_1 = arith.constant 0 : i32
    return %c0_i32, %c0_i32_0 : i32, i32
  }
  func.func @transform_15(%arg0: i32) -> (i32, i32) {
    %c0_i32 = arith.constant 0 : i32
    %c0_i32_0 = arith.constant 0 : i32
    %c0_i32_1 = arith.constant 0 : i32
    return %c0_i32, %c0_i32_0 : i32, i32
  }
  func.func @transform_16(%arg0: i32) -> (i32, i32) {
    %c0_i32 = arith.constant 0 : i32
    %c0_i32_0 = arith.constant 0 : i32
    %c0_i32_1 = arith.constant 0 : i32
    return %c0_i32, %c0_i32_0 : i32, i32
  }
  func.func @transform_17(%arg0: i32) -> (i32, i32) {
    %c0_i32 = arith.constant 0 : i32
    %c0_i32_0 = arith.constant 0 : i32
    %c0_i32_1 = arith.constant 0 : i32
    return %c0_i32, %c0_i32_0 : i32, i32
  }
  func.func @transform_18(%arg0: i32) -> (i32, i32) {
    %c0_i32 = arith.constant 0 : i32
    %c0_i32_0 = arith.constant 0 : i32
    %c0_i32_1 = arith.constant 0 : i32
    return %c0_i32, %c0_i32_0 : i32, i32
  }
  func.func @transform_19(%arg0: i32) -> (i32, i32) {
    %c0_i32 = arith.constant 0 : i32
    %c0_i32_0 = arith.constant 0 : i32
    return %arg0, %c0_i32 : i32, i32
  }
}

module attributes {stable_mosaic.version = 11 : i64} {
  func.func @_encoder_kernel(%arg0: i32, %arg1: memref<8x32xf32, #tpu.memory_space<vmem>>, %arg2: memref<8x32xf32, #tpu.memory_space<vmem>>, %arg3: memref<8x32xf32, #tpu.memory_space<vmem>>, %arg4: memref<32x32xbf16, #tpu.memory_space<vmem>>, %arg5: memref<1x32xf32, #tpu.memory_space<vmem>>, %arg6: memref<32x32xbf16, #tpu.memory_space<vmem>>, %arg7: memref<1x32xf32, #tpu.memory_space<vmem>>, %arg8: memref<32x32xbf16, #tpu.memory_space<vmem>>, %arg9: memref<1x32xf32, #tpu.memory_space<vmem>>, %arg10: memref<32x32xbf16, #tpu.memory_space<vmem>>, %arg11: memref<1x32xf32, #tpu.memory_space<vmem>>, %arg12: memref<1x32xf32, #tpu.memory_space<vmem>>, %arg13: memref<1x32xf32, #tpu.memory_space<vmem>>, %arg14: memref<32x64xbf16, #tpu.memory_space<vmem>>, %arg15: memref<1x64xf32, #tpu.memory_space<vmem>>, %arg16: memref<64x32xbf16, #tpu.memory_space<vmem>>, %arg17: memref<1x32xf32, #tpu.memory_space<vmem>>, %arg18: memref<1x32xf32, #tpu.memory_space<vmem>>, %arg19: memref<1x32xf32, #tpu.memory_space<vmem>>, %arg20: memref<8x32xf32, #tpu.memory_space<vmem>>) attributes {dimension_semantics = [#tpu.dimension_semantics<parallel>], iteration_bounds = array<i64: 2>, scalar_prefetch = 0 : i64, scratch_operands = 0 : i64, tpu.core_type = #tpu.core_type<tc>, window_params = [{transform_indices = @transform_0, window_bounds = array<i64: 8, 32>}, {transform_indices = @transform_1, window_bounds = array<i64: 8, 32>}, {transform_indices = @transform_2, window_bounds = array<i64: 8, 32>}, {pipeline_mode = #tpu.pipeline_mode<synchronous>, transform_indices = @transform_3, window_bounds = array<i64: 32, 32>}, {pipeline_mode = #tpu.pipeline_mode<synchronous>, transform_indices = @transform_4, window_bounds = array<i64: 1, 32>}, {pipeline_mode = #tpu.pipeline_mode<synchronous>, transform_indices = @transform_5, window_bounds = array<i64: 32, 32>}, {pipeline_mode = #tpu.pipeline_mode<synchronous>, transform_indices = @transform_6, window_bounds = array<i64: 1, 32>}, {pipeline_mode = #tpu.pipeline_mode<synchronous>, transform_indices = @transform_7, window_bounds = array<i64: 32, 32>}, {pipeline_mode = #tpu.pipeline_mode<synchronous>, transform_indices = @transform_8, window_bounds = array<i64: 1, 32>}, {pipeline_mode = #tpu.pipeline_mode<synchronous>, transform_indices = @transform_9, window_bounds = array<i64: 32, 32>}, {pipeline_mode = #tpu.pipeline_mode<synchronous>, transform_indices = @transform_10, window_bounds = array<i64: 1, 32>}, {pipeline_mode = #tpu.pipeline_mode<synchronous>, transform_indices = @transform_11, window_bounds = array<i64: 1, 32>}, {pipeline_mode = #tpu.pipeline_mode<synchronous>, transform_indices = @transform_12, window_bounds = array<i64: 1, 32>}, {pipeline_mode = #tpu.pipeline_mode<synchronous>, transform_indices = @transform_13, window_bounds = array<i64: 32, 64>}, {pipeline_mode = #tpu.pipeline_mode<synchronous>, transform_indices = @transform_14, window_bounds = array<i64: 1, 64>}, {pipeline_mode = #tpu.pipeline_mode<synchronous>, transform_indices = @transform_15, window_bounds = array<i64: 64, 32>}, {pipeline_mode = #tpu.pipeline_mode<synchronous>, transform_indices = @transform_16, window_bounds = array<i64: 1, 32>}, {pipeline_mode = #tpu.pipeline_mode<synchronous>, transform_indices = @transform_17, window_bounds = array<i64: 1, 32>}, {pipeline_mode = #tpu.pipeline_mode<synchronous>, transform_indices = @transform_18, window_bounds = array<i64: 1, 32>}, {transform_indices = @transform_19, window_bounds = array<i64: 8, 32>}]} {
    %c0 = arith.constant 0 : index
    %c0_0 = arith.constant 0 : index
    %0 = vector.load %arg1[%c0, %c0_0] : memref<8x32xf32, #tpu.memory_space<vmem>>, vector<8x32xf32>
    %c0_1 = arith.constant 0 : index
    %c0_2 = arith.constant 0 : index
    %1 = vector.load %arg2[%c0_1, %c0_2] : memref<8x32xf32, #tpu.memory_space<vmem>>, vector<8x32xf32>
    %c0_3 = arith.constant 0 : index
    %c0_4 = arith.constant 0 : index
    %2 = vector.load %arg3[%c0_3, %c0_4] : memref<8x32xf32, #tpu.memory_space<vmem>>, vector<8x32xf32>
    %3 = arith.truncf %0 : vector<8x32xf32> to vector<8x32xbf16>
    %c0_5 = arith.constant 0 : index
    %c0_6 = arith.constant 0 : index
    %4 = vector.load %arg4[%c0_5, %c0_6] : memref<32x32xbf16, #tpu.memory_space<vmem>>, vector<32x32xbf16>
    %cst = arith.constant dense<0.000000e+00> : vector<8x32xf32>
    %5 = tpu.matmul %3, %4, %cst {dimension_numbers = #tpu.dot_dimension_numbers<[1], [0], [0], [1], [0, 0, 1, 1], [], []>} : vector<8x32xbf16>, vector<32x32xbf16>, vector<8x32xf32> -> vector<8x32xf32>
    %c0_7 = arith.constant 0 : index
    %c0_8 = arith.constant 0 : index
    %6 = vector.load %arg5[%c0_7, %c0_8] : memref<1x32xf32, #tpu.memory_space<vmem>>, vector<1x32xf32>
    %7 = vector.broadcast %6 : vector<1x32xf32> to vector<8x32xf32>
    %8 = arith.addf %5, %7 : vector<8x32xf32>
    %9 = arith.truncf %1 : vector<8x32xf32> to vector<8x32xbf16>
    %c0_9 = arith.constant 0 : index
    %c0_10 = arith.constant 0 : index
    %10 = vector.load %arg6[%c0_9, %c0_10] : memref<32x32xbf16, #tpu.memory_space<vmem>>, vector<32x32xbf16>
    %cst_11 = arith.constant dense<0.000000e+00> : vector<8x32xf32>
    %11 = tpu.matmul %9, %10, %cst_11 {dimension_numbers = #tpu.dot_dimension_numbers<[1], [0], [0], [1], [0, 0, 1, 1], [], []>} : vector<8x32xbf16>, vector<32x32xbf16>, vector<8x32xf32> -> vector<8x32xf32>
    %c0_12 = arith.constant 0 : index
    %c0_13 = arith.constant 0 : index
    %12 = vector.load %arg7[%c0_12, %c0_13] : memref<1x32xf32, #tpu.memory_space<vmem>>, vector<1x32xf32>
    %13 = vector.broadcast %12 : vector<1x32xf32> to vector<8x32xf32>
    %14 = arith.addf %11, %13 : vector<8x32xf32>
    %15 = arith.truncf %2 : vector<8x32xf32> to vector<8x32xbf16>
    %c0_14 = arith.constant 0 : index
    %c0_15 = arith.constant 0 : index
    %16 = vector.load %arg8[%c0_14, %c0_15] : memref<32x32xbf16, #tpu.memory_space<vmem>>, vector<32x32xbf16>
    %cst_16 = arith.constant dense<0.000000e+00> : vector<8x32xf32>
    %17 = tpu.matmul %15, %16, %cst_16 {dimension_numbers = #tpu.dot_dimension_numbers<[1], [0], [0], [1], [0, 0, 1, 1], [], []>} : vector<8x32xbf16>, vector<32x32xbf16>, vector<8x32xf32> -> vector<8x32xf32>
    %c0_17 = arith.constant 0 : index
    %c0_18 = arith.constant 0 : index
    %18 = vector.load %arg9[%c0_17, %c0_18] : memref<1x32xf32, #tpu.memory_space<vmem>>, vector<1x32xf32>
    %19 = vector.broadcast %18 : vector<1x32xf32> to vector<8x32xf32>
    %20 = arith.addf %17, %19 : vector<8x32xf32>
    %21 = vector.shape_cast %8 : vector<8x32xf32> to vector<1x8x4x8xf32>
    %22 = arith.truncf %21 : vector<1x8x4x8xf32> to vector<1x8x4x8xbf16>
    %23 = vector.shape_cast %14 : vector<8x32xf32> to vector<1x8x4x8xf32>
    %24 = arith.truncf %23 : vector<1x8x4x8xf32> to vector<1x8x4x8xbf16>
    %25 = vector.shape_cast %20 : vector<8x32xf32> to vector<1x8x4x8xf32>
    %26 = arith.truncf %25 : vector<1x8x4x8xf32> to vector<1x8x4x8xbf16>
    %27 = tpu.transpose %22, [0, 2, 1, 3] : vector<1x8x4x8xbf16> -> vector<1x4x8x8xbf16>
    %28 = vector.shape_cast %27 : vector<1x4x8x8xbf16> to vector<4x8x8xbf16>
    %29 = tpu.transpose %24, [0, 2, 1, 3] : vector<1x8x4x8xbf16> -> vector<1x4x8x8xbf16>
    %30 = vector.shape_cast %29 : vector<1x4x8x8xbf16> to vector<4x8x8xbf16>
    %31 = tpu.transpose %26, [0, 2, 1, 3] : vector<1x8x4x8xbf16> -> vector<1x4x8x8xbf16>
    %32 = vector.shape_cast %31 : vector<1x4x8x8xbf16> to vector<4x8x8xbf16>
    "tpu.trace_start"() <{level = 10 : i32, message = "bqd,bkd->bqk"}> : () -> ()
    %cst_19 = arith.constant dense<0.000000e+00> : vector<4x8x8xf32>
    %33 = tpu.matmul %28, %30, %cst_19 {dimension_numbers = #tpu.dot_dimension_numbers<[2], [2], [1], [1], [0, 0, 0, 1, 1, 1], [0], [0]>} : vector<4x8x8xbf16>, vector<4x8x8xbf16>, vector<4x8x8xf32> -> vector<4x8x8xf32>
    "tpu.trace_stop"() : () -> ()
    %cst_20 = arith.constant dense<0xFF800000> : vector<4x8xf32>
    %34 = vector.multi_reduction <maximumf>, %33, %cst_20 [2] : vector<4x8x8xf32> to vector<4x8xf32>
    %35 = vector.shape_cast %34 : vector<4x8xf32> to vector<4x8x1xf32>
    %36 = vector.broadcast %35 : vector<4x8x1xf32> to vector<4x8x8xf32>
    %37 = arith.subf %33, %36 : vector<4x8x8xf32>
    %38 = math.exp %37 : vector<4x8x8xf32>
    %cst_21 = arith.constant dense<0.000000e+00> : vector<4x8xf32>
    %39 = vector.multi_reduction <add>, %38, %cst_21 [2] : vector<4x8x8xf32> to vector<4x8xf32>
    %40 = vector.shape_cast %39 : vector<4x8xf32> to vector<4x8x1xf32>
    %41 = tpu.reciprocal %40 {approx = true} : vector<4x8x1xf32> -> vector<4x8x1xf32>
    %42 = vector.broadcast %41 : vector<4x8x1xf32> to vector<4x8x8xf32>
    %43 = arith.mulf %38, %42 : vector<4x8x8xf32>
    %44 = arith.truncf %43 : vector<4x8x8xf32> to vector<4x8x8xbf16>
    "tpu.trace_start"() <{level = 10 : i32, message = "bqk,bkd->bqd"}> : () -> ()
    %cst_22 = arith.constant dense<0.000000e+00> : vector<4x8x8xf32>
    %45 = tpu.matmul %44, %32, %cst_22 {dimension_numbers = #tpu.dot_dimension_numbers<[2], [1], [1], [2], [0, 0, 0, 1, 1, 2], [0], [0]>} : vector<4x8x8xbf16>, vector<4x8x8xbf16>, vector<4x8x8xf32> -> vector<4x8x8xf32>
    "tpu.trace_stop"() : () -> ()
    %46 = vector.shape_cast %45 : vector<4x8x8xf32> to vector<1x4x8x8xf32>
    %47 = tpu.transpose %46, [0, 2, 1, 3] : vector<1x4x8x8xf32> -> vector<1x8x4x8xf32>
    %48 = vector.shape_cast %47 : vector<1x8x4x8xf32> to vector<8x32xf32>
    %49 = arith.truncf %48 : vector<8x32xf32> to vector<8x32xbf16>
    %c0_23 = arith.constant 0 : index
    %c0_24 = arith.constant 0 : index
    %50 = vector.load %arg10[%c0_23, %c0_24] : memref<32x32xbf16, #tpu.memory_space<vmem>>, vector<32x32xbf16>
    %cst_25 = arith.constant dense<0.000000e+00> : vector<8x32xf32>
    %51 = tpu.matmul %49, %50, %cst_25 {dimension_numbers = #tpu.dot_dimension_numbers<[1], [0], [0], [1], [0, 0, 1, 1], [], []>} : vector<8x32xbf16>, vector<32x32xbf16>, vector<8x32xf32> -> vector<8x32xf32>
    %c0_26 = arith.constant 0 : index
    %c0_27 = arith.constant 0 : index
    %52 = vector.load %arg11[%c0_26, %c0_27] : memref<1x32xf32, #tpu.memory_space<vmem>>, vector<1x32xf32>
    %53 = vector.broadcast %52 : vector<1x32xf32> to vector<8x32xf32>
    %54 = arith.addf %51, %53 : vector<8x32xf32>
    %55 = arith.addf %54, %0 : vector<8x32xf32>
    %cst_28 = arith.constant dense<0.000000e+00> : vector<8xf32>
    %56 = vector.multi_reduction <add>, %55, %cst_28 [1] : vector<8x32xf32> to vector<8xf32>
    %57 = vector.shape_cast %56 : vector<8xf32> to vector<8x1xf32>
    %cst_29 = arith.constant 3.200000e+01 : f32
    %58 = vector.broadcast %cst_29 : f32 to vector<8x1xf32>
    %59 = arith.divf %57, %58 : vector<8x1xf32>
    %60 = vector.broadcast %59 : vector<8x1xf32> to vector<8x32xf32>
    %61 = arith.subf %55, %60 : vector<8x32xf32>
    %62 = arith.mulf %61, %61 : vector<8x32xf32>
    %cst_30 = arith.constant dense<0.000000e+00> : vector<8xf32>
    %63 = vector.multi_reduction <add>, %62, %cst_30 [1] : vector<8x32xf32> to vector<8xf32>
    %64 = vector.shape_cast %63 : vector<8xf32> to vector<8x1xf32>
    %cst_31 = arith.constant 3.200000e+01 : f32
    %65 = vector.broadcast %cst_31 : f32 to vector<8x1xf32>
    %66 = arith.divf %64, %65 : vector<8x1xf32>
    %67 = vector.broadcast %59 : vector<8x1xf32> to vector<8x32xf32>
    %68 = arith.subf %55, %67 : vector<8x32xf32>
    %cst_32 = arith.constant 9.99999974E-6 : f32
    %69 = vector.broadcast %cst_32 : f32 to vector<8x1xf32>
    %70 = arith.addf %66, %69 : vector<8x1xf32>
    %71 = math.rsqrt %70 : vector<8x1xf32>
    %72 = vector.broadcast %71 : vector<8x1xf32> to vector<8x32xf32>
    %73 = arith.mulf %68, %72 : vector<8x32xf32>
    %c0_33 = arith.constant 0 : index
    %c0_34 = arith.constant 0 : index
    %74 = vector.load %arg12[%c0_33, %c0_34] : memref<1x32xf32, #tpu.memory_space<vmem>>, vector<1x32xf32>
    %75 = vector.broadcast %74 : vector<1x32xf32> to vector<8x32xf32>
    %76 = arith.mulf %73, %75 : vector<8x32xf32>
    %c0_35 = arith.constant 0 : index
    %c0_36 = arith.constant 0 : index
    %77 = vector.load %arg13[%c0_35, %c0_36] : memref<1x32xf32, #tpu.memory_space<vmem>>, vector<1x32xf32>
    %78 = vector.broadcast %77 : vector<1x32xf32> to vector<8x32xf32>
    %79 = arith.addf %76, %78 : vector<8x32xf32>
    %80 = arith.truncf %79 : vector<8x32xf32> to vector<8x32xbf16>
    %c0_37 = arith.constant 0 : index
    %c0_38 = arith.constant 0 : index
    %81 = vector.load %arg14[%c0_37, %c0_38] : memref<32x64xbf16, #tpu.memory_space<vmem>>, vector<32x64xbf16>
    %cst_39 = arith.constant dense<0.000000e+00> : vector<8x64xf32>
    %82 = tpu.matmul %80, %81, %cst_39 {dimension_numbers = #tpu.dot_dimension_numbers<[1], [0], [0], [1], [0, 0, 1, 1], [], []>} : vector<8x32xbf16>, vector<32x64xbf16>, vector<8x64xf32> -> vector<8x64xf32>
    %c0_40 = arith.constant 0 : index
    %c0_41 = arith.constant 0 : index
    %83 = vector.load %arg15[%c0_40, %c0_41] : memref<1x64xf32, #tpu.memory_space<vmem>>, vector<1x64xf32>
    %84 = vector.broadcast %83 : vector<1x64xf32> to vector<8x64xf32>
    %85 = arith.addf %82, %84 : vector<8x64xf32>
    %cst_42 = arith.constant 0.000000e+00 : f32
    %86 = vector.broadcast %cst_42 : f32 to vector<8x64xf32>
    %87 = arith.maximumf %85, %86 : vector<8x64xf32>
    %88 = arith.truncf %87 : vector<8x64xf32> to vector<8x64xbf16>
    %c0_43 = arith.constant 0 : index
    %c0_44 = arith.constant 0 : index
    %89 = vector.load %arg16[%c0_43, %c0_44] : memref<64x32xbf16, #tpu.memory_space<vmem>>, vector<64x32xbf16>
    %cst_45 = arith.constant dense<0.000000e+00> : vector<8x32xf32>
    %90 = tpu.matmul %88, %89, %cst_45 {dimension_numbers = #tpu.dot_dimension_numbers<[1], [0], [0], [1], [0, 0, 1, 1], [], []>} : vector<8x64xbf16>, vector<64x32xbf16>, vector<8x32xf32> -> vector<8x32xf32>
    %c0_46 = arith.constant 0 : index
    %c0_47 = arith.constant 0 : index
    %91 = vector.load %arg17[%c0_46, %c0_47] : memref<1x32xf32, #tpu.memory_space<vmem>>, vector<1x32xf32>
    %92 = vector.broadcast %91 : vector<1x32xf32> to vector<8x32xf32>
    %93 = arith.addf %90, %92 : vector<8x32xf32>
    %94 = arith.addf %93, %79 : vector<8x32xf32>
    %cst_48 = arith.constant dense<0.000000e+00> : vector<8xf32>
    %95 = vector.multi_reduction <add>, %94, %cst_48 [1] : vector<8x32xf32> to vector<8xf32>
    %96 = vector.shape_cast %95 : vector<8xf32> to vector<8x1xf32>
    %cst_49 = arith.constant 3.200000e+01 : f32
    %97 = vector.broadcast %cst_49 : f32 to vector<8x1xf32>
    %98 = arith.divf %96, %97 : vector<8x1xf32>
    %99 = vector.broadcast %98 : vector<8x1xf32> to vector<8x32xf32>
    %100 = arith.subf %94, %99 : vector<8x32xf32>
    %101 = arith.mulf %100, %100 : vector<8x32xf32>
    %cst_50 = arith.constant dense<0.000000e+00> : vector<8xf32>
    %102 = vector.multi_reduction <add>, %101, %cst_50 [1] : vector<8x32xf32> to vector<8xf32>
    %103 = vector.shape_cast %102 : vector<8xf32> to vector<8x1xf32>
    %cst_51 = arith.constant 3.200000e+01 : f32
    %104 = vector.broadcast %cst_51 : f32 to vector<8x1xf32>
    %105 = arith.divf %103, %104 : vector<8x1xf32>
    %106 = vector.broadcast %98 : vector<8x1xf32> to vector<8x32xf32>
    %107 = arith.subf %94, %106 : vector<8x32xf32>
    %cst_52 = arith.constant 9.99999974E-6 : f32
    %108 = vector.broadcast %cst_52 : f32 to vector<8x1xf32>
    %109 = arith.addf %105, %108 : vector<8x1xf32>
    %110 = math.rsqrt %109 : vector<8x1xf32>
    %111 = vector.broadcast %110 : vector<8x1xf32> to vector<8x32xf32>
    %112 = arith.mulf %107, %111 : vector<8x32xf32>
    %c0_53 = arith.constant 0 : index
    %c0_54 = arith.constant 0 : index
    %113 = vector.load %arg18[%c0_53, %c0_54] : memref<1x32xf32, #tpu.memory_space<vmem>>, vector<1x32xf32>
    %114 = vector.broadcast %113 : vector<1x32xf32> to vector<8x32xf32>
    %115 = arith.mulf %112, %114 : vector<8x32xf32>
    %c0_55 = arith.constant 0 : index
    %c0_56 = arith.constant 0 : index
    %116 = vector.load %arg19[%c0_55, %c0_56] : memref<1x32xf32, #tpu.memory_space<vmem>>, vector<1x32xf32>
    %117 = vector.broadcast %116 : vector<1x32xf32> to vector<8x32xf32>
    %118 = arith.addf %115, %117 : vector<8x32xf32>
    %c0_57 = arith.constant 0 : index
    %c0_58 = arith.constant 0 : index
    %119 = vector.load %arg20[%c0_57, %c0_58] : memref<8x32xf32, #tpu.memory_space<vmem>>, vector<8x32xf32>
    tpu.vector_store %arg20[%c0_57, %c0_58], %118 {strides = array<i32>} : memref<8x32xf32, #tpu.memory_space<vmem>>, vector<8x32xf32>,
    return
  }
  func.func @transform_0(%arg0: i32) -> (i32, i32) {
    %c0_i32 = arith.constant 0 : i32
    %c0_i32_0 = arith.constant 0 : i32
    return %arg0, %c0_i32 : i32, i32
  }
  func.func @transform_1(%arg0: i32) -> (i32, i32) {
    %c0_i32 = arith.constant 0 : i32
    %c0_i32_0 = arith.constant 0 : i32
    return %arg0, %c0_i32 : i32, i32
  }
  func.func @transform_2(%arg0: i32) -> (i32, i32) {
    %c0_i32 = arith.constant 0 : i32
    %c0_i32_0 = arith.constant 0 : i32
    return %arg0, %c0_i32 : i32, i32
  }
  func.func @transform_3(%arg0: i32) -> (i32, i32) {
    %c0_i32 = arith.constant 0 : i32
    %c0_i32_0 = arith.constant 0 : i32
    %c0_i32_1 = arith.constant 0 : i32
    return %c0_i32, %c0_i32_0 : i32, i32
  }
  func.func @transform_4(%arg0: i32) -> (i32, i32) {
    %c0_i32 = arith.constant 0 : i32
    %c0_i32_0 = arith.constant 0 : i32
    %c0_i32_1 = arith.constant 0 : i32
    return %c0_i32, %c0_i32_0 : i32, i32
  }
  func.func @transform_5(%arg0: i32) -> (i32, i32) {
    %c0_i32 = arith.constant 0 : i32
    %c0_i32_0 = arith.constant 0 : i32
    %c0_i32_1 = arith.constant 0 : i32
    return %c0_i32, %c0_i32_0 : i32, i32
  }
  func.func @transform_6(%arg0: i32) -> (i32, i32) {
    %c0_i32 = arith.constant 0 : i32
    %c0_i32_0 = arith.constant 0 : i32
    %c0_i32_1 = arith.constant 0 : i32
    return %c0_i32, %c0_i32_0 : i32, i32
  }
  func.func @transform_7(%arg0: i32) -> (i32, i32) {
    %c0_i32 = arith.constant 0 : i32
    %c0_i32_0 = arith.constant 0 : i32
    %c0_i32_1 = arith.constant 0 : i32
    return %c0_i32, %c0_i32_0 : i32, i32
  }
  func.func @transform_8(%arg0: i32) -> (i32, i32) {
    %c0_i32 = arith.constant 0 : i32
    %c0_i32_0 = arith.constant 0 : i32
    %c0_i32_1 = arith.constant 0 : i32
    return %c0_i32, %c0_i32_0 : i32, i32
  }
  func.func @transform_9(%arg0: i32) -> (i32, i32) {
    %c0_i32 = arith.constant 0 : i32
    %c0_i32_0 = arith.constant 0 : i32
    %c0_i32_1 = arith.constant 0 : i32
    return %c0_i32, %c0_i32_0 : i32, i32
  }
  func.func @transform_10(%arg0: i32) -> (i32, i32) {
    %c0_i32 = arith.constant 0 : i32
    %c0_i32_0 = arith.constant 0 : i32
    %c0_i32_1 = arith.constant 0 : i32
    return %c0_i32, %c0_i32_0 : i32, i32
  }
  func.func @transform_11(%arg0: i32) -> (i32, i32) {
    %c0_i32 = arith.constant 0 : i32
    %c0_i32_0 = arith.constant 0 : i32
    %c0_i32_1 = arith.constant 0 : i32
    return %c0_i32, %c0_i32_0 : i32, i32
  }
  func.func @transform_12(%arg0: i32) -> (i32, i32) {
    %c0_i32 = arith.constant 0 : i32
    %c0_i32_0 = arith.constant 0 : i32
    %c0_i32_1 = arith.constant 0 : i32
    return %c0_i32, %c0_i32_0 : i32, i32
  }
  func.func @transform_13(%arg0: i32) -> (i32, i32) {
    %c0_i32 = arith.constant 0 : i32
    %c0_i32_0 = arith.constant 0 : i32
    %c0_i32_1 = arith.constant 0 : i32
    return %c0_i32, %c0_i32_0 : i32, i32
  }
  func.func @transform_14(%arg0: i32) -> (i32, i32) {
    %c0_i32 = arith.constant 0 : i32
    %c0_i32_0 = arith.constant 0 : i32
    %c0_i32_1 = arith.constant 0 : i32
    return %c0_i32, %c0_i32_0 : i32, i32
  }
  func.func @transform_15(%arg0: i32) -> (i32, i32) {
    %c0_i32 = arith.constant 0 : i32
    %c0_i32_0 = arith.constant 0 : i32
    %c0_i32_1 = arith.constant 0 : i32
    return %c0_i32, %c0_i32_0 : i32, i32
  }
  func.func @transform_16(%arg0: i32) -> (i32, i32) {
    %c0_i32 = arith.constant 0 : i32
    %c0_i32_0 = arith.constant 0 : i32
    %c0_i32_1 = arith.constant 0 : i32
    return %c0_i32, %c0_i32_0 : i32, i32
  }
  func.func @transform_17(%arg0: i32) -> (i32, i32) {
    %c0_i32 = arith.constant 0 : i32
    %c0_i32_0 = arith.constant 0 : i32
    %c0_i32_1 = arith.constant 0 : i32
    return %c0_i32, %c0_i32_0 : i32, i32
  }
  func.func @transform_18(%arg0: i32) -> (i32, i32) {
    %c0_i32 = arith.constant 0 : i32
    %c0_i32_0 = arith.constant 0 : i32
    %c0_i32_1 = arith.constant 0 : i32
    return %c0_i32, %c0_i32_0 : i32, i32
  }
  func.func @transform_19(%arg0: i32) -> (i32, i32) {
    %c0_i32 = arith.constant 0 : i32
    %c0_i32_0 = arith.constant 0 : i32
    return %arg0, %c0_i32 : i32, i32
  }
}

</mosaic_0001>

<bundles_post_ra>
// kernel: tpu_custom_call.1
= control target key start
LH: loop header
LB: loop body
LE: loop exit
PB: predicated region body
PF: predicated region fallthrough
CT: control target
= control target key end

     0   :  { %s3786_s0 = inlined_call_operand.vmem [shape: f32[16,32], index: 0, kind: input, shape index: {}]   ;;  %s3787_s1 = inlined_call_operand.vmem [shape: f32[16,32], index: 1, kind: input, shape index: {}]   ;;  %s3788_s2 = inlined_call_operand.vmem [shape: f32[16,32], index: 2, kind: input, shape index: {}]   ;;  %s3789_s3 = inlined_call_operand.hbm [shape: bf16[32,32], index: 3, kind: input, shape index: {}]   ;;  %s3790_s4 = inlined_call_operand.vmem [shape: f32[1,32], index: 4, kind: input, shape index: {}]   ;;  %s3791_s5 = inlined_call_operand.hbm [shape: bf16[32,32], index: 5, kind: input, shape index: {}]   ;;  %s3792_s6 = inlined_call_operand.hbm [shape: f32[1,32], index: 6, kind: input, shape index: {}]   ;;  %s3793_s7 = inlined_call_operand.hbm [shape: bf16[32,32], index: 7, kind: input, shape index: {}]   ;;  %s3794_s8 = inlined_call_operand.hbm [shape: f32[1,32], index: 8, kind: input, shape index: {}]   ;;  %s3795_s9 = inlined_call_operand.vmem [shape: bf16[32,32], index: 9, kind: input, shape index: {}]   ;;  %s3796_s10 = inlined_call_operand.hbm [shape: f32[1,32], index: 10, kind: input, shape index: {}]   ;;  %s3797_s11 = inlined_call_operand.hbm [shape: f32[1,32], index: 11, kind: input, shape index: {}]   ;;  %s3798_s12 = inlined_call_operand.hbm [shape: f32[1,32], index: 12, kind: input, shape index: {}]   ;;  %s3799_s13 = inlined_call_operand.vmem [shape: bf16[32,64], index: 13, kind: input, shape index: {}]   ;;  %s3800_s14 = inlined_call_operand.vmem [shape: f32[1,64], index: 14, kind: input, shape index: {}]   ;;  %s3801_s15 = inlined_call_operand.vmem [shape: bf16[64,32], index: 15, kind: input, shape index: {}]   ;;  %s3802_s16 = inlined_call_operand.vmem [shape: f32[1,32], index: 16, kind: input, shape index: {}]   ;;  %s3803_s17 = inlined_call_operand.vmem [shape: f32[1,32], index: 17, kind: input, shape index: {}]   ;;  %s3804_s18 = inlined_call_operand.vmem [shape: f32[1,32], index: 18, kind: input, shape index: {}]   ;;  %s3805_s19 = inlined_call_operand.hbm [shape: f32[16,32], index: 19, kind: output, shape index: {}]  }
   0x1   :  { %3822 = sst [smem:[#allocation31_spill]] %s3786_s0 }
   0x2   :  { %3823 = sst [smem:[#allocation32_spill]] %s3787_s1 }
   0x3   :  { %3824 = sst [smem:[#allocation33_spill]] %s3788_s2 }
   0x4   :  { %3825 = sst [smem:[#allocation34_spill]] %s3789_s3 }
   0x5   :  { %3826 = sst [smem:[#allocation35_spill]] %s3791_s5 }
   0x6   :  { %3827 = sst [smem:[#allocation36_spill]] %s3803_s17 }
   0x7   :  { %3828 = sst [smem:[#allocation37_spill]] %s3804_s18 }
   0x8   :  { %3829 = sst [smem:[#allocation38_spill]] %s3805_s19 }
   0x9   :  { %24 = vsyncpa [#allocation3], 0 }
   0xa   :  { %25 = vsyncpa [#allocation6], 0 }
   0xb   :  { %26 = vsyncpa [#allocation9], 0 }
   0xc   :  { %27 = vsyncpa [#allocation12], 0 }
   0xd   :  { %28 = vsyncpa [#allocation15], 0 }
   0xe   :  { %29 = vsyncpa [#allocation4], 0 }
   0xf   :  { %31 = vsyncpa [#allocation4 + $0x1], 0  ;;  %s3230_s0 = smov 0   ;;  %s3232_s30 = smov 0  }
  0x10   :  { %s3234_s20 = smov 0   ;;  %s3236_s21 = smov 0  }
  0x11 LB: > { %3830 = sst [smem:[#allocation23_spill]] %s3094_s0  ;;  %s3251_s1 = sadd.s32 4294967295, %s3106_s21   ;;  %s3106_s21 = sphi %s3236_s21, %s3872_s21   ;;  %s3102_s20 = sphi %s3234_s20, %s3875_s20   ;;  %s3098_s30 = sphi %s3232_s30, %s3874_s30   ;;  %s3094_s0 = sphi %s3230_s0, %s3873_s0  }
  0x12   : > { %3831 = sst [smem:[#allocation24_spill]] %s3098_s30  ;;  %s2417_s22 = sadd.s32 4294967294, %s3106_s21  }
  0x13   : > { %3832 = sst [smem:[#allocation25_spill]] %s3102_s20  ;;  %s3255_s2 = sadd.s32 1, %s3106_s21  }
  0x14   : > { %3833 = sst [smem:[#allocation26_spill]] %s3106_s21  ;;  %s458_s23 = sadd.s32 1, %s3102_s20 }
  0x15   : > { %3834 = sst [smem:[#allocation27_spill]] %s3255_s2  ;;  %s455_s24 = ssub.s32 %s3106_s21, %s3255_s2 }
  0x16   : > { %p468_p0 = scmp.ne.s32.totalorder %s3102_s20, %s3098_s30  ;;  %p456_p1 = scmp.eq.s32.totalorder %s455_s24, 0 }
  0x17   : > { %p469_p2 = scmp.eq.s32.totalorder %s3251_s1, 1  ;;  %p474_p3 = scmp.ne.s32.totalorder %s3098_s30, %s3094_s0 }
  0x18   : > { %p475_p4 = scmp.eq.s32.totalorder %s2417_s22, 1  ;;  %p2418_p7 = scmp.ge.s32.totalorder %s3106_s21, 1 }
  0x19   : > { %s3266_s25 = scalar_select %p456_p1, %s3102_s20, %s458_s23  }
  0x1a   : > { %p3268_p5 = por %p469_p2, %p468_p0  ;;  %p3272_p6 = por %p475_p4, %p474_p3 }
  0x1b   : > { %3835 = sst [smem:[#allocation28_spill]] %s3266_s25  ;;  %p482_p8 = scmp.lt.s32.totalorder %s3106_s21, 3 }
  0x1c   : > { %s3836_s3 = scalar_select %p3268_p5, 1, 0 }
  0x1d   : > { %s3838_s26 = scalar_select %p3272_p6, 1, 0 }
  0x1e   : > { %3837 = sst [smem:[#allocation29_spill]] %s3836_s3  ;;  %p3814_p9 = scmp.eq.s32.totalorder %s3251_s1, 0 }
  0x1f   : > { %3839 = sst [smem:[#allocation30_spill]] %s3838_s26  ;;  %p3279_p10 = pnand %p2418_p7, %p482_p8 }
  0x20   : > { %s3108_s28 = smov [#allocation5]   ;;  %s3109_s23 = smov [#allocation8]  }
  0x21   : > { %s3840_s27 = scalar_select %p3279_p10, 1, 0 }
  0x22   : > { %p2667_p11 = pneg %p3279_p10  ;;  %s510_s29 = sshll.u32 %s3108_s28, 4  ;;  %s3285_s29 = int_to_ptr.vmem [resolvable:$true] %s510_s29 }
  0x23   : > { %s534_s24 = sshll.u32 %s3109_s23, 4  ;;  %s3110_s25 = smov [#allocation11]   ;;  %s3293_s24 = int_to_ptr.vmem [resolvable:$true] %s534_s24 }
  0x24   : > { %p3289_p12 = pnand %p3814_p9, %p2667_p11  ;;  %s3295_s20 = sshll.u32 %s3110_s25, 4  ;;  %s563_s20 = int_to_ptr.vmem [resolvable:$true] %s3295_s20 }
  0x25   : > { %s3842_s5 = sld [smem:[#allocation35_spill]] }
  0x26   : > { %p3305_p0 = pneg %p3289_p12 }
  0x2b   : > { %s2800_s0 = scalar_lea.hbm %s3842_s5, 256 }
  0x2c   : > { %p2801_p13 = scmp.ne.s32.totalorder %s3842_s5, %s2800_s0  ;;  %p2807_p3 = scmp.lt.u32.totalorder %s2800_s0, %s3842_s5 }
  0x2e   : > { %p2803_p1 = pnand %p3305_p0, %p2801_p13 }
  0x30   : > { %p2804_p2 = pneg %p2803_p1 }
  0x32   : > { %p2809_p4 = pnand %p2807_p3, %p2804_p2 }
  0x34   : > { %2812 = shalt.err (!%p2809_p4)
}
  0x35   : > { %s2813_s21 = scalar_lea.vmem %s3285_s29, 256  ;;  %p2821_p9 = scmp.lt.s32.totalorder %s3285_s29, %s3285_s29 }
  0x36   : > { %p2814_p7 = scmp.ne.s32.totalorder %s3285_s29, %s2813_s21  ;;  %p2822_p6 = scmp.lt.s32.totalorder %s2813_s21, %s2813_s21 }
  0x38   : > { %p2816_p8 = pnand %p2814_p7, %p3305_p0  ;;  %p2823_p13 = por %p2822_p6, %p2821_p9 }
  0x3a   : > { %p2817_p11 = pneg %p2816_p8 }
  0x3c   : > { %p2824_p1 = pnand %p2823_p13, %p2817_p11 }
  0x3e   : > { %2827 = shalt.err (!%p2824_p1)
}
  0x3f   : > { %s3820_s2 = smov 64   ;;  %s3821_s0 = smov 4  }
  0x40   : > { %2673 = dma.hbm_to_vmem [thread:$0]  (!%p3289_p12), %s3842_s5, 256, %s3285_s29, [#allocation6], %s3820_s2, %s3820_s2, %s3821_s0  }
  0x41   : > { %s2828_s21 = scalar_lea.hbm %s3793_s7, 256 }
  0x42   : > { %p2829_p6 = scmp.ne.s32.totalorder %s3793_s7, %s2828_s21  ;;  %p2835_p3 = scmp.lt.u32.totalorder %s2828_s21, %s3793_s7 }
  0x44   : > { %p2831_p9 = pnand %p2829_p6, %p3305_p0 }
  0x46   : > { %p2832_p2 = pneg %p2831_p9 }
  0x48   : > { %p2837_p4 = pnand %p2835_p3, %p2832_p2 }
  0x4a   : > { %2840 = shalt.err (!%p2837_p4)
}
  0x4b   : > { %s2841_s29 = scalar_lea.vmem %s3293_s24, 256  ;;  %p2849_p13 = scmp.lt.s32.totalorder %s3293_s24, %s3293_s24 }
  0x4c   : > { %p2842_p7 = scmp.ne.s32.totalorder %s3293_s24, %s2841_s29  ;;  %p2850_p1 = scmp.lt.s32.totalorder %s2841_s29, %s2841_s29 }
  0x4e   : > { %p2844_p8 = pnand %p2842_p7, %p3305_p0  ;;  %p2851_p6 = por %p2850_p1, %p2849_p13 }
  0x50   : > { %p2845_p11 = pneg %p2844_p8 }
  0x52   : > { %p2852_p9 = pnand %p2851_p6, %p2845_p11 }
  0x54   : > { %2855 = shalt.err (!%p2852_p9)
}
  0x55   : > { %2679 = dma.hbm_to_vmem [thread:$0]  (!%p3289_p12), %s3793_s7, 256, %s3293_s24, [#allocation9], %s3820_s2, %s3820_s2, %s3821_s0  }
  0x56   : > { %s2856_s26 = scalar_lea.hbm %s3796_s10, 16 }
  0x57   : > { %p2857_p2 = scmp.ne.s32.totalorder %s3796_s10, %s2856_s26  ;;  %p2863_p7 = scmp.lt.u32.totalorder %s2856_s26, %s3796_s10 }
  0x59   : > { %p2859_p3 = pnand %p2857_p2, %p3305_p0 }
  0x5b   : > { %p2860_p4 = pneg %p2859_p3 }
  0x5d   : > { %p2865_p8 = pnand %p2863_p7, %p2860_p4 }
  0x5f   : > { %2868 = shalt.err (!%p2865_p8)
}
  0x60   : > { %s2869_s29 = scalar_lea.vmem %s563_s20, 16  ;;  %s2876_s24 = scalar_lea.vmem %s563_s20, 32 }
  0x61   : > { %p2870_p11 = scmp.ne.s32.totalorder %s563_s20, %s2869_s29  ;;  %p2877_p6 = scmp.lt.s32.totalorder %s563_s20, %s563_s20 }
  0x62   : > { %p2878_p9 = scmp.lt.s32.totalorder %s2876_s24, %s2869_s29 }
  0x63   : > { %p2872_p13 = pnand %p2870_p11, %p3305_p0 }
  0x64   : > { %p2879_p5 = por %p2878_p9, %p2877_p6 }
  0x65   : > { %p2873_p1 = pneg %p2872_p13 }
  0x67   : > { %p2880_p10 = pnand %p2879_p5, %p2873_p1 }
  0x69   : > { %2883 = shalt.err (!%p2880_p10)
}
  0x6a   : > { %2685 = dma.hbm_to_vmem [thread:$0]  (!%p3289_p12), %s3796_s10, 16, %s563_s20, [#allocation12]  }
  0x6b   : > { %s3113_s30 = smov [#allocation2]   ;;  %s3114_s26 = smov [#allocation7]  }
  0x6c   : > { %s494_s3 = sshll.u32 %s3113_s30, 4  ;;  %s524_s28 = sshll.u32 %s3114_s26, 4  ;;  %s495_s3 = int_to_ptr.vmem [resolvable:$true] %s494_s3  ;;  %s525_s28 = int_to_ptr.vmem [resolvable:$true] %s524_s28 }
  0x6d   : > { %s3844_s21 = sld [smem:[#allocation34_spill]] }
  0x73   : > { %s3845_s2 = smov %s3844_s21  ;;  %s2884_s0 = scalar_lea.hbm %s3844_s21, 256 }
  0x74   : > { %p2885_p5 = scmp.ne.s32.totalorder %s3845_s2, %s2884_s0  ;;  %p2891_p3 = scmp.lt.u32.totalorder %s2884_s0, %s3845_s2 }
  0x76   : > { %p2887_p10 = pnand %p2885_p5, %p3305_p0 }
  0x78   : > { %p2888_p2 = pneg %p2887_p10 }
  0x7a   : > { %p2893_p4 = pnand %p2891_p3, %p2888_p2 }
  0x7c   : > { %2896 = shalt.err (!%p2893_p4)
}
  0x7d   : > { %s2897_s20 = scalar_lea.vmem %s495_s3, 256  ;;  %p2905_p13 = scmp.lt.s32.totalorder %s495_s3, %s495_s3 }
  0x7e   : > { %p2898_p7 = scmp.ne.s32.totalorder %s495_s3, %s2897_s20  ;;  %p2906_p1 = scmp.lt.s32.totalorder %s2897_s20, %s2897_s20 }
  0x80   : > { %p2900_p8 = pnand %p2898_p7, %p3305_p0  ;;  %p2907_p6 = por %p2906_p1, %p2905_p13 }
  0x82   : > { %p2901_p11 = pneg %p2900_p8 }
  0x84   : > { %p2908_p9 = pnand %p2907_p6, %p2901_p11 }
  0x86   : > { %2911 = shalt.err (!%p2908_p9)
}
  0x87   : > { %s3846_s18 = smov 4   ;;  %s3847_s30 = smov 64  }
  0x88   : > { %2670 = dma.hbm_to_vmem [thread:$0]  (!%p3289_p12), %s3845_s2, 256, %s495_s3, [#allocation3], %s3847_s30, %s3847_s30, %s3846_s18  }
  0x89   : > { %s2912_s25 = scalar_lea.hbm %s3792_s6, 16 }
  0x8a   : > { %p2913_p5 = scmp.ne.s32.totalorder %s3792_s6, %s2912_s25  ;;  %p2919_p3 = scmp.lt.u32.totalorder %s2912_s25, %s3792_s6 }
  0x8c   : > { %p2915_p10 = pnand %p2913_p5, %p3305_p0 }
  0x8e   : > { %p2916_p2 = pneg %p2915_p10 }
  0x90   : > { %p2921_p4 = pnand %p2919_p3, %p2916_p2 }
  0x92   : > { %2924 = shalt.err (!%p2921_p4)
}
  0x93   : > { %s2925_s20 = scalar_lea.vmem %s525_s28, 16  ;;  %s2932_s3 = scalar_lea.vmem %s525_s28, 32 }
  0x94   : > { %p2926_p7 = scmp.ne.s32.totalorder %s525_s28, %s2925_s20  ;;  %p2933_p13 = scmp.lt.s32.totalorder %s525_s28, %s525_s28 }
  0x95   : > { %p2934_p1 = scmp.lt.s32.totalorder %s2932_s3, %s2925_s20 }
  0x96   : > { %p2928_p8 = pnand %p2926_p7, %p3305_p0 }
  0x97   : > { %p2935_p6 = por %p2934_p1, %p2933_p13 }
  0x98   : > { %p2929_p11 = pneg %p2928_p8 }
  0x9a   : > { %p2936_p9 = pnand %p2935_p6, %p2929_p11 }
  0x9c   : > { %2939 = shalt.err (!%p2936_p9)
}
  0x9d   : > { %2676 = dma.hbm_to_vmem [thread:$0]  (!%p3289_p12), %s3792_s6, 16, %s525_s28, [#allocation6]  }
  0x9e   : > { %s3115_s5 = smov [#allocation10]   ;;  %s3116_s26 = smov [#allocation13]  }
  0x9f   : > { %s548_s0 = sshll.u32 %s3115_s5, 4  ;;  %s573_s23 = sshll.u32 %s3116_s26, 4  ;;  %s549_s0 = int_to_ptr.vmem [resolvable:$true] %s548_s0  ;;  %s574_s23 = int_to_ptr.vmem [resolvable:$true] %s573_s23 }
  0xa0   : > { %s2940_s29 = scalar_lea.hbm %s3794_s8, 16 }
  0xa1   : > { %p2941_p5 = scmp.ne.s32.totalorder %s3794_s8, %s2940_s29  ;;  %p2947_p3 = scmp.lt.u32.totalorder %s2940_s29, %s3794_s8 }
  0xa3   : > { %p2943_p10 = pnand %p2941_p5, %p3305_p0 }
  0xa5   : > { %p2944_p2 = pneg %p2943_p10 }
  0xa7   : > { %p2949_p4 = pnand %p2947_p3, %p2944_p2 }
  0xa9   : > { %2952 = shalt.err (!%p2949_p4)
}
  0xaa   : > { %s2953_s28 = scalar_lea.vmem %s549_s0, 16  ;;  %s2960_s18 = scalar_lea.vmem %s549_s0, 32 }
  0xab   : > { %p2954_p7 = scmp.ne.s32.totalorder %s549_s0, %s2953_s28  ;;  %p2961_p13 = scmp.lt.s32.totalorder %s549_s0, %s549_s0 }
  0xac   : > { %p2962_p1 = scmp.lt.s32.totalorder %s2960_s18, %s2953_s28 }
  0xad   : > { %p2956_p8 = pnand %p2954_p7, %p3305_p0 }
  0xae   : > { %p2963_p6 = por %p2962_p1, %p2961_p13 }
  0xaf   : > { %p2957_p11 = pneg %p2956_p8 }
  0xb1   : > { %p2964_p9 = pnand %p2963_p6, %p2957_p11 }
  0xb3   : > { %2967 = shalt.err (!%p2964_p9)
}
  0xb4   : > { %2682 = dma.hbm_to_vmem [thread:$0]  (!%p3289_p12), %s3794_s8, 16, %s549_s0, [#allocation9]  }
  0xb5   : > { %s2968_s21 = scalar_lea.hbm %s3797_s11, 16 }
  0xb6   : > { %p2969_p5 = scmp.ne.s32.totalorder %s3797_s11, %s2968_s21  ;;  %p2975_p3 = scmp.lt.u32.totalorder %s2968_s21, %s3797_s11 }
  0xb8   : > { %p2971_p10 = pnand %p2969_p5, %p3305_p0 }
  0xba   : > { %p2972_p2 = pneg %p2971_p10 }
  0xbc   : > { %p2977_p4 = pnand %p2975_p3, %p2972_p2 }
  0xbe   : > { %2980 = shalt.err (!%p2977_p4)
}
  0xbf   : > { %s2981_s3 = scalar_lea.vmem %s574_s23, 16  ;;  %s2988_s0 = scalar_lea.vmem %s574_s23, 32 }
  0xc0   : > { %p2982_p7 = scmp.ne.s32.totalorder %s574_s23, %s2981_s3  ;;  %p2989_p13 = scmp.lt.s32.totalorder %s574_s23, %s574_s23 }
  0xc1   : > { %p2990_p1 = scmp.lt.s32.totalorder %s2988_s0, %s2981_s3 }
  0xc2   : > { %p2984_p8 = pnand %p2982_p7, %p3305_p0 }
  0xc3   : > { %p2991_p6 = por %p2990_p1, %p2989_p13 }
  0xc4   : > { %p2985_p11 = pneg %p2984_p8 }
  0xc6   : > { %p2992_p9 = pnand %p2991_p6, %p2985_p11 }
  0xc8   : > { %2995 = shalt.err (!%p2992_p9)
}
  0xc9   : > { %2688 = dma.hbm_to_vmem [thread:$0]  (!%p3289_p12), %s3797_s11, 16, %s574_s23, [#allocation12]  }
  0xca   : > { %s3117_s30 = smov [#allocation14]   ;;  %s2996_s21 = scalar_lea.hbm %s3798_s12, 16 }
  0xcb   : > { %s584_s5 = sshll.u32 %s3117_s30, 4  ;;  %p2997_p5 = scmp.ne.s32.totalorder %s3798_s12, %s2996_s21  ;;  %s585_s5 = int_to_ptr.vmem [resolvable:$true] %s584_s5 }
  0xcc   : > { %p3003_p3 = scmp.lt.u32.totalorder %s2996_s21, %s3798_s12 }
  0xcd   : > { %p2999_p10 = pnand %p2997_p5, %p3305_p0 }
  0xcf   : > { %p3000_p2 = pneg %p2999_p10 }
  0xd1   : > { %p3005_p4 = pnand %p3003_p3, %p3000_p2 }
  0xd3   : > { %3008 = shalt.err (!%p3005_p4)
}
  0xd4   : > { %s3009_s23 = scalar_lea.vmem %s585_s5, 16  ;;  %s3016_s3 = scalar_lea.vmem %s585_s5, 32 }
  0xd5   : > { %p3010_p7 = scmp.ne.s32.totalorder %s585_s5, %s3009_s23  ;;  %p3017_p13 = scmp.lt.s32.totalorder %s585_s5, %s585_s5 }
  0xd6   : > { %p3018_p1 = scmp.lt.s32.totalorder %s3016_s3, %s3009_s23 }
  0xd7   : > { %p3012_p8 = pnand %p3010_p7, %p3305_p0 }
  0xd8   : > { %p3019_p6 = por %p3018_p1, %p3017_p13 }
  0xd9   : > { %p3013_p11 = pneg %p3012_p8 }
  0xdb   : > { %p3020_p9 = pnand %p3019_p6, %p3013_p11 }
  0xdd   : > { %3023 = shalt.err (!%p3020_p9)
}
  0xde   : > { %2691 = dma.hbm_to_vmem [thread:$0]  (!%p3289_p12), %s3798_s12, 16, %s585_s5, [#allocation15]  }
  0xdf   : > { %p3848_p5 = scmp.ne.s32.totalorder %s3840_s27, 0 }
  0xe0   : > { %p3849_p10 = scmp.eq.s32.totalorder (!%p3848_p5), %s3251_s1, 0 }
  0xe1   : > { %636 = sbr.rel (%p3848_p5) target bundleno = 2846 (0xb1e), region = 96 }
  0xe8   : > { %3069 = dma.done.wait (%p3849_p10), [#allocation3], 256   ;;  %p3850_p0 = pmov %p3849_p10 }
  0xea   : > { %3071 = vsyncadd (%p3850_p0), [#allocation3], 4294967040  ;;  %p3851_p2 = pmov %p3850_p0 }
  0xeb   : > { %p3852_p3 = pmov %p3850_p0 }
  0xec   : > { %3073 = dma.done.wait (%p3851_p2), [#allocation6], 272  }
  0xed   : > { %3075 = vsyncadd (%p3852_p3), [#allocation6], 4294967024  ;;  %p3853_p4 = pmov %p3850_p0 }
  0xee   : > { %p3854_p12 = pmov %p3850_p0 }
  0xef   : > { %3077 = dma.done.wait (%p3853_p4), [#allocation9], 272  }
  0xf0   : > { %3079 = vsyncadd (%p3854_p12), [#allocation9], 4294967024  ;;  %p3855_p7 = pmov %p3850_p0 }
  0xf1   : > { %p3856_p8 = pmov %p3850_p0 }
  0xf2   : > { %3081 = dma.done.wait (%p3855_p7), [#allocation12], 32  }
  0xf3   : > { %3083 = vsyncadd (%p3856_p8), [#allocation12], 4294967264  ;;  %p3857_p11 = pmov %p3850_p0 }
  0xf4   : > { %p3858_p13 = pmov %p3850_p0 }
  0xf5   : > { %3085 = dma.done.wait (%p3857_p11), [#allocation15], 16  }
  0xf6   : > { %3087 = vsyncadd (%p3858_p13), [#allocation15], 4294967280  ;;  %p727_p1 = scmp.lt.s32.totalorder %s3251_s1, 1  ;;  %v3118_v0 = vmov 0.0   ;;  %vm3119_vm0 = vmmov 0   ;;  %v2766_v1 = vld [vmem:[#allocation5] sm:$0xff]   ;;  %v960_v27 = vlaneseq }
  0xf7   : > { %2541 = vmatprep.subr.bf16.mxu1 %v3118_v0  ;;  %2533 = vmatprep.subr.bf16.mxu0 %v3118_v0  ;;  %s3859_s30 = sld [smem:[#allocation32_spill]]  ;;  %v2767_v2 = vld [vmem:[#allocation2] sm:$0xff]   ;;  %s3860_s21 = sld [smem:[#allocation31_spill]]  ;;  %v2768_v3 = vld [vmem:[#allocation5 + $0x8] sm:$0xff]   ;;  %vm767_vm1 = vcmask 261120   ;;  %v2769_v5 = vld [vmem:[#allocation2 + $0x8] sm:$0xff]  }
  0xf8   : > { %2545 = vmatprep.mubr.msk.bf16.mxu1 %vm3119_vm0, %v3118_v0  ;;  %s728_s19 = scalar_select %p727_p1, %s3251_s1, 1  ;;  %2537 = vmatprep.mubr.msk.bf16.mxu0 %vm3119_vm0, %v3118_v0  ;;  %v2445_v9 = vld [vmem:[#allocation7] ss:$0 sm:$0xff]  ;;  %v2770_v21 = vld [vmem:[#allocation8] sm:$0xff]   ;;  %v2771_v22 = vld [vmem:[#allocation8 + $0x8] sm:$0xff]   ;;  %v961_v31 = vshrl.u32 %v960_v27, 7 }
  0xf9   : > { %2542 = vmatpush3.bf16.msra.mxu1 %v2766_v1  ;;  %2534 = vmatpush3.bf16.msra.mxu0 %v2767_v2  ;;  %v2441_v11 = vld [vmem:[%s3790_s4] ss:$0 sm:$0xff]  ;;  %s3120_s20 = smov 104   ;;  %s3121_s23 = smov 120   ;;  %v3123_v25 = vmov 1983009808  }
  0xfa   : > { %s3497_s27 = sshll.u32 %s728_s19, 3  ;;  %2543 = vmatprep.subr.bf16.mxu1 %v3118_v0  ;;  %2535 = vmatprep.subr.bf16.mxu0 %v3118_v0  ;;  %s3122_s3 = smov 112   ;;  %v958_v26 = vunpack.c.l.s4 %v3123_v25  ;;  %v3124_v28 = vmov 1934713408   ;;  %vm1389_vm2 = vcmask 64512   ;;  %vm1625_vm3 = vcmask 1043456  }
  0xfb   : > { %s3861_s19 = sld [smem:[#allocation33_spill]]  ;;  %v990_v29 = vunpack.c.l.s4 %v3124_v28  ;;  %s3126_s26 = smov 16   ;;  %vm1956_vm4 = vcmask 130048   ;;  %vm1958_vm5 = vcmask 195584   ;;  %vm2166_vm6 = vcmask 523264  }
  0xfc   : > { %v959_v30 = vunpack.c.0.s8 %v958_v26  ;;  %s3127_s25 = smov 8   ;;  %s3863_s17 = sld [smem:[#allocation29_spill]] }
  0xfd   : > { %s734_s5 = scalar_lea.vmem %s3859_s30, %s3497_s27  ;;  %s730_s29 = scalar_lea.vmem %s3860_s21, %s3497_s27  ;;  %2544 = vmatpush3.bf16.msra.mxu1 %v2768_v3  ;;  %2536 = vmatpush3.bf16.msra.mxu0 %v2769_v5  ;;  %v991_v34 = vunpack.c.0.s8 %v990_v29 }
  0xfe   : > { %v741_v4 = vld [vmem:[%s734_s5] sm:$0xff]  ;;  %2557 = vmatprep.subr.bf16.mxu1 %v3118_v0  ;;  %2549 = vmatprep.subr.bf16.mxu0 %v3118_v0  ;;  %v3539_v35 = vsub.s32 %v959_v30, %v961_v31  ;;  %s3128_s21 = smov 24  }
  0xff   : > { %v3509_v6 = vld [vmem:[%s730_s29] sm:$0xff]  ;;  %v811_v7 = vpack.c.bf16 %v741_v4, %v741_v4  ;;  %v3541_v42 = vsub.s32 %v991_v34, %v961_v31 }
 0x100   : > { %v743_v8 = vpack.c.bf16 %v3509_v6, %v3509_v6 }
 0x101   : > { %2546 = vmatmul.mubr.msk.bf16.vlgmr.msra.gmra.mrb[0].mxu1 %vm767_vm1, %v811_v7  ;;  %s738_s22 = scalar_lea.vmem %s3861_s19, %s3497_s27  ;;  %s3865_s19 = sld [smem:[#allocation37_spill]] }
 0x102   : > { %2538 = vmatmul.mubr.msk.bf16.vlgmr.msra.gmra.mrb[0].mxu0 %vm767_vm1, %v743_v8  ;;  %2559 = vmatprep.mubr.msk.bf16.mxu1 %vm3119_vm0, %v3118_v0  ;;  %v742_v23 = vld [vmem:[%s738_s22] sm:$0xff]  ;;  %s2494_s22 = sshll.u32 %s3251_s1, 7  ;;  %p3867_p9 = scmp.ne.s32.totalorder %s3863_s17, 0 }
 0x103   : > { %2553 = vmatprep.mubr.msk.bf16.mxu0 %vm3119_vm0, %v3118_v0  ;;  %2550 = vmatpush3.bf16.msra.mxu0 %v2770_v21  ;;  %v878_v24 = vpack.c.bf16 %v742_v23, %v742_v23  ;;  %s3129_s1 = smov [#allocation16]  }
 0x104   : > { %2551 = vmatprep.subr.bf16.mxu0 %v3118_v0 }
 0x107   : > { %2552 = vmatpush3.bf16.msra.mxu0 %v2771_v22 }
 0x108   : > { %2563 = vmatprep.subr.bf16.mxu0 %v3118_v0 }
 0x10a   : > { %2554 = vmatmul.mubr.msk.bf16.vlgmr.msra.gmra.mrb[4].mxu0 %vm767_vm1, %v878_v24 }
 0x10b   : > { %2565 = vmatprep.mubr.msk.bf16.mxu0 %vm3119_vm0, %v3118_v0 }
 0x1d4   : > { %v872_v10 = vpop.f32.mrb[0].mxu1 }
 0x1d5   : > { %v873_v12 = vadd.f32 %v2445_v9, %v872_v10  ;;  %v2547_v13 = vpop.f32.mrb[1].mxu1  ;;  %v805_v14 = vpop.f32.mrb[0].mxu0 }
 0x1d6   : > { %v875_v15 = vpop.f32.mrb[2].mxu1  ;;  %v2539_v16 = vpop.f32.mrb[1].mxu0  ;;  %v806_v18 = vadd.f32 %v2441_v11, %v805_v14 }
 0x1d7   : > { %1038 = vrot.lane.b32.xlu1 %v873_v12, %s3120_s20  ;;  %1032 = vrot.lane.b32.xlu0 %v873_v12, %s3121_s23  ;;  %v2548_v17 = vpop.f32.mrb[3].mxu1  ;;  %v808_v19 = vpop.f32.mrb[2].mxu0 }
 0x1d8   : > { %v2540_v20 = vpop.f32.mrb[3].mxu0 }
 0x1db   : > { %1035 = vrot.lane.b32.xlu0 %v873_v12, %s3122_s3  ;;  %946 = vrot.lane.b32.xlu1 %v806_v18, %s3121_s23 }
 0x1df   : > { %949 = vrot.lane.b32.xlu0 %v806_v18, %s3122_s3  ;;  %952 = vrot.lane.b32.xlu1 %v806_v18, %s3120_s20 }
 0x249   : > { %v1039_v32 = vpop.permute.xlu1 %1038  ;;  %v1033_v33 = vpop.permute.xlu0 %1032 }
 0x24a   : > { %v1057_v36 = vcombine.low %v1033_v33, %v1039_v32  ;;  %v1058_v37 = vcombine.high %v1033_v33, %v1039_v32 }
 0x24c   : > { %v1065_v43 = vrot.slane %v1057_v36, %v3539_v35  ;;  %v1072_v44 = vrot.slane %v1058_v37, %v3539_v35 }
 0x24d   : > { %v1036_v38 = vpop.permute.xlu0 %1035  ;;  %v947_v39 = vpop.permute.xlu1 %946 }
 0x24e   : > { %v1041_v40 = vcombine.low %v873_v12, %v1036_v38  ;;  %v1042_v41 = vcombine.high %v873_v12, %v1036_v38 }
 0x250   : > { %v1049_v45 = vrot.slane %v1041_v40, %v3539_v35  ;;  %v1056_v46 = vrot.slane %v1042_v41, %v3539_v35 }
 0x251   : > { %v950_v47 = vpop.permute.xlu0 %949  ;;  %v953_v48 = vpop.permute.xlu1 %952 }
 0x252   : > { %v1073_v49 = vcombine.low %v1049_v45, %v1065_v43  ;;  %v1074_v50 = vcombine.high %v1049_v45, %v1065_v43  ;;  %v1089_v51 = vcombine.low %v1056_v46, %v1072_v44  ;;  %v1090_v52 = vcombine.high %v1056_v46, %v1072_v44 }
 0x253   : > { %v955_v53 = vcombine.low %v806_v18, %v950_v47  ;;  %v956_v54 = vcombine.high %v806_v18, %v950_v47  ;;  %v971_v55 = vcombine.low %v947_v39, %v953_v48  ;;  %v972_v56 = vcombine.high %v947_v39, %v953_v48 }
 0x254   : > { %v1081_v57 = vrot.slane %v1073_v49, %v3541_v42  ;;  %v1088_v58 = vrot.slane %v1074_v50, %v3541_v42  ;;  %v1097_v59 = vrot.slane %v1089_v51, %v3541_v42  ;;  %v1104_v60 = vrot.slane %v1090_v52, %v3541_v42 }
 0x255   : > { %v963_v61 = vrot.slane %v955_v53, %v3539_v35  ;;  %v970_v62 = vrot.slane %v956_v54, %v3539_v35  ;;  %v979_v63 = vrot.slane %v971_v55, %v3539_v35  ;;  %v986_v1 = vrot.slane %v972_v56, %v3539_v35 }
 0x256   : > { %v1105_v2 = vcombine.high %v1081_v57, %v3118_v0  ;;  %v1106_v3 = vcombine.high %v1088_v58, %v3118_v0  ;;  %v1107_v4 = vcombine.high %v1097_v59, %v3118_v0  ;;  %v1108_v5 = vcombine.high %v1104_v60, %v3118_v0 }
 0x257   : > { %v2457_v7 = vpack.c.bf16 %v1097_v59, %v1081_v57  ;;  %v2458_v8 = vpack.c.bf16 %v1104_v60, %v1088_v58  ;;  %v987_v9 = vcombine.low %v963_v61, %v979_v63  ;;  %v988_v10 = vcombine.high %v963_v61, %v979_v63 }
 0x258   : > { %v2459_v11 = vpack.c.bf16 %v1107_v4, %v1105_v2  ;;  %v2460_v12 = vpack.c.bf16 %v1108_v5, %v1106_v3  ;;  %v1003_v13 = vcombine.low %v970_v62, %v986_v1  ;;  %v1004_v14 = vcombine.high %v970_v62, %v986_v1 }
 0x259   : > { %v1272_v15 = vrot.slane %v2457_v7, %v3539_v35  ;;  %v1280_v16 = vrot.slane %v2458_v8, %v3539_v35  ;;  %v995_v17 = vrot.slane %v987_v9, %v3541_v42  ;;  %v1002_v18 = vrot.slane %v988_v10, %v3541_v42  ;;  %v939_v8 = vpop.f32.mrb[4].mxu0 }
 0x25a   : > { %v1297_v19 = vrot.slane %v2459_v11, %v3539_v35  ;;  %v1305_v20 = vrot.slane %v2460_v12, %v3539_v35  ;;  %v1011_v21 = vrot.slane %v1003_v13, %v3541_v42  ;;  %v1018_v22 = vrot.slane %v1004_v14, %v3541_v42  ;;  %v2555_v9 = vpop.f32.mrb[5].mxu0 }
 0x25b   : > { %v1019_v23 = vcombine.high %v995_v17, %v3118_v0  ;;  %v1020_v24 = vcombine.high %v1002_v18, %v3118_v0  ;;  %v1281_v25 = vcombine.low %v1272_v15, %v1280_v16  ;;  %v3125_v45 = vmov 0   ;;  %v942_v10 = vpop.f32.mrb[6].mxu0 }
 0x25c   : > { %v1021_v26 = vcombine.high %v1011_v21, %v3118_v0  ;;  %v1022_v27 = vcombine.high %v1018_v22, %v3118_v0  ;;  %v2453_v28 = vpack.c.bf16 %v1011_v21, %v995_v17  ;;  %v2454_v29 = vpack.c.bf16 %v1018_v22, %v1002_v18  ;;  %v2556_v11 = vpop.f32.mrb[7].mxu0 }
 0x25d   : > { %v1288_v30 = vrot.slane %v1281_v25, %v3541_v42  ;;  %v1306_v31 = vcombine.low %v1297_v19, %v1305_v20 }
 0x25e   : > { %v1210_v32 = vrot.slane %v2453_v28, %v3539_v35  ;;  %v1218_v33 = vrot.slane %v2454_v29, %v3539_v35  ;;  %v2455_v34 = vpack.c.bf16 %v1021_v26, %v1019_v23  ;;  %v2456_v36 = vpack.c.bf16 %v1022_v27, %v1020_v24 }
 0x25f   : > { %v1313_v37 = vrot.slane %v1306_v31, %v3541_v42  ;;  %v1318_v40 = vshrl.u32 %v1288_v30, 16  ;;  %v1289_v50 = vcombine.high %v1288_v30, %v3125_v45 }
 0x260   : > { %v1235_v38 = vrot.slane %v2455_v34, %v3539_v35  ;;  %v1243_v39 = vrot.slane %v2456_v36, %v3539_v35  ;;  %v1219_v41 = vcombine.low %v1210_v32, %v1218_v33  ;;  %v2449_v32 = vld [vmem:[#allocation10] ss:$0 sm:$0xff] }
 0x261   : > { %v1317_v43 = vpack.i.b16 %v1313_v37, %v1288_v30  ;;  %v1319_v44 = vshrl.u32 %v1313_v37, 16  ;;  %v1314_v46 = vcombine.high %v1313_v37, %v3125_v45  ;;  %v1324_v57 = vshrl.u32 %v1289_v50, 16 }
 0x262   : > { %v1244_v47 = vcombine.low %v1235_v38, %v1243_v39  ;;  %v1226_v52 = vrot.slane %v1219_v41, %v3541_v42  ;;  %v940_v33 = vadd.f32 %v2449_v32, %v939_v8 }
 0x263   : > { %v1394_v48 = vsel %vm1389_vm2, %v1317_v43, 0  ;;  %v1320_v49 = vpack.i.b16 %v1319_v44, %v1318_v40  ;;  %v1325_v54 = vshrl.u32 %v1314_v46, 16  ;;  %v1323_v55 = vpack.i.b16 %v1314_v46, %v1289_v50 }
 0x264   : > { %2558 = vmatpush3.bf16.xpose.msra.mxu1 %v1394_v48  ;;  %v1251_v51 = vrot.slane %v1244_v47, %v3541_v42  ;;  %v1256_v59 = vshrl.u32 %v1226_v52, 16  ;;  %v1227_v2 = vcombine.high %v1226_v52, %v3125_v45 }
 0x265   : > { %v1440_v53 = vsel %vm1389_vm2, %v1320_v49, 0  ;;  %2569 = vmatprep.subr.bf16.mxu1 %v3118_v0  ;;  %v1326_v60 = vpack.i.b16 %v1325_v54, %v1324_v57  ;;  %v1486_v61 = vsel %vm1389_vm2, %v1323_v55, 0 }
 0x266   : > { %2564 = vmatpush3.bf16.xpose.msra.mxu0 %v1440_v53  ;;  %v1257_v56 = vshrl.u32 %v1251_v51, 16  ;;  %v1255_v58 = vpack.i.b16 %v1251_v51, %v1226_v52  ;;  %v1252_v63 = vcombine.high %v1251_v51, %v3125_v45  ;;  %v1262_v5 = vshrl.u32 %v1227_v2, 16 }
 0x267   : > { %2575 = vmatprep.subr.bf16.mxu0 %v3118_v0  ;;  %v1532_v1 = vsel %vm1389_vm2, %v1326_v60, 0 }
 0x268   : > { %v1258_v62 = vpack.i.b16 %v1257_v56, %v1256_v59  ;;  %v1263_v3 = vshrl.u32 %v1252_v63, 16  ;;  %v1261_v4 = vpack.i.b16 %v1252_v63, %v1227_v2 }
 0x26a   : > { %v1264_v7 = vpack.i.b16 %v1263_v3, %v1262_v5 }
 0x26b   : > { %2560 = vmatmul.mubr.msk.bf16.vlgmr.msra.gmra.mrb[4].mxu1 %vm1389_vm2, %v1255_v58 }
 0x26c   : > { %2570 = vmatpush3.bf16.xpose.msra.mxu1 %v1486_v61  ;;  %2571 = vmatprep.mubr.msk.bf16.mxu1 %vm3119_vm0, %v3118_v0 }
 0x26d   : > { %2566 = vmatmul.mubr.msk.bf16.vlgmr.msra.gmra.mrb[8].mxu0 %vm1389_vm2, %v1258_v62  ;;  %2581 = vmatprep.subr.bf16.mxu1 %v3118_v0 }
 0x26e   : > { %2576 = vmatpush3.bf16.xpose.msra.mxu0 %v1532_v1  ;;  %2577 = vmatprep.mubr.msk.bf16.mxu0 %vm3119_vm0, %v3118_v0 }
 0x26f   : > { %2587 = vmatprep.subr.bf16.mxu0 %v3118_v0 }
 0x273   : > { %2572 = vmatmul.mubr.msk.bf16.vlgmr.msra.gmra.mrb[8].mxu1 %vm1389_vm2, %v1261_v4 }
 0x274   : > { %2583 = vmatprep.mubr.msk.bf16.mxu1 %vm3119_vm0, %v3118_v0 }
 0x275   : > { %2578 = vmatmul.mubr.msk.bf16.vlgmr.msra.gmra.mrb[12].mxu0 %vm1389_vm2, %v1264_v7 }
 0x276   : > { %2589 = vmatprep.mubr.msk.bf16.mxu0 %vm3119_vm0, %v3118_v0 }
 0x33e   : > { %v1430_v12 = vpop.f32.mrb[4].mxu1 }
 0x33f   : > { %v2561_v13 = vpop.f32.mrb[5].mxu1  ;;  %v1574_v14 = vsel %vm1389_vm2, %v1430_v12, -inf }
 0x340   : > { %1575 = vmax.xlane.f32.xlu0 %v1574_v14  ;;  %v1433_v15 = vpop.f32.mrb[6].mxu1  ;;  %v1476_v16 = vpop.f32.mrb[8].mxu0 }
 0x341   : > { %v2562_v17 = vpop.f32.mrb[7].mxu1  ;;  %v2567_v18 = vpop.f32.mrb[9].mxu0  ;;  %v1577_v19 = vsel %vm1389_vm2, %v1476_v16, -inf }
 0x342   : > { %1578 = vmax.xlane.f32.xlu1 %v1577_v19  ;;  %v1479_v20 = vpop.f32.mrb[10].mxu0 }
 0x343   : > { %v2568_v21 = vpop.f32.mrb[11].mxu0 }
 0x346   : > { %v1522_v22 = vpop.f32.mrb[8].mxu1 }
 0x347   : > { %v2573_v23 = vpop.f32.mrb[9].mxu1  ;;  %v1580_v24 = vsel %vm1389_vm2, %v1522_v22, -inf }
 0x348   : > { %1581 = vmax.xlane.f32.xlu0 %v1580_v24  ;;  %v1525_v25 = vpop.f32.mrb[10].mxu1  ;;  %v1568_v26 = vpop.f32.mrb[12].mxu0 }
 0x349   : > { %v2574_v27 = vpop.f32.mrb[11].mxu1  ;;  %v2579_v28 = vpop.f32.mrb[13].mxu0  ;;  %v1583_v31 = vsel %vm1389_vm2, %v1568_v26, -inf }
 0x34a   : > { %v1571_v29 = vpop.f32.mrb[14].mxu0 }
 0x34b   : > { %v2580_v30 = vpop.f32.mrb[15].mxu0 }
 0x34c   : > { %1584 = vmax.xlane.f32.xlu0 %v1583_v31 }
 0x353   : > { %1118 = vrot.lane.b32.xlu1 %v940_v33, %s3121_s23 }
 0x3cd   : > { %v1576_v34 = vpop.xlane.xlu0 %1575 }
 0x3ce   : > { %v1586_v36 = vsub.f32 %v1430_v12, %v1576_v34 }
 0x3cf   : > { %v1579_v37 = vpop.xlane.xlu1 %1578 }
 0x3d0   : > { %v1590_v38 = vmul.f32 1.442695, %v1586_v36  ;;  %v1587_v39 = vsub.f32 %v1476_v16, %v1579_v37 }
 0x3d2   : > { %2780 = vpow2.f32 %v1590_v38  ;;  %v1592_v40 = vmul.f32 1.442695, %v1587_v39 }
 0x3d3   : > { %v1119_v57 = vpop.permute.xlu1 %1118 }
 0x3d4   : > { %2782 = vpow2.f32 %v1592_v40 }
 0x3d5   : > { %v1582_v47 = vpop.xlane.xlu0 %1581 }
 0x3d6   : > { %v1588_v49 = vsub.f32 %v1522_v22, %v1582_v47 }
 0x3d8   : > { %v1594_v51 = vmul.f32 1.442695, %v1588_v49 }
 0x3d9   : > { %v1585_v48 = vpop.xlane.xlu0 %1584 }
 0x3da   : > { %v1589_v50 = vsub.f32 %v1568_v26, %v1585_v48  ;;  %2784 = vpow2.f32 %v1594_v51 }
 0x3dc   : > { %v3608_v41 = vpop.eup %2780  ;;  %v1596_v52 = vmul.f32 1.442695, %v1589_v50 }
 0x3dd   : > { %v1598_v43 = vsel %vm1389_vm2, %v3608_v41, 0.0 }
 0x3de   : > { %v3612_v44 = vpop.eup %2782  ;;  %1599 = vadd.xlane.f32.xlu1 %v1598_v43  ;;  %2786 = vpow2.f32 %v1596_v52 }
 0x3df   : > { %v1601_v46 = vsel %vm1389_vm2, %v3612_v44, 0.0 }
 0x3e0   : > { %1602 = vadd.xlane.f32.xlu0 %v1601_v46 }
 0x3e4   : > { %v3618_v53 = vpop.eup %2784 }
 0x3e5   : > { %v1604_v55 = vsel %vm1389_vm2, %v3618_v53, 0.0 }
 0x3e8   : > { %v3620_v54 = vpop.eup %2786 }
 0x3e9   : > { %v1607_v56 = vsel %vm1389_vm2, %v3620_v54, 0.0 }
 0x3ef   : > { %1124 = vrot.lane.b32.xlu1 %v940_v33, %s3120_s20 }
 0x3f6   : > { %1121 = vrot.lane.b32.xlu0 %v940_v33, %s3122_s3  ;;  %s3864_s3 = sld [smem:[#allocation36_spill]] }
 0x413   : > { %1605 = vadd.xlane.f32.xlu1 %v1604_v55 }
 0x415   : > { %1608 = vadd.xlane.f32.xlu0 %v1607_v56 }
 0x46b   : > { %v1600_v58 = vpop.xlane.xlu1 %1599 }
 0x46c   : > { %2788 = vrcp.f32 %v1600_v58 }
 0x46d   : > { %v1603_v59 = vpop.xlane.xlu0 %1602 }
 0x46e   : > { %2790 = vrcp.f32 %v1603_v59 }
 0x46f   : > { %v1125_v60 = vpop.permute.xlu1 %1124 }
 0x470   : > { %v1143_v61 = vcombine.low %v1119_v57, %v1125_v60  ;;  %v1144_v62 = vcombine.high %v1119_v57, %v1125_v60 }
 0x471   : > { %v1122_v63 = vpop.permute.xlu0 %1121 }
 0x472   : > { %v1127_v1 = vcombine.low %v940_v33, %v1122_v63  ;;  %v1128_v2 = vcombine.high %v940_v33, %v1122_v63  ;;  %v1151_v3 = vrot.slane %v1143_v61, %v3539_v35  ;;  %v1158_v4 = vrot.slane %v1144_v62, %v3539_v35 }
 0x474   : > { %v1135_v5 = vrot.slane %v1127_v1, %v3539_v35  ;;  %v1142_v7 = vrot.slane %v1128_v2, %v3539_v35 }
 0x476   : > { %v1159_v8 = vcombine.low %v1135_v5, %v1151_v3  ;;  %v1160_v9 = vcombine.high %v1135_v5, %v1151_v3  ;;  %v1175_v10 = vcombine.low %v1142_v7, %v1158_v4  ;;  %v1176_v11 = vcombine.high %v1142_v7, %v1158_v4  ;;  %v2789_v28 = vpop.eup %2788 }
 0x477   : > { %v1614_v34 = vmul.f32 %v2789_v28, %v3608_v41  ;;  %v2772_v28 = vld [vmem:[%s3795_s9] sm:$0xff]  }
 0x478   : > { %v1167_v12 = vrot.slane %v1159_v8, %v3541_v42  ;;  %v1174_v13 = vrot.slane %v1160_v9, %v3541_v42  ;;  %v1183_v14 = vrot.slane %v1175_v10, %v3541_v42  ;;  %v1190_v15 = vrot.slane %v1176_v11, %v3541_v42  ;;  %v2791_v31 = vpop.eup %2790 }
 0x479   : > { %v1615_v43 = vmul.f32 %v2791_v31, %v3612_v44  ;;  %v1618_v41 = vpack.c.bf16 %v1614_v34, %v1614_v34 }
 0x47a   : > { %v1191_v16 = vcombine.high %v1167_v12, %v3118_v0  ;;  %v1192_v17 = vcombine.high %v1174_v13, %v3118_v0  ;;  %v1193_v18 = vcombine.high %v1183_v14, %v3118_v0  ;;  %v1194_v19 = vcombine.high %v1190_v15, %v3118_v0 }
 0x47b   : > { %v2461_v20 = vpack.c.bf16 %v1183_v14, %v1167_v12  ;;  %v2462_v21 = vpack.c.bf16 %v1190_v15, %v1174_v13  ;;  %v1619_v55 = vpack.c.bf16 %v1615_v43, %v1615_v43 }
 0x47c   : > { %v2463_v22 = vpack.c.bf16 %v1193_v18, %v1191_v16  ;;  %v2464_v23 = vpack.c.bf16 %v1194_v19, %v1192_v17 }
 0x47d   : > { %v1334_v24 = vrot.slane %v2461_v20, %v3539_v35  ;;  %v1342_v25 = vrot.slane %v2462_v21, %v3539_v35 }
 0x47e   : > { %v1359_v26 = vrot.slane %v2463_v22, %v3539_v35  ;;  %v1367_v27 = vrot.slane %v2464_v23, %v3539_v35 }
 0x47f   : > { %v1343_v29 = vcombine.low %v1334_v24, %v1342_v25 }
 0x480   : > { %v1368_v30 = vcombine.low %v1359_v26, %v1367_v27 }
 0x481   : > { %v1350_v32 = vrot.slane %v1343_v29, %v3541_v42 }
 0x482   : > { %v1375_v33 = vrot.slane %v1368_v30, %v3541_v42 }
 0x483   : > { %v1351_v36 = vcombine.high %v1350_v32, %v3125_v45  ;;  %v1380_v38 = vshrl.u32 %v1350_v32, 16 }
 0x484   : > { %v1379_v37 = vpack.i.b16 %v1375_v33, %v1350_v32  ;;  %v1381_v39 = vshrl.u32 %v1375_v33, 16  ;;  %v1376_v40 = vcombine.high %v1375_v33, %v3125_v45 }
 0x485   : > { %v1386_v46 = vshrl.u32 %v1351_v36, 16 }
 0x486   : > { %v1627_v47 = vsel %vm1625_vm3, %v1379_v37, 0  ;;  %v1382_v48 = vpack.i.b16 %v1381_v39, %v1380_v38  ;;  %v1385_v49 = vpack.i.b16 %v1376_v40, %v1351_v36  ;;  %v1387_v50 = vshrl.u32 %v1376_v40, 16  ;;  %v2773_v38 = vld [vmem:[%s3795_s9 + $0x8] sm:$0xff]  }
 0x487   : > { %2582 = vmatpush3.bf16.msra.mxu1 %v1627_v47 }
 0x488   : > { %v1673_v51 = vsel %vm1625_vm3, %v1382_v48, 0  ;;  %2593 = vmatprep.subr.bf16.mxu1 %v3118_v0  ;;  %v1388_v52 = vpack.i.b16 %v1387_v50, %v1386_v46  ;;  %v1719_v45 = vsel %vm1625_vm3, %v1385_v49, 0 }
 0x489   : > { %2588 = vmatpush3.bf16.msra.mxu0 %v1673_v51 }
 0x48a   : > { %2584 = vmatmul.mubr.msk.bf16.vlgmr.msra.gmra.mrb[12].mxu1 %vm1389_vm2, %v1618_v41  ;;  %2599 = vmatprep.subr.bf16.mxu0 %v3118_v0  ;;  %v1765_v44 = vsel %vm1625_vm3, %v1388_v52, 0 }
 0x48b   : > { %2594 = vmatpush3.bf16.msra.mxu1 %v1719_v45  ;;  %2595 = vmatprep.mubr.msk.bf16.mxu1 %vm3119_vm0, %v3118_v0 }
 0x48c   : > { %2590 = vmatmul.mubr.msk.bf16.vlgmr.msra.gmra.mrb[16].mxu0 %vm1389_vm2, %v1619_v55  ;;  %2605 = vmatprep.subr.bf16.mxu1 %v3118_v0 }
 0x48d   : > { %2600 = vmatpush3.bf16.msra.mxu0 %v1765_v44  ;;  %2601 = vmatprep.mubr.msk.bf16.mxu0 %vm3119_vm0, %v3118_v0 }
 0x48e   : > { %2613 = vmatprep.subr.bf16.mxu0 %v3118_v0 }
 0x4a0   : > { %v1606_v56 = vpop.xlane.xlu1 %1605 }
 0x4a1   : > { %2792 = vrcp.f32 %v1606_v56 }
 0x4a2   : > { %v1609_v57 = vpop.xlane.xlu0 %1608 }
 0x4a3   : > { %2794 = vrcp.f32 %v1609_v57 }
 0x4ab   : > { %v2793_v58 = vpop.eup %2792 }
 0x4ac   : > { %v1616_v59 = vmul.f32 %v2793_v58, %v3618_v53 }
 0x4ad   : > { %v2795_v60 = vpop.eup %2794 }
 0x4ae   : > { %v1617_v61 = vmul.f32 %v2795_v60, %v3620_v54  ;;  %v1620_v62 = vpack.c.bf16 %v1616_v59, %v1616_v59 }
 0x4b0   : > { %2596 = vmatmul.mubr.msk.bf16.vlgmr.msra.gmra.mrb[16].mxu1 %vm1389_vm2, %v1620_v62  ;;  %v1621_v63 = vpack.c.bf16 %v1617_v61, %v1617_v61 }
 0x4b1   : > { %2609 = vmatprep.mubr.msk.bf16.mxu1 %vm3119_vm0, %v3118_v0  ;;  %2606 = vmatpush3.bf16.msra.mxu1 %v2772_v28 }
 0x4b2   : > { %2602 = vmatmul.mubr.msk.bf16.vlgmr.msra.gmra.mrb[20].mxu0 %vm1389_vm2, %v1621_v63  ;;  %2607 = vmatprep.subr.bf16.mxu1 %v3118_v0  ;;  %v2475_v63 = vld [vmem:[#allocation11] ss:$0 sm:$0xff] }
 0x4b3   : > { %2617 = vmatprep.mubr.msk.bf16.mxu0 %vm3119_vm0, %v3118_v0 }
 0x4b5   : > { %2608 = vmatpush3.bf16.msra.mxu1 %v2773_v38 }
 0x4b6   : > { %2621 = vmatprep.subr.bf16.mxu1 %v3118_v0 }
 0x55d   : > { %v1663_v1 = vpop.f32.mrb[12].mxu1 }
 0x55e   : > { %v2585_v2 = vpop.f32.mrb[13].mxu1 }
 0x55f   : > { %v1666_v3 = vpop.f32.mrb[14].mxu1  ;;  %v1709_v4 = vpop.f32.mrb[16].mxu0 }
 0x560   : > { %v2586_v53 = vpop.f32.mrb[15].mxu1  ;;  %v2591_v5 = vpop.f32.mrb[17].mxu0 }
 0x561   : > { %v1712_v7 = vpop.f32.mrb[18].mxu0 }
 0x562   : > { %v2592_v54 = vpop.f32.mrb[19].mxu0 }
 0x583   : > { %v1755_v8 = vpop.f32.mrb[16].mxu1 }
 0x584   : > { %v1807_v9 = vcombine.low %v1663_v1, %v1755_v8  ;;  %v1808_v10 = vcombine.high %v1663_v1, %v1755_v8  ;;  %v2597_v11 = vpop.f32.mrb[17].mxu1 }
 0x585   : > { %v1758_v12 = vpop.f32.mrb[18].mxu1  ;;  %v1801_v13 = vpop.f32.mrb[20].mxu0 }
 0x586   : > { %v1823_v14 = vcombine.low %v1709_v4, %v1801_v13  ;;  %v1824_v15 = vcombine.high %v1709_v4, %v1801_v13  ;;  %v2598_v16 = vpop.f32.mrb[19].mxu1  ;;  %v2603_v17 = vpop.f32.mrb[21].mxu0  ;;  %v1815_v19 = vrot.slane %v1807_v9, %v3539_v35  ;;  %v1822_v20 = vrot.slane %v1808_v10, %v3539_v35  ;;  %v2774_v12 = vld [vmem:[%s3799_s13] sm:$0xff]   ;;  %v2775_v13 = vld [vmem:[%s3799_s13 + $0x8] sm:$0xff]  }
 0x587   : > { %v1804_v18 = vpop.f32.mrb[22].mxu0  ;;  %2614 = vmatpush3.bf16.msra.mxu0 %v2774_v12 }
 0x588   : > { %v1831_v21 = vrot.slane %v1823_v14, %v3539_v35  ;;  %v1838_v22 = vrot.slane %v1824_v15, %v3539_v35  ;;  %v2604_v23 = vpop.f32.mrb[23].mxu0  ;;  %2615 = vmatprep.subr.bf16.mxu0 %v3118_v0  ;;  %v2777_v14 = vld [vmem:[%s3801_s15 + $0x8] sm:$0xff]  }
 0x58a   : > { %v1839_v24 = vcombine.low %v1815_v19, %v1831_v21  ;;  %v1840_v25 = vcombine.high %v1815_v19, %v1831_v21  ;;  %v1855_v26 = vcombine.low %v1822_v20, %v1838_v22  ;;  %v1856_v27 = vcombine.high %v1822_v20, %v1838_v22  ;;  %v2479_v19 = vld [vmem:[#allocation13] ss:$0 sm:$0xff]  ;;  %v2480_v21 = vld [vmem:[#allocation14] ss:$0 sm:$0xff] }
 0x58b   : > { %2616 = vmatpush3.bf16.msra.mxu0 %v2775_v13 }
 0x58c   : > { %v1847_v29 = vrot.slane %v1839_v24, %v3541_v42  ;;  %v1854_v30 = vrot.slane %v1840_v25, %v3541_v42  ;;  %v1863_v31 = vrot.slane %v1855_v26, %v3541_v42  ;;  %v1870_v32 = vrot.slane %v1856_v27, %v3541_v42  ;;  %v2778_v25 = vld [vmem:[%s3801_s15 + $0x10] sm:$0xff]   ;;  %v2779_v26 = vld [vmem:[%s3801_s15 + $0x18] sm:$0xff]   ;;  %v2481_v27 = vld [vmem:[%s3800_s14] ss:$0 sm:$0xff] }
 0x58e   : > { %v1875_v33 = vcombine.low %v1847_v29, %v1854_v30  ;;  %v2473_v34 = vcombine.high %v1847_v29, %v1854_v30  ;;  %v1891_v36 = vcombine.low %v1863_v31, %v1870_v32  ;;  %v2474_v37 = vcombine.high %v1863_v31, %v1870_v32 }
 0x590   : > { %v1882_v39 = vrot.slane %v1875_v33, %v3539_v35  ;;  %v1890_v40 = vrot.slane %v2473_v34, %v3539_v35  ;;  %v1898_v43 = vrot.slane %v1891_v36, %v3539_v35  ;;  %v1906_v46 = vrot.slane %v2474_v37, %v3539_v35 }
 0x592   : > { %v1908_v47 = vcombine.high %v1882_v39, %v1890_v40  ;;  %v1924_v48 = vcombine.high %v1898_v43, %v1906_v46  ;;  %v1907_v49 = vcombine.low %v1882_v39, %v1890_v40  ;;  %v1923_v50 = vcombine.low %v1898_v43, %v1906_v46 }
 0x594   : > { %v1922_v51 = vrot.slane %v1908_v47, %v3541_v42  ;;  %v1938_v41 = vrot.slane %v1924_v48, %v3541_v42  ;;  %v1915_v52 = vrot.slane %v1907_v49, %v3541_v42  ;;  %v1931_v45 = vrot.slane %v1923_v50, %v3541_v42 }
 0x596   : > { %v1941_v55 = vcombine.low %v1922_v51, %v1938_v41  ;;  %v1940_v44 = vcombine.high %v1915_v52, %v1931_v45  ;;  %v1942_v56 = vcombine.high %v1922_v51, %v1938_v41  ;;  %v1939_v57 = vcombine.low %v1915_v52, %v1931_v45 }
 0x598   : > { %1948 = vrot.lane.b32.xlu1 %v1941_v55, %s3126_s26  ;;  %1944 = vrot.lane.b32.xlu0 %v1940_v44, %s3127_s25  ;;  %v2491_v44 = vld [vmem:[%s3864_s3] ss:$0 sm:$0xff]  ;;  %s3866_s26 = sld [smem:[#allocation38_spill]] }
 0x59c   : > { %1952 = vrot.lane.b32.xlu1 %v1942_v56, %s3128_s21  ;;  %s3862_s21 = sld [smem:[#allocation24_spill]] }
 0x59e   : > { %s3743_s25 = scalar_lea.hbm %s3866_s26, %s2494_s22 }
 0x5a2   : > { %s724_s29 = sand.u32 1, %s3862_s21  }
 0x5a3   : > { %s2437_s24 = sshll.u32 %s724_s29, 3  ;;  %s2242_s21 = scalar_lea.sflag [#allocation4], %s724_s29 }
 0x5a4   : > { %s726_s27 = scalar_lea.vmem [#allocation16], %s2437_s24  ;;  %s3028_s24 = sshll.u32 %s3129_s1, 4  ;;  %s3029_s24 = int_to_ptr.vmem [resolvable:$false] %s3028_s24 }
 0x5a5   : > { %s2255_s18 = sshll.u32 %s726_s27, 4  ;;  %s3030_s23 = scalar_lea.vmem %s3029_s24, 256  ;;  %s3745_s18 = int_to_ptr.vmem [resolvable:$true] %s2255_s18 }
 0x5a6   : > { %s3024_s20 = scalar_lea.vmem %s3745_s18, 128  ;;  %p3031_p0 = scmp.lt.s32.totalorder %s3745_s18, %s3029_s24 }
 0x5a7   : > { %p3025_p6 = scmp.ne.s32.totalorder %s3745_s18, %s3024_s20  ;;  %p3032_p2 = scmp.lt.s32.totalorder %s3030_s23, %s3024_s20 }
 0x5a9   : > { %p3026_p5 = pnand %p3025_p6, %p3867_p9  ;;  %p3033_p3 = por %p3032_p2, %p3031_p0 }
 0x5ab   : > { %p3027_p10 = pneg %p3026_p5 }
 0x5ad   : > { %p3034_p4 = pnand %p3033_p3, %p3027_p10 }
 0x60a   : > { %v1949_v35 = vpop.permute.xlu1 %1948  ;;  %v1945_v58 = vpop.permute.xlu0 %1944 }
 0x60b   : > { %v1955_v59 = vsel %vm1389_vm2, %v1939_v57, %v1945_v58  ;;  %v2492_v57 = vld [vmem:[%s3865_s19] ss:$0 sm:$0xff] }
 0x60c   : > { %v1957_v61 = vsel %vm1956_vm4, %v1955_v59, %v1949_v35 }
 0x60e   : > { %v1953_v60 = vpop.permute.xlu1 %1952 }
 0x60f   : > { %v1959_v62 = vsel %vm1958_vm5, %v1957_v61, %v1953_v60 }
 0x610   : > { %v1960_v42 = vpack.c.bf16 %v1959_v62, %v1959_v62 }
 0x612   : > { %2610 = vmatmul.mubr.msk.bf16.vlgmr.msra.gmra.mrb[20].mxu1 %vm767_vm1, %v1960_v42 }
 0x613   : > { %2629 = vmatprep.mubr.msk.bf16.mxu1 %vm3119_vm0, %v3118_v0 }
 0x6e5   : > { %v2021_v1 = vpop.f32.mrb[20].mxu1 }
 0x6e6   : > { %v2022_v2 = vadd.f32 %v2475_v63, %v2021_v1  ;;  %v2611_v3 = vpop.f32.mrb[21].mxu1 }
 0x6e7   : > { %v2024_v4 = vpop.f32.mrb[22].mxu1 }
 0x6e8   : > { %v2612_v53 = vpop.f32.mrb[23].mxu1  ;;  %v2027_v5 = vadd.f32 %v2022_v2, %v3509_v6  ;;  %v2776_v6 = vld [vmem:[%s3801_s15] sm:$0xff]  }
 0x6e9   : > { %2622 = vmatpush3.bf16.msra.mxu1 %v2776_v6 }
 0x6ea   : > { %v2028_v7 = vsel %vm767_vm1, %v2027_v5, 0.0  ;;  %2623 = vmatprep.subr.bf16.mxu1 %v3118_v0 }
 0x6eb   : > { %2029 = vadd.xlane.f32.xlu0 %v2028_v7 }
 0x6ed   : > { %2624 = vmatpush3.bf16.msra.mxu1 %v2777_v14 }
 0x6ee   : > { %2625 = vmatprep.subr.bf16.mxu1 %v3118_v0 }
 0x6f1   : > { %2626 = vmatpush3.bf16.msra.mxu1 %v2778_v25 }
 0x6f2   : > { %2627 = vmatprep.subr.bf16.mxu1 %v3118_v0  ;;  %v2485_v0 = vld [vmem:[%s3802_s16] ss:$0 sm:$0xff] }
 0x6f5   : > { %2628 = vmatpush3.bf16.msra.mxu1 %v2779_v26 }
 0x778   : > { %v2030_v54 = vpop.xlane.xlu0 %2029 }
 0x779   : > { %v2032_v8 = vmul.f32 0.03125, %v2030_v54 }
 0x77b   : > { %v2033_v9 = vsub.f32 %v2027_v5, %v2032_v8 }
 0x77d   : > { %v2034_v10 = vmul.f32 %v2033_v9, %v2033_v9 }
 0x77f   : > { %v2035_v11 = vsel %vm767_vm1, %v2034_v10, 0.0 }
 0x780   : > { %2036 = vadd.xlane.f32.xlu1 %v2035_v11 }
 0x80d   : > { %v2037_v15 = vpop.xlane.xlu1 %2036 }
 0x80e   : > { %v2038_v16 = vmul.f32 0.03125, %v2037_v15 }
 0x810   : > { %v2039_v17 = vadd.f32 1e-05, %v2038_v16 }
 0x812   : > { %2796 = vrsqrt.f32 %v2039_v17 }
 0x81c   : > { %v2797_v18 = vpop.eup %2796 }
 0x81d   : > { %v2041_v20 = vmul.f32 %v2797_v18, %v2033_v9 }
 0x81f   : > { %v2049_v22 = vmul.f32 %v2479_v19, %v2041_v20 }
 0x821   : > { %v2057_v23 = vadd.f32 %v2480_v21, %v2049_v22 }
 0x823   : > { %v2058_v24 = vpack.c.bf16 %v2057_v23, %v2057_v23 }
 0x825   : > { %2618 = vmatmul.mubr.msk.bf16.vlgmr.msra.gmra.mrb[24].mxu0 %vm767_vm1, %v2058_v24 }
 0x8f8   : > { %v2119_v28 = vpop.f32.mrb[24].mxu0 }
 0x8f9   : > { %v2120_v29 = vadd.f32 %v2481_v27, %v2119_v28  ;;  %v2619_v30 = vpop.f32.mrb[25].mxu0 }
 0x8fa   : > { %v2122_v31 = vpop.f32.mrb[26].mxu0 }
 0x8fb   : > { %v2125_v32 = vmax.f32 %v2120_v29, 0.0  ;;  %v2620_v33 = vpop.f32.mrb[27].mxu0 }
 0x8fd   : > { %v2126_v34 = vpack.c.bf16 %v2125_v32, %v2125_v32 }
 0x8ff   : > { %2630 = vmatmul.mubr.msk.bf16.vlgmr.msra.gmra.mrb[24].mxu1 %vm2166_vm6, %v2126_v34 }
 0x9d2   : > { %v2204_v36 = vpop.f32.mrb[24].mxu1 }
 0x9d3   : > { %v2205_v37 = vadd.f32 %v2485_v0, %v2204_v36  ;;  %v2631_v38 = vpop.f32.mrb[25].mxu1 }
 0x9d4   : > { %v2207_v39 = vpop.f32.mrb[26].mxu1 }
 0x9d5   : > { %v2632_v40 = vpop.f32.mrb[27].mxu1  ;;  %v2210_v43 = vadd.f32 %v2205_v37, %v2057_v23 }
 0x9d7   : > { %v2211_v46 = vsel %vm767_vm1, %v2210_v43, 0.0 }
 0x9d8   : > { %2212 = vadd.xlane.f32.xlu0 %v2211_v46 }
 0xa65   : > { %v2213_v47 = vpop.xlane.xlu0 %2212 }
 0xa66   : > { %v2214_v48 = vmul.f32 0.03125, %v2213_v47 }
 0xa68   : > { %v2215_v49 = vsub.f32 %v2210_v43, %v2214_v48 }
 0xa6a   : > { %v2216_v50 = vmul.f32 %v2215_v49, %v2215_v49 }
 0xa6c   : > { %v2217_v51 = vsel %vm767_vm1, %v2216_v50, 0.0 }
 0xa6d   : > { %2218 = vadd.xlane.f32.xlu0 %v2217_v51 }
 0xafa   : > { %v2219_v41 = vpop.xlane.xlu0 %2218 }
 0xafb   : > { %v2220_v52 = vmul.f32 0.03125, %v2219_v41 }
 0xafd   : > { %v2221_v45 = vadd.f32 1e-05, %v2220_v52 }
 0xaff   : > { %2798 = vrsqrt.f32 %v2221_v45 }
 0xb09   : > { %v2799_v55 = vpop.eup %2798 }
 0xb0a   : > { %v2223_v56 = vmul.f32 %v2799_v55, %v2215_v49 }
 0xb0c   : > { %v2231_v35 = vmul.f32 %v2491_v44, %v2223_v56 }
 0xb0e   : > { %v2239_v58 = vadd.f32 %v2492_v57, %v2231_v35 }
 0xb10   : > { %2240 = vst.msk [vmem:[%s726_s27] sm:$0xff] %vm767_vm1, %v2239_v58 }
 0xb11   : > { %3037 = shalt.err (!%p3034_p4)
}
 0xb12   : > { %s3038_s29 = scalar_lea.hbm %s3743_s25, 128  ;;  %s3042_s28 = scalar_lea.hbm %s3866_s26, 256 }
 0xb13   : > { %p3039_p12 = scmp.ne.s32.totalorder %s3743_s25, %s3038_s29  ;;  %p3043_p11 = scmp.lt.u32.totalorder %s3743_s25, %s3866_s26 }
 0xb14   : > { %p3044_p13 = scmp.lt.u32.totalorder %s3042_s28, %s3038_s29  ;;  %p3046_p6 = scmp.lt.u32.totalorder %s3038_s29, %s3743_s25 }
 0xb15   : > { %p3040_p7 = pnand %p3039_p12, %p3867_p9 }
 0xb16   : > { %p3045_p1 = por %p3044_p13, %p3043_p11 }
 0xb17   : > { %p3041_p8 = pneg %p3040_p7 }
 0xb18   : > { %p3047_p5 = por %p3046_p6, %p3045_p1 }
 0xb1a   : > { %p3048_p10 = pnand %p3047_p5, %p3041_p8 }
 0xb1c   : > { %3051 = shalt.err (!%p3048_p10)
}
 0xb1d   : > { %2665 = dma.vmem_to_hbm [thread:$0]  (%p3867_p9), %s3745_s18, 128, %s3743_s25, %s2242_s21  }
 0xb1e PF: > { %s3868_s27 = sld [smem:[#allocation26_spill]]  ;;  %s3869_s30 = sld [smem:[#allocation23_spill]] }
 0xb1f   : > { %s3870_s5 = sld [smem:[#allocation30_spill]] }
 0xb24   : > { %p2712_p0 = scmp.ge.s32.totalorder %s3868_s27, 2  ;;  %s2267_s20 = sand.u32 1, %s3869_s30  }
 0xb25   : > { %p3871_p2 = scmp.ne.s32.totalorder %s3870_s5, 0  ;;  %s2268_s1 = scalar_lea.sflag [#allocation4], %s2267_s20 }
 0xb27   : > { %p2693_p3 = pnand %p2712_p0, %p3871_p2 }
 0xb29   : > { %3089 = dma.done.wait (!%p2693_p3), %s2268_s1, 128  }
 0xb2a   : > { %3091 = vsyncadd (!%p2693_p3), %s2268_s1, 4294967168  ;;  %s3872_s21 = sld [smem:[#allocation27_spill]]  ;;  %s3873_s0 = sld [smem:[#allocation24_spill]] }
 0xb2b   : > { %s3874_s30 = sld [smem:[#allocation25_spill]]  ;;  %s3875_s20 = sld [smem:[#allocation28_spill]] }
 0xb30   : > { %p34_p4 = scmp.ge.s32.totalorder %s3872_s21, 4  }
 0xb32   :  { %36 = sbr.rel (!%p34_p4) target bundleno = 17 (0x11), region = 170 }
 0xb39   :  { %2273 = vsyncpa [#allocation3], 1 }
 0xb3a   :  { %2275 = vsyncpa [#allocation3 + $0x1], 1 }
 0xb3b   :  { %2276 = vsyncpa [#allocation6], 1 }
 0xb3c   :  { %2277 = vsyncpa [#allocation9], 1 }
 0xb3d   :  { %2278 = vsyncpa [#allocation12], 1 }
 0xb3e   :  { %2279 = vsyncpa [#allocation15], 1 }
 0xb3f   :  { %2280 = vsyncpa [#allocation4], 1 }
 0xb40   :  { %2282 = vsyncpa [#allocation4 + $0x1], 1 }

// kernel: tpu_custom_call.1
= control target key start
LH: loop header
LB: loop body
LE: loop exit
PB: predicated region body
PF: predicated region fallthrough
CT: control target
= control target key end

     0   :  { %s3786_s0 = inlined_call_operand.vmem [shape: f32[16,32], index: 0, kind: input, shape index: {}]   ;;  %s3787_s1 = inlined_call_operand.vmem [shape: f32[16,32], index: 1, kind: input, shape index: {}]   ;;  %s3788_s2 = inlined_call_operand.vmem [shape: f32[16,32], index: 2, kind: input, shape index: {}]   ;;  %s3789_s3 = inlined_call_operand.hbm [shape: bf16[32,32], index: 3, kind: input, shape index: {}]   ;;  %s3790_s4 = inlined_call_operand.vmem [shape: f32[1,32], index: 4, kind: input, shape index: {}]   ;;  %s3791_s5 = inlined_call_operand.hbm [shape: bf16[32,32], index: 5, kind: input, shape index: {}]   ;;  %s3792_s6 = inlined_call_operand.hbm [shape: f32[1,32], index: 6, kind: input, shape index: {}]   ;;  %s3793_s7 = inlined_call_operand.hbm [shape: bf16[32,32], index: 7, kind: input, shape index: {}]   ;;  %s3794_s8 = inlined_call_operand.hbm [shape: f32[1,32], index: 8, kind: input, shape index: {}]   ;;  %s3795_s9 = inlined_call_operand.vmem [shape: bf16[32,32], index: 9, kind: input, shape index: {}]   ;;  %s3796_s10 = inlined_call_operand.hbm [shape: f32[1,32], index: 10, kind: input, shape index: {}]   ;;  %s3797_s11 = inlined_call_operand.hbm [shape: f32[1,32], index: 11, kind: input, shape index: {}]   ;;  %s3798_s12 = inlined_call_operand.hbm [shape: f32[1,32], index: 12, kind: input, shape index: {}]   ;;  %s3799_s13 = inlined_call_operand.vmem [shape: bf16[32,64], index: 13, kind: input, shape index: {}]   ;;  %s3800_s14 = inlined_call_operand.vmem [shape: f32[1,64], index: 14, kind: input, shape index: {}]   ;;  %s3801_s15 = inlined_call_operand.vmem [shape: bf16[64,32], index: 15, kind: input, shape index: {}]   ;;  %s3802_s16 = inlined_call_operand.vmem [shape: f32[1,32], index: 16, kind: input, shape index: {}]   ;;  %s3803_s17 = inlined_call_operand.vmem [shape: f32[1,32], index: 17, kind: input, shape index: {}]   ;;  %s3804_s18 = inlined_call_operand.vmem [shape: f32[1,32], index: 18, kind: input, shape index: {}]   ;;  %s3805_s19 = inlined_call_operand.hbm [shape: f32[16,32], index: 19, kind: output, shape index: {}]  }
   0x1   :  { %3822 = sst [smem:[#allocation31_spill]] %s3786_s0 }
   0x2   :  { %3823 = sst [smem:[#allocation32_spill]] %s3787_s1 }
   0x3   :  { %3824 = sst [smem:[#allocation33_spill]] %s3788_s2 }
   0x4   :  { %3825 = sst [smem:[#allocation34_spill]] %s3789_s3 }
   0x5   :  { %3826 = sst [smem:[#allocation35_spill]] %s3791_s5 }
   0x6   :  { %3827 = sst [smem:[#allocation36_spill]] %s3803_s17 }
   0x7   :  { %3828 = sst [smem:[#allocation37_spill]] %s3804_s18 }
   0x8   :  { %3829 = sst [smem:[#allocation38_spill]] %s3805_s19 }
   0x9   :  { %24 = vsyncpa [#allocation3], 0 }
   0xa   :  { %25 = vsyncpa [#allocation6], 0 }
   0xb   :  { %26 = vsyncpa [#allocation9], 0 }
   0xc   :  { %27 = vsyncpa [#allocation12], 0 }
   0xd   :  { %28 = vsyncpa [#allocation15], 0 }
   0xe   :  { %29 = vsyncpa [#allocation4], 0 }
   0xf   :  { %31 = vsyncpa [#allocation4 + $0x1], 0  ;;  %s3230_s0 = smov 0   ;;  %s3232_s30 = smov 0  }
  0x10   :  { %s3234_s20 = smov 0   ;;  %s3236_s21 = smov 0  }
  0x11 LB: > { %3830 = sst [smem:[#allocation23_spill]] %s3094_s0  ;;  %s3251_s1 = sadd.s32 4294967295, %s3106_s21   ;;  %s3106_s21 = sphi %s3236_s21, %s3872_s21   ;;  %s3102_s20 = sphi %s3234_s20, %s3875_s20   ;;  %s3098_s30 = sphi %s3232_s30, %s3874_s30   ;;  %s3094_s0 = sphi %s3230_s0, %s3873_s0  }
  0x12   : > { %3831 = sst [smem:[#allocation24_spill]] %s3098_s30  ;;  %s2417_s22 = sadd.s32 4294967294, %s3106_s21  }
  0x13   : > { %3832 = sst [smem:[#allocation25_spill]] %s3102_s20  ;;  %s3255_s2 = sadd.s32 1, %s3106_s21  }
  0x14   : > { %3833 = sst [smem:[#allocation26_spill]] %s3106_s21  ;;  %s458_s23 = sadd.s32 1, %s3102_s20 }
  0x15   : > { %3834 = sst [smem:[#allocation27_spill]] %s3255_s2  ;;  %s455_s24 = ssub.s32 %s3106_s21, %s3255_s2 }
  0x16   : > { %p468_p0 = scmp.ne.s32.totalorder %s3102_s20, %s3098_s30  ;;  %p456_p1 = scmp.eq.s32.totalorder %s455_s24, 0 }
  0x17   : > { %p469_p2 = scmp.eq.s32.totalorder %s3251_s1, 1  ;;  %p474_p3 = scmp.ne.s32.totalorder %s3098_s30, %s3094_s0 }
  0x18   : > { %p475_p4 = scmp.eq.s32.totalorder %s2417_s22, 1  ;;  %p2418_p7 = scmp.ge.s32.totalorder %s3106_s21, 1 }
  0x19   : > { %s3266_s25 = scalar_select %p456_p1, %s3102_s20, %s458_s23  }
  0x1a   : > { %p3268_p5 = por %p469_p2, %p468_p0  ;;  %p3272_p6 = por %p475_p4, %p474_p3 }
  0x1b   : > { %3835 = sst [smem:[#allocation28_spill]] %s3266_s25  ;;  %p482_p8 = scmp.lt.s32.totalorder %s3106_s21, 3 }
  0x1c   : > { %s3836_s3 = scalar_select %p3268_p5, 1, 0 }
  0x1d   : > { %s3838_s26 = scalar_select %p3272_p6, 1, 0 }
  0x1e   : > { %3837 = sst [smem:[#allocation29_spill]] %s3836_s3  ;;  %p3814_p9 = scmp.eq.s32.totalorder %s3251_s1, 0 }
  0x1f   : > { %3839 = sst [smem:[#allocation30_spill]] %s3838_s26  ;;  %p3279_p10 = pnand %p2418_p7, %p482_p8 }
  0x20   : > { %s3108_s28 = smov [#allocation5]   ;;  %s3109_s23 = smov [#allocation8]  }
  0x21   : > { %s3840_s27 = scalar_select %p3279_p10, 1, 0 }
  0x22   : > { %p2667_p11 = pneg %p3279_p10  ;;  %s510_s29 = sshll.u32 %s3108_s28, 4  ;;  %s3285_s29 = int_to_ptr.vmem [resolvable:$true] %s510_s29 }
  0x23   : > { %s534_s24 = sshll.u32 %s3109_s23, 4  ;;  %s3110_s25 = smov [#allocation11]   ;;  %s3293_s24 = int_to_ptr.vmem [resolvable:$true] %s534_s24 }
  0x24   : > { %p3289_p12 = pnand %p3814_p9, %p2667_p11  ;;  %s3295_s20 = sshll.u32 %s3110_s25, 4  ;;  %s563_s20 = int_to_ptr.vmem [resolvable:$true] %s3295_s20 }
  0x25   : > { %s3842_s5 = sld [smem:[#allocation35_spill]] }
  0x26   : > { %p3305_p0 = pneg %p3289_p12 }
  0x2b   : > { %s2800_s0 = scalar_lea.hbm %s3842_s5, 256 }
  0x2c   : > { %p2801_p13 = scmp.ne.s32.totalorder %s3842_s5, %s2800_s0  ;;  %p2807_p3 = scmp.lt.u32.totalorder %s2800_s0, %s3842_s5 }
  0x2e   : > { %p2803_p1 = pnand %p3305_p0, %p2801_p13 }
  0x30   : > { %p2804_p2 = pneg %p2803_p1 }
  0x32   : > { %p2809_p4 = pnand %p2807_p3, %p2804_p2 }
  0x34   : > { %2812 = shalt.err (!%p2809_p4)
}
  0x35   : > { %s2813_s21 = scalar_lea.vmem %s3285_s29, 256  ;;  %p2821_p9 = scmp.lt.s32.totalorder %s3285_s29, %s3285_s29 }
  0x36   : > { %p2814_p7 = scmp.ne.s32.totalorder %s3285_s29, %s2813_s21  ;;  %p2822_p6 = scmp.lt.s32.totalorder %s2813_s21, %s2813_s21 }
  0x38   : > { %p2816_p8 = pnand %p2814_p7, %p3305_p0  ;;  %p2823_p13 = por %p2822_p6, %p2821_p9 }
  0x3a   : > { %p2817_p11 = pneg %p2816_p8 }
  0x3c   : > { %p2824_p1 = pnand %p2823_p13, %p2817_p11 }
  0x3e   : > { %2827 = shalt.err (!%p2824_p1)
}
  0x3f   : > { %s3820_s2 = smov 64   ;;  %s3821_s0 = smov 4  }
  0x40   : > { %2673 = dma.hbm_to_vmem [thread:$0]  (!%p3289_p12), %s3842_s5, 256, %s3285_s29, [#allocation6], %s3820_s2, %s3820_s2, %s3821_s0  }
  0x41   : > { %s2828_s21 = scalar_lea.hbm %s3793_s7, 256 }
  0x42   : > { %p2829_p6 = scmp.ne.s32.totalorder %s3793_s7, %s2828_s21  ;;  %p2835_p3 = scmp.lt.u32.totalorder %s2828_s21, %s3793_s7 }
  0x44   : > { %p2831_p9 = pnand %p2829_p6, %p3305_p0 }
  0x46   : > { %p2832_p2 = pneg %p2831_p9 }
  0x48   : > { %p2837_p4 = pnand %p2835_p3, %p2832_p2 }
  0x4a   : > { %2840 = shalt.err (!%p2837_p4)
}
  0x4b   : > { %s2841_s29 = scalar_lea.vmem %s3293_s24, 256  ;;  %p2849_p13 = scmp.lt.s32.totalorder %s3293_s24, %s3293_s24 }
  0x4c   : > { %p2842_p7 = scmp.ne.s32.totalorder %s3293_s24, %s2841_s29  ;;  %p2850_p1 = scmp.lt.s32.totalorder %s2841_s29, %s2841_s29 }
  0x4e   : > { %p2844_p8 = pnand %p2842_p7, %p3305_p0  ;;  %p2851_p6 = por %p2850_p1, %p2849_p13 }
  0x50   : > { %p2845_p11 = pneg %p2844_p8 }
  0x52   : > { %p2852_p9 = pnand %p2851_p6, %p2845_p11 }
  0x54   : > { %2855 = shalt.err (!%p2852_p9)
}
  0x55   : > { %2679 = dma.hbm_to_vmem [thread:$0]  (!%p3289_p12), %s3793_s7, 256, %s3293_s24, [#allocation9], %s3820_s2, %s3820_s2, %s3821_s0  }
  0x56   : > { %s2856_s26 = scalar_lea.hbm %s3796_s10, 16 }
  0x57   : > { %p2857_p2 = scmp.ne.s32.totalorder %s3796_s10, %s2856_s26  ;;  %p2863_p7 = scmp.lt.u32.totalorder %s2856_s26, %s3796_s10 }
  0x59   : > { %p2859_p3 = pnand %p2857_p2, %p3305_p0 }
  0x5b   : > { %p2860_p4 = pneg %p2859_p3 }
  0x5d   : > { %p2865_p8 = pnand %p2863_p7, %p2860_p4 }
  0x5f   : > { %2868 = shalt.err (!%p2865_p8)
}
  0x60   : > { %s2869_s29 = scalar_lea.vmem %s563_s20, 16  ;;  %s2876_s24 = scalar_lea.vmem %s563_s20, 32 }
  0x61   : > { %p2870_p11 = scmp.ne.s32.totalorder %s563_s20, %s2869_s29  ;;  %p2877_p6 = scmp.lt.s32.totalorder %s563_s20, %s563_s20 }
  0x62   : > { %p2878_p9 = scmp.lt.s32.totalorder %s2876_s24, %s2869_s29 }
  0x63   : > { %p2872_p13 = pnand %p2870_p11, %p3305_p0 }
  0x64   : > { %p2879_p5 = por %p2878_p9, %p2877_p6 }
  0x65   : > { %p2873_p1 = pneg %p2872_p13 }
  0x67   : > { %p2880_p10 = pnand %p2879_p5, %p2873_p1 }
  0x69   : > { %2883 = shalt.err (!%p2880_p10)
}
  0x6a   : > { %2685 = dma.hbm_to_vmem [thread:$0]  (!%p3289_p12), %s3796_s10, 16, %s563_s20, [#allocation12]  }
  0x6b   : > { %s3113_s30 = smov [#allocation2]   ;;  %s3114_s26 = smov [#allocation7]  }
  0x6c   : > { %s494_s3 = sshll.u32 %s3113_s30, 4  ;;  %s524_s28 = sshll.u32 %s3114_s26, 4  ;;  %s495_s3 = int_to_ptr.vmem [resolvable:$true] %s494_s3  ;;  %s525_s28 = int_to_ptr.vmem [resolvable:$true] %s524_s28 }
  0x6d   : > { %s3844_s21 = sld [smem:[#allocation34_spill]] }
  0x73   : > { %s3845_s2 = smov %s3844_s21  ;;  %s2884_s0 = scalar_lea.hbm %s3844_s21, 256 }
  0x74   : > { %p2885_p5 = scmp.ne.s32.totalorder %s3845_s2, %s2884_s0  ;;  %p2891_p3 = scmp.lt.u32.totalorder %s2884_s0, %s3845_s2 }
  0x76   : > { %p2887_p10 = pnand %p2885_p5, %p3305_p0 }
  0x78   : > { %p2888_p2 = pneg %p2887_p10 }
  0x7a   : > { %p2893_p4 = pnand %p2891_p3, %p2888_p2 }
  0x7c   : > { %2896 = shalt.err (!%p2893_p4)
}
  0x7d   : > { %s2897_s20 = scalar_lea.vmem %s495_s3, 256  ;;  %p2905_p13 = scmp.lt.s32.totalorder %s495_s3, %s495_s3 }
  0x7e   : > { %p2898_p7 = scmp.ne.s32.totalorder %s495_s3, %s2897_s20  ;;  %p2906_p1 = scmp.lt.s32.totalorder %s2897_s20, %s2897_s20 }
  0x80   : > { %p2900_p8 = pnand %p2898_p7, %p3305_p0  ;;  %p2907_p6 = por %p2906_p1, %p2905_p13 }
  0x82   : > { %p2901_p11 = pneg %p2900_p8 }
  0x84   : > { %p2908_p9 = pnand %p2907_p6, %p2901_p11 }
  0x86   : > { %2911 = shalt.err (!%p2908_p9)
}
  0x87   : > { %s3846_s18 = smov 4   ;;  %s3847_s30 = smov 64  }
  0x88   : > { %2670 = dma.hbm_to_vmem [thread:$0]  (!%p3289_p12), %s3845_s2, 256, %s495_s3, [#allocation3], %s3847_s30, %s3847_s30, %s3846_s18  }
  0x89   : > { %s2912_s25 = scalar_lea.hbm %s3792_s6, 16 }
  0x8a   : > { %p2913_p5 = scmp.ne.s32.totalorder %s3792_s6, %s2912_s25  ;;  %p2919_p3 = scmp.lt.u32.totalorder %s2912_s25, %s3792_s6 }
  0x8c   : > { %p2915_p10 = pnand %p2913_p5, %p3305_p0 }
  0x8e   : > { %p2916_p2 = pneg %p2915_p10 }
  0x90   : > { %p2921_p4 = pnand %p2919_p3, %p2916_p2 }
  0x92   : > { %2924 = shalt.err (!%p2921_p4)
}
  0x93   : > { %s2925_s20 = scalar_lea.vmem %s525_s28, 16  ;;  %s2932_s3 = scalar_lea.vmem %s525_s28, 32 }
  0x94   : > { %p2926_p7 = scmp.ne.s32.totalorder %s525_s28, %s2925_s20  ;;  %p2933_p13 = scmp.lt.s32.totalorder %s525_s28, %s525_s28 }
  0x95   : > { %p2934_p1 = scmp.lt.s32.totalorder %s2932_s3, %s2925_s20 }
  0x96   : > { %p2928_p8 = pnand %p2926_p7, %p3305_p0 }
  0x97   : > { %p2935_p6 = por %p2934_p1, %p2933_p13 }
  0x98   : > { %p2929_p11 = pneg %p2928_p8 }
  0x9a   : > { %p2936_p9 = pnand %p2935_p6, %p2929_p11 }
  0x9c   : > { %2939 = shalt.err (!%p2936_p9)
}
  0x9d   : > { %2676 = dma.hbm_to_vmem [thread:$0]  (!%p3289_p12), %s3792_s6, 16, %s525_s28, [#allocation6]  }
  0x9e   : > { %s3115_s5 = smov [#allocation10]   ;;  %s3116_s26 = smov [#allocation13]  }
  0x9f   : > { %s548_s0 = sshll.u32 %s3115_s5, 4  ;;  %s573_s23 = sshll.u32 %s3116_s26, 4  ;;  %s549_s0 = int_to_ptr.vmem [resolvable:$true] %s548_s0  ;;  %s574_s23 = int_to_ptr.vmem [resolvable:$true] %s573_s23 }
  0xa0   : > { %s2940_s29 = scalar_lea.hbm %s3794_s8, 16 }
  0xa1   : > { %p2941_p5 = scmp.ne.s32.totalorder %s3794_s8, %s2940_s29  ;;  %p2947_p3 = scmp.lt.u32.totalorder %s2940_s29, %s3794_s8 }
  0xa3   : > { %p2943_p10 = pnand %p2941_p5, %p3305_p0 }
  0xa5   : > { %p2944_p2 = pneg %p2943_p10 }
  0xa7   : > { %p2949_p4 = pnand %p2947_p3, %p2944_p2 }
  0xa9   : > { %2952 = shalt.err (!%p2949_p4)
}
  0xaa   : > { %s2953_s28 = scalar_lea.vmem %s549_s0, 16  ;;  %s2960_s18 = scalar_lea.vmem %s549_s0, 32 }
  0xab   : > { %p2954_p7 = scmp.ne.s32.totalorder %s549_s0, %s2953_s28  ;;  %p2961_p13 = scmp.lt.s32.totalorder %s549_s0, %s549_s0 }
  0xac   : > { %p2962_p1 = scmp.lt.s32.totalorder %s2960_s18, %s2953_s28 }
  0xad   : > { %p2956_p8 = pnand %p2954_p7, %p3305_p0 }
  0xae   : > { %p2963_p6 = por %p2962_p1, %p2961_p13 }
  0xaf   : > { %p2957_p11 = pneg %p2956_p8 }
  0xb1   : > { %p2964_p9 = pnand %p2963_p6, %p2957_p11 }
  0xb3   : > { %2967 = shalt.err (!%p2964_p9)
}
  0xb4   : > { %2682 = dma.hbm_to_vmem [thread:$0]  (!%p3289_p12), %s3794_s8, 16, %s549_s0, [#allocation9]  }
  0xb5   : > { %s2968_s21 = scalar_lea.hbm %s3797_s11, 16 }
  0xb6   : > { %p2969_p5 = scmp.ne.s32.totalorder %s3797_s11, %s2968_s21  ;;  %p2975_p3 = scmp.lt.u32.totalorder %s2968_s21, %s3797_s11 }
  0xb8   : > { %p2971_p10 = pnand %p2969_p5, %p3305_p0 }
  0xba   : > { %p2972_p2 = pneg %p2971_p10 }
  0xbc   : > { %p2977_p4 = pnand %p2975_p3, %p2972_p2 }
  0xbe   : > { %2980 = shalt.err (!%p2977_p4)
}
  0xbf   : > { %s2981_s3 = scalar_lea.vmem %s574_s23, 16  ;;  %s2988_s0 = scalar_lea.vmem %s574_s23, 32 }
  0xc0   : > { %p2982_p7 = scmp.ne.s32.totalorder %s574_s23, %s2981_s3  ;;  %p2989_p13 = scmp.lt.s32.totalorder %s574_s23, %s574_s23 }
  0xc1   : > { %p2990_p1 = scmp.lt.s32.totalorder %s2988_s0, %s2981_s3 }
  0xc2   : > { %p2984_p8 = pnand %p2982_p7, %p3305_p0 }
  0xc3   : > { %p2991_p6 = por %p2990_p1, %p2989_p13 }
  0xc4   : > { %p2985_p11 = pneg %p2984_p8 }
  0xc6   : > { %p2992_p9 = pnand %p2991_p6, %p2985_p11 }
  0xc8   : > { %2995 = shalt.err (!%p2992_p9)
}
  0xc9   : > { %2688 = dma.hbm_to_vmem [thread:$0]  (!%p3289_p12), %s3797_s11, 16, %s574_s23, [#allocation12]  }
  0xca   : > { %s3117_s30 = smov [#allocation14]   ;;  %s2996_s21 = scalar_lea.hbm %s3798_s12, 16 }
  0xcb   : > { %s584_s5 = sshll.u32 %s3117_s30, 4  ;;  %p2997_p5 = scmp.ne.s32.totalorder %s3798_s12, %s2996_s21  ;;  %s585_s5 = int_to_ptr.vmem [resolvable:$true] %s584_s5 }
  0xcc   : > { %p3003_p3 = scmp.lt.u32.totalorder %s2996_s21, %s3798_s12 }
  0xcd   : > { %p2999_p10 = pnand %p2997_p5, %p3305_p0 }
  0xcf   : > { %p3000_p2 = pneg %p2999_p10 }
  0xd1   : > { %p3005_p4 = pnand %p3003_p3, %p3000_p2 }
  0xd3   : > { %3008 = shalt.err (!%p3005_p4)
}
  0xd4   : > { %s3009_s23 = scalar_lea.vmem %s585_s5, 16  ;;  %s3016_s3 = scalar_lea.vmem %s585_s5, 32 }
  0xd5   : > { %p3010_p7 = scmp.ne.s32.totalorder %s585_s5, %s3009_s23  ;;  %p3017_p13 = scmp.lt.s32.totalorder %s585_s5, %s585_s5 }
  0xd6   : > { %p3018_p1 = scmp.lt.s32.totalorder %s3016_s3, %s3009_s23 }
  0xd7   : > { %p3012_p8 = pnand %p3010_p7, %p3305_p0 }
  0xd8   : > { %p3019_p6 = por %p3018_p1, %p3017_p13 }
  0xd9   : > { %p3013_p11 = pneg %p3012_p8 }
  0xdb   : > { %p3020_p9 = pnand %p3019_p6, %p3013_p11 }
  0xdd   : > { %3023 = shalt.err (!%p3020_p9)
}
  0xde   : > { %2691 = dma.hbm_to_vmem [thread:$0]  (!%p3289_p12), %s3798_s12, 16, %s585_s5, [#allocation15]  }
  0xdf   : > { %p3848_p5 = scmp.ne.s32.totalorder %s3840_s27, 0 }
  0xe0   : > { %p3849_p10 = scmp.eq.s32.totalorder (!%p3848_p5), %s3251_s1, 0 }
  0xe1   : > { %636 = sbr.rel (%p3848_p5) target bundleno = 2846 (0xb1e), region = 96 }
  0xe8   : > { %3069 = dma.done.wait (%p3849_p10), [#allocation3], 256   ;;  %p3850_p0 = pmov %p3849_p10 }
  0xea   : > { %3071 = vsyncadd (%p3850_p0), [#allocation3], 4294967040  ;;  %p3851_p2 = pmov %p3850_p0 }
  0xeb   : > { %p3852_p3 = pmov %p3850_p0 }
  0xec   : > { %3073 = dma.done.wait (%p3851_p2), [#allocation6], 272  }
  0xed   : > { %3075 = vsyncadd (%p3852_p3), [#allocation6], 4294967024  ;;  %p3853_p4 = pmov %p3850_p0 }
  0xee   : > { %p3854_p12 = pmov %p3850_p0 }
  0xef   : > { %3077 = dma.done.wait (%p3853_p4), [#allocation9], 272  }
  0xf0   : > { %3079 = vsyncadd (%p3854_p12), [#allocation9], 4294967024  ;;  %p3855_p7 = pmov %p3850_p0 }
  0xf1   : > { %p3856_p8 = pmov %p3850_p0 }
  0xf2   : > { %3081 = dma.done.wait (%p3855_p7), [#allocation12], 32  }
  0xf3   : > { %3083 = vsyncadd (%p3856_p8), [#allocation12], 4294967264  ;;  %p3857_p11 = pmov %p3850_p0 }
  0xf4   : > { %p3858_p13 = pmov %p3850_p0 }
  0xf5   : > { %3085 = dma.done.wait (%p3857_p11), [#allocation15], 16  }
  0xf6   : > { %3087 = vsyncadd (%p3858_p13), [#allocation15], 4294967280  ;;  %p727_p1 = scmp.lt.s32.totalorder %s3251_s1, 1  ;;  %v3118_v0 = vmov 0.0   ;;  %vm3119_vm0 = vmmov 0   ;;  %v2766_v1 = vld [vmem:[#allocation5] sm:$0xff]   ;;  %v960_v27 = vlaneseq }
  0xf7   : > { %2541 = vmatprep.subr.bf16.mxu1 %v3118_v0  ;;  %2533 = vmatprep.subr.bf16.mxu0 %v3118_v0  ;;  %s3859_s30 = sld [smem:[#allocation32_spill]]  ;;  %v2767_v2 = vld [vmem:[#allocation2] sm:$0xff]   ;;  %s3860_s21 = sld [smem:[#allocation31_spill]]  ;;  %v2768_v3 = vld [vmem:[#allocation5 + $0x8] sm:$0xff]   ;;  %vm767_vm1 = vcmask 261120   ;;  %v2769_v5 = vld [vmem:[#allocation2 + $0x8] sm:$0xff]  }
  0xf8   : > { %2545 = vmatprep.mubr.msk.bf16.mxu1 %vm3119_vm0, %v3118_v0  ;;  %s728_s19 = scalar_select %p727_p1, %s3251_s1, 1  ;;  %2537 = vmatprep.mubr.msk.bf16.mxu0 %vm3119_vm0, %v3118_v0  ;;  %v2445_v9 = vld [vmem:[#allocation7] ss:$0 sm:$0xff]  ;;  %v2770_v21 = vld [vmem:[#allocation8] sm:$0xff]   ;;  %v2771_v22 = vld [vmem:[#allocation8 + $0x8] sm:$0xff]   ;;  %v961_v31 = vshrl.u32 %v960_v27, 7 }
  0xf9   : > { %2542 = vmatpush3.bf16.msra.mxu1 %v2766_v1  ;;  %2534 = vmatpush3.bf16.msra.mxu0 %v2767_v2  ;;  %v2441_v11 = vld [vmem:[%s3790_s4] ss:$0 sm:$0xff]  ;;  %s3120_s20 = smov 104   ;;  %s3121_s23 = smov 120   ;;  %v3123_v25 = vmov 1983009808  }
  0xfa   : > { %s3497_s27 = sshll.u32 %s728_s19, 3  ;;  %2543 = vmatprep.subr.bf16.mxu1 %v3118_v0  ;;  %2535 = vmatprep.subr.bf16.mxu0 %v3118_v0  ;;  %s3122_s3 = smov 112   ;;  %v958_v26 = vunpack.c.l.s4 %v3123_v25  ;;  %v3124_v28 = vmov 1934713408   ;;  %vm1389_vm2 = vcmask 64512   ;;  %vm1625_vm3 = vcmask 1043456  }
  0xfb   : > { %s3861_s19 = sld [smem:[#allocation33_spill]]  ;;  %v990_v29 = vunpack.c.l.s4 %v3124_v28  ;;  %s3126_s26 = smov 16   ;;  %vm1956_vm4 = vcmask 130048   ;;  %vm1958_vm5 = vcmask 195584   ;;  %vm2166_vm6 = vcmask 523264  }
  0xfc   : > { %v959_v30 = vunpack.c.0.s8 %v958_v26  ;;  %s3127_s25 = smov 8   ;;  %s3863_s17 = sld [smem:[#allocation29_spill]] }
  0xfd   : > { %s734_s5 = scalar_lea.vmem %s3859_s30, %s3497_s27  ;;  %s730_s29 = scalar_lea.vmem %s3860_s21, %s3497_s27  ;;  %2544 = vmatpush3.bf16.msra.mxu1 %v2768_v3  ;;  %2536 = vmatpush3.bf16.msra.mxu0 %v2769_v5  ;;  %v991_v34 = vunpack.c.0.s8 %v990_v29 }
  0xfe   : > { %v741_v4 = vld [vmem:[%s734_s5] sm:$0xff]  ;;  %2557 = vmatprep.subr.bf16.mxu1 %v3118_v0  ;;  %2549 = vmatprep.subr.bf16.mxu0 %v3118_v0  ;;  %v3539_v35 = vsub.s32 %v959_v30, %v961_v31  ;;  %s3128_s21 = smov 24  }
  0xff   : > { %v3509_v6 = vld [vmem:[%s730_s29] sm:$0xff]  ;;  %v811_v7 = vpack.c.bf16 %v741_v4, %v741_v4  ;;  %v3541_v42 = vsub.s32 %v991_v34, %v961_v31 }
 0x100   : > { %v743_v8 = vpack.c.bf16 %v3509_v6, %v3509_v6 }
 0x101   : > { %2546 = vmatmul.mubr.msk.bf16.vlgmr.msra.gmra.mrb[0].mxu1 %vm767_vm1, %v811_v7  ;;  %s738_s22 = scalar_lea.vmem %s3861_s19, %s3497_s27  ;;  %s3865_s19 = sld [smem:[#allocation37_spill]] }
 0x102   : > { %2538 = vmatmul.mubr.msk.bf16.vlgmr.msra.gmra.mrb[0].mxu0 %vm767_vm1, %v743_v8  ;;  %2559 = vmatprep.mubr.msk.bf16.mxu1 %vm3119_vm0, %v3118_v0  ;;  %v742_v23 = vld [vmem:[%s738_s22] sm:$0xff]  ;;  %s2494_s22 = sshll.u32 %s3251_s1, 7  ;;  %p3867_p9 = scmp.ne.s32.totalorder %s3863_s17, 0 }
 0x103   : > { %2553 = vmatprep.mubr.msk.bf16.mxu0 %vm3119_vm0, %v3118_v0  ;;  %2550 = vmatpush3.bf16.msra.mxu0 %v2770_v21  ;;  %v878_v24 = vpack.c.bf16 %v742_v23, %v742_v23  ;;  %s3129_s1 = smov [#allocation16]  }
 0x104   : > { %2551 = vmatprep.subr.bf16.mxu0 %v3118_v0 }
 0x107   : > { %2552 = vmatpush3.bf16.msra.mxu0 %v2771_v22 }
 0x108   : > { %2563 = vmatprep.subr.bf16.mxu0 %v3118_v0 }
 0x10a   : > { %2554 = vmatmul.mubr.msk.bf16.vlgmr.msra.gmra.mrb[4].mxu0 %vm767_vm1, %v878_v24 }
 0x10b   : > { %2565 = vmatprep.mubr.msk.bf16.mxu0 %vm3119_vm0, %v3118_v0 }
 0x1d4   : > { %v872_v10 = vpop.f32.mrb[0].mxu1 }
 0x1d5   : > { %v873_v12 = vadd.f32 %v2445_v9, %v872_v10  ;;  %v2547_v13 = vpop.f32.mrb[1].mxu1  ;;  %v805_v14 = vpop.f32.mrb[0].mxu0 }
 0x1d6   : > { %v875_v15 = vpop.f32.mrb[2].mxu1  ;;  %v2539_v16 = vpop.f32.mrb[1].mxu0  ;;  %v806_v18 = vadd.f32 %v2441_v11, %v805_v14 }
 0x1d7   : > { %1038 = vrot.lane.b32.xlu1 %v873_v12, %s3120_s20  ;;  %1032 = vrot.lane.b32.xlu0 %v873_v12, %s3121_s23  ;;  %v2548_v17 = vpop.f32.mrb[3].mxu1  ;;  %v808_v19 = vpop.f32.mrb[2].mxu0 }
 0x1d8   : > { %v2540_v20 = vpop.f32.mrb[3].mxu0 }
 0x1db   : > { %1035 = vrot.lane.b32.xlu0 %v873_v12, %s3122_s3  ;;  %946 = vrot.lane.b32.xlu1 %v806_v18, %s3121_s23 }
 0x1df   : > { %949 = vrot.lane.b32.xlu0 %v806_v18, %s3122_s3  ;;  %952 = vrot.lane.b32.xlu1 %v806_v18, %s3120_s20 }
 0x249   : > { %v1039_v32 = vpop.permute.xlu1 %1038  ;;  %v1033_v33 = vpop.permute.xlu0 %1032 }
 0x24a   : > { %v1057_v36 = vcombine.low %v1033_v33, %v1039_v32  ;;  %v1058_v37 = vcombine.high %v1033_v33, %v1039_v32 }
 0x24c   : > { %v1065_v43 = vrot.slane %v1057_v36, %v3539_v35  ;;  %v1072_v44 = vrot.slane %v1058_v37, %v3539_v35 }
 0x24d   : > { %v1036_v38 = vpop.permute.xlu0 %1035  ;;  %v947_v39 = vpop.permute.xlu1 %946 }
 0x24e   : > { %v1041_v40 = vcombine.low %v873_v12, %v1036_v38  ;;  %v1042_v41 = vcombine.high %v873_v12, %v1036_v38 }
 0x250   : > { %v1049_v45 = vrot.slane %v1041_v40, %v3539_v35  ;;  %v1056_v46 = vrot.slane %v1042_v41, %v3539_v35 }
 0x251   : > { %v950_v47 = vpop.permute.xlu0 %949  ;;  %v953_v48 = vpop.permute.xlu1 %952 }
 0x252   : > { %v1073_v49 = vcombine.low %v1049_v45, %v1065_v43  ;;  %v1074_v50 = vcombine.high %v1049_v45, %v1065_v43  ;;  %v1089_v51 = vcombine.low %v1056_v46, %v1072_v44  ;;  %v1090_v52 = vcombine.high %v1056_v46, %v1072_v44 }
 0x253   : > { %v955_v53 = vcombine.low %v806_v18, %v950_v47  ;;  %v956_v54 = vcombine.high %v806_v18, %v950_v47  ;;  %v971_v55 = vcombine.low %v947_v39, %v953_v48  ;;  %v972_v56 = vcombine.high %v947_v39, %v953_v48 }
 0x254   : > { %v1081_v57 = vrot.slane %v1073_v49, %v3541_v42  ;;  %v1088_v58 = vrot.slane %v1074_v50, %v3541_v42  ;;  %v1097_v59 = vrot.slane %v1089_v51, %v3541_v42  ;;  %v1104_v60 = vrot.slane %v1090_v52, %v3541_v42 }
 0x255   : > { %v963_v61 = vrot.slane %v955_v53, %v3539_v35  ;;  %v970_v62 = vrot.slane %v956_v54, %v3539_v35  ;;  %v979_v63 = vrot.slane %v971_v55, %v3539_v35  ;;  %v986_v1 = vrot.slane %v972_v56, %v3539_v35 }
 0x256   : > { %v1105_v2 = vcombine.high %v1081_v57, %v3118_v0  ;;  %v1106_v3 = vcombine.high %v1088_v58, %v3118_v0  ;;  %v1107_v4 = vcombine.high %v1097_v59, %v3118_v0  ;;  %v1108_v5 = vcombine.high %v1104_v60, %v3118_v0 }
 0x257   : > { %v2457_v7 = vpack.c.bf16 %v1097_v59, %v1081_v57  ;;  %v2458_v8 = vpack.c.bf16 %v1104_v60, %v1088_v58  ;;  %v987_v9 = vcombine.low %v963_v61, %v979_v63  ;;  %v988_v10 = vcombine.high %v963_v61, %v979_v63 }
 0x258   : > { %v2459_v11 = vpack.c.bf16 %v1107_v4, %v1105_v2  ;;  %v2460_v12 = vpack.c.bf16 %v1108_v5, %v1106_v3  ;;  %v1003_v13 = vcombine.low %v970_v62, %v986_v1  ;;  %v1004_v14 = vcombine.high %v970_v62, %v986_v1 }
 0x259   : > { %v1272_v15 = vrot.slane %v2457_v7, %v3539_v35  ;;  %v1280_v16 = vrot.slane %v2458_v8, %v3539_v35  ;;  %v995_v17 = vrot.slane %v987_v9, %v3541_v42  ;;  %v1002_v18 = vrot.slane %v988_v10, %v3541_v42  ;;  %v939_v8 = vpop.f32.mrb[4].mxu0 }
 0x25a   : > { %v1297_v19 = vrot.slane %v2459_v11, %v3539_v35  ;;  %v1305_v20 = vrot.slane %v2460_v12, %v3539_v35  ;;  %v1011_v21 = vrot.slane %v1003_v13, %v3541_v42  ;;  %v1018_v22 = vrot.slane %v1004_v14, %v3541_v42  ;;  %v2555_v9 = vpop.f32.mrb[5].mxu0 }
 0x25b   : > { %v1019_v23 = vcombine.high %v995_v17, %v3118_v0  ;;  %v1020_v24 = vcombine.high %v1002_v18, %v3118_v0  ;;  %v1281_v25 = vcombine.low %v1272_v15, %v1280_v16  ;;  %v3125_v45 = vmov 0   ;;  %v942_v10 = vpop.f32.mrb[6].mxu0 }
 0x25c   : > { %v1021_v26 = vcombine.high %v1011_v21, %v3118_v0  ;;  %v1022_v27 = vcombine.high %v1018_v22, %v3118_v0  ;;  %v2453_v28 = vpack.c.bf16 %v1011_v21, %v995_v17  ;;  %v2454_v29 = vpack.c.bf16 %v1018_v22, %v1002_v18  ;;  %v2556_v11 = vpop.f32.mrb[7].mxu0 }
 0x25d   : > { %v1288_v30 = vrot.slane %v1281_v25, %v3541_v42  ;;  %v1306_v31 = vcombine.low %v1297_v19, %v1305_v20 }
 0x25e   : > { %v1210_v32 = vrot.slane %v2453_v28, %v3539_v35  ;;  %v1218_v33 = vrot.slane %v2454_v29, %v3539_v35  ;;  %v2455_v34 = vpack.c.bf16 %v1021_v26, %v1019_v23  ;;  %v2456_v36 = vpack.c.bf16 %v1022_v27, %v1020_v24 }
 0x25f   : > { %v1313_v37 = vrot.slane %v1306_v31, %v3541_v42  ;;  %v1318_v40 = vshrl.u32 %v1288_v30, 16  ;;  %v1289_v50 = vcombine.high %v1288_v30, %v3125_v45 }
 0x260   : > { %v1235_v38 = vrot.slane %v2455_v34, %v3539_v35  ;;  %v1243_v39 = vrot.slane %v2456_v36, %v3539_v35  ;;  %v1219_v41 = vcombine.low %v1210_v32, %v1218_v33  ;;  %v2449_v32 = vld [vmem:[#allocation10] ss:$0 sm:$0xff] }
 0x261   : > { %v1317_v43 = vpack.i.b16 %v1313_v37, %v1288_v30  ;;  %v1319_v44 = vshrl.u32 %v1313_v37, 16  ;;  %v1314_v46 = vcombine.high %v1313_v37, %v3125_v45  ;;  %v1324_v57 = vshrl.u32 %v1289_v50, 16 }
 0x262   : > { %v1244_v47 = vcombine.low %v1235_v38, %v1243_v39  ;;  %v1226_v52 = vrot.slane %v1219_v41, %v3541_v42  ;;  %v940_v33 = vadd.f32 %v2449_v32, %v939_v8 }
 0x263   : > { %v1394_v48 = vsel %vm1389_vm2, %v1317_v43, 0  ;;  %v1320_v49 = vpack.i.b16 %v1319_v44, %v1318_v40  ;;  %v1325_v54 = vshrl.u32 %v1314_v46, 16  ;;  %v1323_v55 = vpack.i.b16 %v1314_v46, %v1289_v50 }
 0x264   : > { %2558 = vmatpush3.bf16.xpose.msra.mxu1 %v1394_v48  ;;  %v1251_v51 = vrot.slane %v1244_v47, %v3541_v42  ;;  %v1256_v59 = vshrl.u32 %v1226_v52, 16  ;;  %v1227_v2 = vcombine.high %v1226_v52, %v3125_v45 }
 0x265   : > { %v1440_v53 = vsel %vm1389_vm2, %v1320_v49, 0  ;;  %2569 = vmatprep.subr.bf16.mxu1 %v3118_v0  ;;  %v1326_v60 = vpack.i.b16 %v1325_v54, %v1324_v57  ;;  %v1486_v61 = vsel %vm1389_vm2, %v1323_v55, 0 }
 0x266   : > { %2564 = vmatpush3.bf16.xpose.msra.mxu0 %v1440_v53  ;;  %v1257_v56 = vshrl.u32 %v1251_v51, 16  ;;  %v1255_v58 = vpack.i.b16 %v1251_v51, %v1226_v52  ;;  %v1252_v63 = vcombine.high %v1251_v51, %v3125_v45  ;;  %v1262_v5 = vshrl.u32 %v1227_v2, 16 }
 0x267   : > { %2575 = vmatprep.subr.bf16.mxu0 %v3118_v0  ;;  %v1532_v1 = vsel %vm1389_vm2, %v1326_v60, 0 }
 0x268   : > { %v1258_v62 = vpack.i.b16 %v1257_v56, %v1256_v59  ;;  %v1263_v3 = vshrl.u32 %v1252_v63, 16  ;;  %v1261_v4 = vpack.i.b16 %v1252_v63, %v1227_v2 }
 0x26a   : > { %v1264_v7 = vpack.i.b16 %v1263_v3, %v1262_v5 }
 0x26b   : > { %2560 = vmatmul.mubr.msk.bf16.vlgmr.msra.gmra.mrb[4].mxu1 %vm1389_vm2, %v1255_v58 }
 0x26c   : > { %2570 = vmatpush3.bf16.xpose.msra.mxu1 %v1486_v61  ;;  %2571 = vmatprep.mubr.msk.bf16.mxu1 %vm3119_vm0, %v3118_v0 }
 0x26d   : > { %2566 = vmatmul.mubr.msk.bf16.vlgmr.msra.gmra.mrb[8].mxu0 %vm1389_vm2, %v1258_v62  ;;  %2581 = vmatprep.subr.bf16.mxu1 %v3118_v0 }
 0x26e   : > { %2576 = vmatpush3.bf16.xpose.msra.mxu0 %v1532_v1  ;;  %2577 = vmatprep.mubr.msk.bf16.mxu0 %vm3119_vm0, %v3118_v0 }
 0x26f   : > { %2587 = vmatprep.subr.bf16.mxu0 %v3118_v0 }
 0x273   : > { %2572 = vmatmul.mubr.msk.bf16.vlgmr.msra.gmra.mrb[8].mxu1 %vm1389_vm2, %v1261_v4 }
 0x274   : > { %2583 = vmatprep.mubr.msk.bf16.mxu1 %vm3119_vm0, %v3118_v0 }
 0x275   : > { %2578 = vmatmul.mubr.msk.bf16.vlgmr.msra.gmra.mrb[12].mxu0 %vm1389_vm2, %v1264_v7 }
 0x276   : > { %2589 = vmatprep.mubr.msk.bf16.mxu0 %vm3119_vm0, %v3118_v0 }
 0x33e   : > { %v1430_v12 = vpop.f32.mrb[4].mxu1 }
 0x33f   : > { %v2561_v13 = vpop.f32.mrb[5].mxu1  ;;  %v1574_v14 = vsel %vm1389_vm2, %v1430_v12, -inf }
 0x340   : > { %1575 = vmax.xlane.f32.xlu0 %v1574_v14  ;;  %v1433_v15 = vpop.f32.mrb[6].mxu1  ;;  %v1476_v16 = vpop.f32.mrb[8].mxu0 }
 0x341   : > { %v2562_v17 = vpop.f32.mrb[7].mxu1  ;;  %v2567_v18 = vpop.f32.mrb[9].mxu0  ;;  %v1577_v19 = vsel %vm1389_vm2, %v1476_v16, -inf }
 0x342   : > { %1578 = vmax.xlane.f32.xlu1 %v1577_v19  ;;  %v1479_v20 = vpop.f32.mrb[10].mxu0 }
 0x343   : > { %v2568_v21 = vpop.f32.mrb[11].mxu0 }
 0x346   : > { %v1522_v22 = vpop.f32.mrb[8].mxu1 }
 0x347   : > { %v2573_v23 = vpop.f32.mrb[9].mxu1  ;;  %v1580_v24 = vsel %vm1389_vm2, %v1522_v22, -inf }
 0x348   : > { %1581 = vmax.xlane.f32.xlu0 %v1580_v24  ;;  %v1525_v25 = vpop.f32.mrb[10].mxu1  ;;  %v1568_v26 = vpop.f32.mrb[12].mxu0 }
 0x349   : > { %v2574_v27 = vpop.f32.mrb[11].mxu1  ;;  %v2579_v28 = vpop.f32.mrb[13].mxu0  ;;  %v1583_v31 = vsel %vm1389_vm2, %v1568_v26, -inf }
 0x34a   : > { %v1571_v29 = vpop.f32.mrb[14].mxu0 }
 0x34b   : > { %v2580_v30 = vpop.f32.mrb[15].mxu0 }
 0x34c   : > { %1584 = vmax.xlane.f32.xlu0 %v1583_v31 }
 0x353   : > { %1118 = vrot.lane.b32.xlu1 %v940_v33, %s3121_s23 }
 0x3cd   : > { %v1576_v34 = vpop.xlane.xlu0 %1575 }
 0x3ce   : > { %v1586_v36 = vsub.f32 %v1430_v12, %v1576_v34 }
 0x3cf   : > { %v1579_v37 = vpop.xlane.xlu1 %1578 }
 0x3d0   : > { %v1590_v38 = vmul.f32 1.442695, %v1586_v36  ;;  %v1587_v39 = vsub.f32 %v1476_v16, %v1579_v37 }
 0x3d2   : > { %2780 = vpow2.f32 %v1590_v38  ;;  %v1592_v40 = vmul.f32 1.442695, %v1587_v39 }
 0x3d3   : > { %v1119_v57 = vpop.permute.xlu1 %1118 }
 0x3d4   : > { %2782 = vpow2.f32 %v1592_v40 }
 0x3d5   : > { %v1582_v47 = vpop.xlane.xlu0 %1581 }
 0x3d6   : > { %v1588_v49 = vsub.f32 %v1522_v22, %v1582_v47 }
 0x3d8   : > { %v1594_v51 = vmul.f32 1.442695, %v1588_v49 }
 0x3d9   : > { %v1585_v48 = vpop.xlane.xlu0 %1584 }
 0x3da   : > { %v1589_v50 = vsub.f32 %v1568_v26, %v1585_v48  ;;  %2784 = vpow2.f32 %v1594_v51 }
 0x3dc   : > { %v3608_v41 = vpop.eup %2780  ;;  %v1596_v52 = vmul.f32 1.442695, %v1589_v50 }
 0x3dd   : > { %v1598_v43 = vsel %vm1389_vm2, %v3608_v41, 0.0 }
 0x3de   : > { %v3612_v44 = vpop.eup %2782  ;;  %1599 = vadd.xlane.f32.xlu1 %v1598_v43  ;;  %2786 = vpow2.f32 %v1596_v52 }
 0x3df   : > { %v1601_v46 = vsel %vm1389_vm2, %v3612_v44, 0.0 }
 0x3e0   : > { %1602 = vadd.xlane.f32.xlu0 %v1601_v46 }
 0x3e4   : > { %v3618_v53 = vpop.eup %2784 }
 0x3e5   : > { %v1604_v55 = vsel %vm1389_vm2, %v3618_v53, 0.0 }
 0x3e8   : > { %v3620_v54 = vpop.eup %2786 }
 0x3e9   : > { %v1607_v56 = vsel %vm1389_vm2, %v3620_v54, 0.0 }
 0x3ef   : > { %1124 = vrot.lane.b32.xlu1 %v940_v33, %s3120_s20 }
 0x3f6   : > { %1121 = vrot.lane.b32.xlu0 %v940_v33, %s3122_s3  ;;  %s3864_s3 = sld [smem:[#allocation36_spill]] }
 0x413   : > { %1605 = vadd.xlane.f32.xlu1 %v1604_v55 }
 0x415   : > { %1608 = vadd.xlane.f32.xlu0 %v1607_v56 }
 0x46b   : > { %v1600_v58 = vpop.xlane.xlu1 %1599 }
 0x46c   : > { %2788 = vrcp.f32 %v1600_v58 }
 0x46d   : > { %v1603_v59 = vpop.xlane.xlu0 %1602 }
 0x46e   : > { %2790 = vrcp.f32 %v1603_v59 }
 0x46f   : > { %v1125_v60 = vpop.permute.xlu1 %1124 }
 0x470   : > { %v1143_v61 = vcombine.low %v1119_v57, %v1125_v60  ;;  %v1144_v62 = vcombine.high %v1119_v57, %v1125_v60 }
 0x471   : > { %v1122_v63 = vpop.permute.xlu0 %1121 }
 0x472   : > { %v1127_v1 = vcombine.low %v940_v33, %v1122_v63  ;;  %v1128_v2 = vcombine.high %v940_v33, %v1122_v63  ;;  %v1151_v3 = vrot.slane %v1143_v61, %v3539_v35  ;;  %v1158_v4 = vrot.slane %v1144_v62, %v3539_v35 }
 0x474   : > { %v1135_v5 = vrot.slane %v1127_v1, %v3539_v35  ;;  %v1142_v7 = vrot.slane %v1128_v2, %v3539_v35 }
 0x476   : > { %v1159_v8 = vcombine.low %v1135_v5, %v1151_v3  ;;  %v1160_v9 = vcombine.high %v1135_v5, %v1151_v3  ;;  %v1175_v10 = vcombine.low %v1142_v7, %v1158_v4  ;;  %v1176_v11 = vcombine.high %v1142_v7, %v1158_v4  ;;  %v2789_v28 = vpop.eup %2788 }
 0x477   : > { %v1614_v34 = vmul.f32 %v2789_v28, %v3608_v41  ;;  %v2772_v28 = vld [vmem:[%s3795_s9] sm:$0xff]  }
 0x478   : > { %v1167_v12 = vrot.slane %v1159_v8, %v3541_v42  ;;  %v1174_v13 = vrot.slane %v1160_v9, %v3541_v42  ;;  %v1183_v14 = vrot.slane %v1175_v10, %v3541_v42  ;;  %v1190_v15 = vrot.slane %v1176_v11, %v3541_v42  ;;  %v2791_v31 = vpop.eup %2790 }
 0x479   : > { %v1615_v43 = vmul.f32 %v2791_v31, %v3612_v44  ;;  %v1618_v41 = vpack.c.bf16 %v1614_v34, %v1614_v34 }
 0x47a   : > { %v1191_v16 = vcombine.high %v1167_v12, %v3118_v0  ;;  %v1192_v17 = vcombine.high %v1174_v13, %v3118_v0  ;;  %v1193_v18 = vcombine.high %v1183_v14, %v3118_v0  ;;  %v1194_v19 = vcombine.high %v1190_v15, %v3118_v0 }
 0x47b   : > { %v2461_v20 = vpack.c.bf16 %v1183_v14, %v1167_v12  ;;  %v2462_v21 = vpack.c.bf16 %v1190_v15, %v1174_v13  ;;  %v1619_v55 = vpack.c.bf16 %v1615_v43, %v1615_v43 }
 0x47c   : > { %v2463_v22 = vpack.c.bf16 %v1193_v18, %v1191_v16  ;;  %v2464_v23 = vpack.c.bf16 %v1194_v19, %v1192_v17 }
 0x47d   : > { %v1334_v24 = vrot.slane %v2461_v20, %v3539_v35  ;;  %v1342_v25 = vrot.slane %v2462_v21, %v3539_v35 }
 0x47e   : > { %v1359_v26 = vrot.slane %v2463_v22, %v3539_v35  ;;  %v1367_v27 = vrot.slane %v2464_v23, %v3539_v35 }
 0x47f   : > { %v1343_v29 = vcombine.low %v1334_v24, %v1342_v25 }
 0x480   : > { %v1368_v30 = vcombine.low %v1359_v26, %v1367_v27 }
 0x481   : > { %v1350_v32 = vrot.slane %v1343_v29, %v3541_v42 }
 0x482   : > { %v1375_v33 = vrot.slane %v1368_v30, %v3541_v42 }
 0x483   : > { %v1351_v36 = vcombine.high %v1350_v32, %v3125_v45  ;;  %v1380_v38 = vshrl.u32 %v1350_v32, 16 }
 0x484   : > { %v1379_v37 = vpack.i.b16 %v1375_v33, %v1350_v32  ;;  %v1381_v39 = vshrl.u32 %v1375_v33, 16  ;;  %v1376_v40 = vcombine.high %v1375_v33, %v3125_v45 }
 0x485   : > { %v1386_v46 = vshrl.u32 %v1351_v36, 16 }
 0x486   : > { %v1627_v47 = vsel %vm1625_vm3, %v1379_v37, 0  ;;  %v1382_v48 = vpack.i.b16 %v1381_v39, %v1380_v38  ;;  %v1385_v49 = vpack.i.b16 %v1376_v40, %v1351_v36  ;;  %v1387_v50 = vshrl.u32 %v1376_v40, 16  ;;  %v2773_v38 = vld [vmem:[%s3795_s9 + $0x8] sm:$0xff]  }
 0x487   : > { %2582 = vmatpush3.bf16.msra.mxu1 %v1627_v47 }
 0x488   : > { %v1673_v51 = vsel %vm1625_vm3, %v1382_v48, 0  ;;  %2593 = vmatprep.subr.bf16.mxu1 %v3118_v0  ;;  %v1388_v52 = vpack.i.b16 %v1387_v50, %v1386_v46  ;;  %v1719_v45 = vsel %vm1625_vm3, %v1385_v49, 0 }
 0x489   : > { %2588 = vmatpush3.bf16.msra.mxu0 %v1673_v51 }
 0x48a   : > { %2584 = vmatmul.mubr.msk.bf16.vlgmr.msra.gmra.mrb[12].mxu1 %vm1389_vm2, %v1618_v41  ;;  %2599 = vmatprep.subr.bf16.mxu0 %v3118_v0  ;;  %v1765_v44 = vsel %vm1625_vm3, %v1388_v52, 0 }
 0x48b   : > { %2594 = vmatpush3.bf16.msra.mxu1 %v1719_v45  ;;  %2595 = vmatprep.mubr.msk.bf16.mxu1 %vm3119_vm0, %v3118_v0 }
 0x48c   : > { %2590 = vmatmul.mubr.msk.bf16.vlgmr.msra.gmra.mrb[16].mxu0 %vm1389_vm2, %v1619_v55  ;;  %2605 = vmatprep.subr.bf16.mxu1 %v3118_v0 }
 0x48d   : > { %2600 = vmatpush3.bf16.msra.mxu0 %v1765_v44  ;;  %2601 = vmatprep.mubr.msk.bf16.mxu0 %vm3119_vm0, %v3118_v0 }
 0x48e   : > { %2613 = vmatprep.subr.bf16.mxu0 %v3118_v0 }
 0x4a0   : > { %v1606_v56 = vpop.xlane.xlu1 %1605 }
 0x4a1   : > { %2792 = vrcp.f32 %v1606_v56 }
 0x4a2   : > { %v1609_v57 = vpop.xlane.xlu0 %1608 }
 0x4a3   : > { %2794 = vrcp.f32 %v1609_v57 }
 0x4ab   : > { %v2793_v58 = vpop.eup %2792 }
 0x4ac   : > { %v1616_v59 = vmul.f32 %v2793_v58, %v3618_v53 }
 0x4ad   : > { %v2795_v60 = vpop.eup %2794 }
 0x4ae   : > { %v1617_v61 = vmul.f32 %v2795_v60, %v3620_v54  ;;  %v1620_v62 = vpack.c.bf16 %v1616_v59, %v1616_v59 }
 0x4b0   : > { %2596 = vmatmul.mubr.msk.bf16.vlgmr.msra.gmra.mrb[16].mxu1 %vm1389_vm2, %v1620_v62  ;;  %v1621_v63 = vpack.c.bf16 %v1617_v61, %v1617_v61 }
 0x4b1   : > { %2609 = vmatprep.mubr.msk.bf16.mxu1 %vm3119_vm0, %v3118_v0  ;;  %2606 = vmatpush3.bf16.msra.mxu1 %v2772_v28 }
 0x4b2   : > { %2602 = vmatmul.mubr.msk.bf16.vlgmr.msra.gmra.mrb[20].mxu0 %vm1389_vm2, %v1621_v63  ;;  %2607 = vmatprep.subr.bf16.mxu1 %v3118_v0  ;;  %v2475_v63 = vld [vmem:[#allocation11] ss:$0 sm:$0xff] }
 0x4b3   : > { %2617 = vmatprep.mubr.msk.bf16.mxu0 %vm3119_vm0, %v3118_v0 }
 0x4b5   : > { %2608 = vmatpush3.bf16.msra.mxu1 %v2773_v38 }
 0x4b6   : > { %2621 = vmatprep.subr.bf16.mxu1 %v3118_v0 }
 0x55d   : > { %v1663_v1 = vpop.f32.mrb[12].mxu1 }
 0x55e   : > { %v2585_v2 = vpop.f32.mrb[13].mxu1 }
 0x55f   : > { %v1666_v3 = vpop.f32.mrb[14].mxu1  ;;  %v1709_v4 = vpop.f32.mrb[16].mxu0 }
 0x560   : > { %v2586_v53 = vpop.f32.mrb[15].mxu1  ;;  %v2591_v5 = vpop.f32.mrb[17].mxu0 }
 0x561   : > { %v1712_v7 = vpop.f32.mrb[18].mxu0 }
 0x562   : > { %v2592_v54 = vpop.f32.mrb[19].mxu0 }
 0x583   : > { %v1755_v8 = vpop.f32.mrb[16].mxu1 }
 0x584   : > { %v1807_v9 = vcombine.low %v1663_v1, %v1755_v8  ;;  %v1808_v10 = vcombine.high %v1663_v1, %v1755_v8  ;;  %v2597_v11 = vpop.f32.mrb[17].mxu1 }
 0x585   : > { %v1758_v12 = vpop.f32.mrb[18].mxu1  ;;  %v1801_v13 = vpop.f32.mrb[20].mxu0 }
 0x586   : > { %v1823_v14 = vcombine.low %v1709_v4, %v1801_v13  ;;  %v1824_v15 = vcombine.high %v1709_v4, %v1801_v13  ;;  %v2598_v16 = vpop.f32.mrb[19].mxu1  ;;  %v2603_v17 = vpop.f32.mrb[21].mxu0  ;;  %v1815_v19 = vrot.slane %v1807_v9, %v3539_v35  ;;  %v1822_v20 = vrot.slane %v1808_v10, %v3539_v35  ;;  %v2774_v12 = vld [vmem:[%s3799_s13] sm:$0xff]   ;;  %v2775_v13 = vld [vmem:[%s3799_s13 + $0x8] sm:$0xff]  }
 0x587   : > { %v1804_v18 = vpop.f32.mrb[22].mxu0  ;;  %2614 = vmatpush3.bf16.msra.mxu0 %v2774_v12 }
 0x588   : > { %v1831_v21 = vrot.slane %v1823_v14, %v3539_v35  ;;  %v1838_v22 = vrot.slane %v1824_v15, %v3539_v35  ;;  %v2604_v23 = vpop.f32.mrb[23].mxu0  ;;  %2615 = vmatprep.subr.bf16.mxu0 %v3118_v0  ;;  %v2777_v14 = vld [vmem:[%s3801_s15 + $0x8] sm:$0xff]  }
 0x58a   : > { %v1839_v24 = vcombine.low %v1815_v19, %v1831_v21  ;;  %v1840_v25 = vcombine.high %v1815_v19, %v1831_v21  ;;  %v1855_v26 = vcombine.low %v1822_v20, %v1838_v22  ;;  %v1856_v27 = vcombine.high %v1822_v20, %v1838_v22  ;;  %v2479_v19 = vld [vmem:[#allocation13] ss:$0 sm:$0xff]  ;;  %v2480_v21 = vld [vmem:[#allocation14] ss:$0 sm:$0xff] }
 0x58b   : > { %2616 = vmatpush3.bf16.msra.mxu0 %v2775_v13 }
 0x58c   : > { %v1847_v29 = vrot.slane %v1839_v24, %v3541_v42  ;;  %v1854_v30 = vrot.slane %v1840_v25, %v3541_v42  ;;  %v1863_v31 = vrot.slane %v1855_v26, %v3541_v42  ;;  %v1870_v32 = vrot.slane %v1856_v27, %v3541_v42  ;;  %v2778_v25 = vld [vmem:[%s3801_s15 + $0x10] sm:$0xff]   ;;  %v2779_v26 = vld [vmem:[%s3801_s15 + $0x18] sm:$0xff]   ;;  %v2481_v27 = vld [vmem:[%s3800_s14] ss:$0 sm:$0xff] }
 0x58e   : > { %v1875_v33 = vcombine.low %v1847_v29, %v1854_v30  ;;  %v2473_v34 = vcombine.high %v1847_v29, %v1854_v30  ;;  %v1891_v36 = vcombine.low %v1863_v31, %v1870_v32  ;;  %v2474_v37 = vcombine.high %v1863_v31, %v1870_v32 }
 0x590   : > { %v1882_v39 = vrot.slane %v1875_v33, %v3539_v35  ;;  %v1890_v40 = vrot.slane %v2473_v34, %v3539_v35  ;;  %v1898_v43 = vrot.slane %v1891_v36, %v3539_v35  ;;  %v1906_v46 = vrot.slane %v2474_v37, %v3539_v35 }
 0x592   : > { %v1908_v47 = vcombine.high %v1882_v39, %v1890_v40  ;;  %v1924_v48 = vcombine.high %v1898_v43, %v1906_v46  ;;  %v1907_v49 = vcombine.low %v1882_v39, %v1890_v40  ;;  %v1923_v50 = vcombine.low %v1898_v43, %v1906_v46 }
 0x594   : > { %v1922_v51 = vrot.slane %v1908_v47, %v3541_v42  ;;  %v1938_v41 = vrot.slane %v1924_v48, %v3541_v42  ;;  %v1915_v52 = vrot.slane %v1907_v49, %v3541_v42  ;;  %v1931_v45 = vrot.slane %v1923_v50, %v3541_v42 }
 0x596   : > { %v1941_v55 = vcombine.low %v1922_v51, %v1938_v41  ;;  %v1940_v44 = vcombine.high %v1915_v52, %v1931_v45  ;;  %v1942_v56 = vcombine.high %v1922_v51, %v1938_v41  ;;  %v1939_v57 = vcombine.low %v1915_v52, %v1931_v45 }
 0x598   : > { %1948 = vrot.lane.b32.xlu1 %v1941_v55, %s3126_s26  ;;  %1944 = vrot.lane.b32.xlu0 %v1940_v44, %s3127_s25  ;;  %v2491_v44 = vld [vmem:[%s3864_s3] ss:$0 sm:$0xff]  ;;  %s3866_s26 = sld [smem:[#allocation38_spill]] }
 0x59c   : > { %1952 = vrot.lane.b32.xlu1 %v1942_v56, %s3128_s21  ;;  %s3862_s21 = sld [smem:[#allocation24_spill]] }
 0x59e   : > { %s3743_s25 = scalar_lea.hbm %s3866_s26, %s2494_s22 }
 0x5a2   : > { %s724_s29 = sand.u32 1, %s3862_s21  }
 0x5a3   : > { %s2437_s24 = sshll.u32 %s724_s29, 3  ;;  %s2242_s21 = scalar_lea.sflag [#allocation4], %s724_s29 }
 0x5a4   : > { %s726_s27 = scalar_lea.vmem [#allocation16], %s2437_s24  ;;  %s3028_s24 = sshll.u32 %s3129_s1, 4  ;;  %s3029_s24 = int_to_ptr.vmem [resolvable:$false] %s3028_s24 }
 0x5a5   : > { %s2255_s18 = sshll.u32 %s726_s27, 4  ;;  %s3030_s23 = scalar_lea.vmem %s3029_s24, 256  ;;  %s3745_s18 = int_to_ptr.vmem [resolvable:$true] %s2255_s18 }
 0x5a6   : > { %s3024_s20 = scalar_lea.vmem %s3745_s18, 128  ;;  %p3031_p0 = scmp.lt.s32.totalorder %s3745_s18, %s3029_s24 }
 0x5a7   : > { %p3025_p6 = scmp.ne.s32.totalorder %s3745_s18, %s3024_s20  ;;  %p3032_p2 = scmp.lt.s32.totalorder %s3030_s23, %s3024_s20 }
 0x5a9   : > { %p3026_p5 = pnand %p3025_p6, %p3867_p9  ;;  %p3033_p3 = por %p3032_p2, %p3031_p0 }
 0x5ab   : > { %p3027_p10 = pneg %p3026_p5 }
 0x5ad   : > { %p3034_p4 = pnand %p3033_p3, %p3027_p10 }
 0x60a   : > { %v1949_v35 = vpop.permute.xlu1 %1948  ;;  %v1945_v58 = vpop.permute.xlu0 %1944 }
 0x60b   : > { %v1955_v59 = vsel %vm1389_vm2, %v1939_v57, %v1945_v58  ;;  %v2492_v57 = vld [vmem:[%s3865_s19] ss:$0 sm:$0xff] }
 0x60c   : > { %v1957_v61 = vsel %vm1956_vm4, %v1955_v59, %v1949_v35 }
 0x60e   : > { %v1953_v60 = vpop.permute.xlu1 %1952 }
 0x60f   : > { %v1959_v62 = vsel %vm1958_vm5, %v1957_v61, %v1953_v60 }
 0x610   : > { %v1960_v42 = vpack.c.bf16 %v1959_v62, %v1959_v62 }
 0x612   : > { %2610 = vmatmul.mubr.msk.bf16.vlgmr.msra.gmra.mrb[20].mxu1 %vm767_vm1, %v1960_v42 }
 0x613   : > { %2629 = vmatprep.mubr.msk.bf16.mxu1 %vm3119_vm0, %v3118_v0 }
 0x6e5   : > { %v2021_v1 = vpop.f32.mrb[20].mxu1 }
 0x6e6   : > { %v2022_v2 = vadd.f32 %v2475_v63, %v2021_v1  ;;  %v2611_v3 = vpop.f32.mrb[21].mxu1 }
 0x6e7   : > { %v2024_v4 = vpop.f32.mrb[22].mxu1 }
 0x6e8   : > { %v2612_v53 = vpop.f32.mrb[23].mxu1  ;;  %v2027_v5 = vadd.f32 %v2022_v2, %v3509_v6  ;;  %v2776_v6 = vld [vmem:[%s3801_s15] sm:$0xff]  }
 0x6e9   : > { %2622 = vmatpush3.bf16.msra.mxu1 %v2776_v6 }
 0x6ea   : > { %v2028_v7 = vsel %vm767_vm1, %v2027_v5, 0.0  ;;  %2623 = vmatprep.subr.bf16.mxu1 %v3118_v0 }
 0x6eb   : > { %2029 = vadd.xlane.f32.xlu0 %v2028_v7 }
 0x6ed   : > { %2624 = vmatpush3.bf16.msra.mxu1 %v2777_v14 }
 0x6ee   : > { %2625 = vmatprep.subr.bf16.mxu1 %v3118_v0 }
 0x6f1   : > { %2626 = vmatpush3.bf16.msra.mxu1 %v2778_v25 }
 0x6f2   : > { %2627 = vmatprep.subr.bf16.mxu1 %v3118_v0  ;;  %v2485_v0 = vld [vmem:[%s3802_s16] ss:$0 sm:$0xff] }
 0x6f5   : > { %2628 = vmatpush3.bf16.msra.mxu1 %v2779_v26 }
 0x778   : > { %v2030_v54 = vpop.xlane.xlu0 %2029 }
 0x779   : > { %v2032_v8 = vmul.f32 0.03125, %v2030_v54 }
 0x77b   : > { %v2033_v9 = vsub.f32 %v2027_v5, %v2032_v8 }
 0x77d   : > { %v2034_v10 = vmul.f32 %v2033_v9, %v2033_v9 }
 0x77f   : > { %v2035_v11 = vsel %vm767_vm1, %v2034_v10, 0.0 }
 0x780   : > { %2036 = vadd.xlane.f32.xlu1 %v2035_v11 }
 0x80d   : > { %v2037_v15 = vpop.xlane.xlu1 %2036 }
 0x80e   : > { %v2038_v16 = vmul.f32 0.03125, %v2037_v15 }
 0x810   : > { %v2039_v17 = vadd.f32 1e-05, %v2038_v16 }
 0x812   : > { %2796 = vrsqrt.f32 %v2039_v17 }
 0x81c   : > { %v2797_v18 = vpop.eup %2796 }
 0x81d   : > { %v2041_v20 = vmul.f32 %v2797_v18, %v2033_v9 }
 0x81f   : > { %v2049_v22 = vmul.f32 %v2479_v19, %v2041_v20 }
 0x821   : > { %v2057_v23 = vadd.f32 %v2480_v21, %v2049_v22 }
 0x823   : > { %v2058_v24 = vpack.c.bf16 %v2057_v23, %v2057_v23 }
 0x825   : > { %2618 = vmatmul.mubr.msk.bf16.vlgmr.msra.gmra.mrb[24].mxu0 %vm767_vm1, %v2058_v24 }
 0x8f8   : > { %v2119_v28 = vpop.f32.mrb[24].mxu0 }
 0x8f9   : > { %v2120_v29 = vadd.f32 %v2481_v27, %v2119_v28  ;;  %v2619_v30 = vpop.f32.mrb[25].mxu0 }
 0x8fa   : > { %v2122_v31 = vpop.f32.mrb[26].mxu0 }
 0x8fb   : > { %v2125_v32 = vmax.f32 %v2120_v29, 0.0  ;;  %v2620_v33 = vpop.f32.mrb[27].mxu0 }
 0x8fd   : > { %v2126_v34 = vpack.c.bf16 %v2125_v32, %v2125_v32 }
 0x8ff   : > { %2630 = vmatmul.mubr.msk.bf16.vlgmr.msra.gmra.mrb[24].mxu1 %vm2166_vm6, %v2126_v34 }
 0x9d2   : > { %v2204_v36 = vpop.f32.mrb[24].mxu1 }
 0x9d3   : > { %v2205_v37 = vadd.f32 %v2485_v0, %v2204_v36  ;;  %v2631_v38 = vpop.f32.mrb[25].mxu1 }
 0x9d4   : > { %v2207_v39 = vpop.f32.mrb[26].mxu1 }
 0x9d5   : > { %v2632_v40 = vpop.f32.mrb[27].mxu1  ;;  %v2210_v43 = vadd.f32 %v2205_v37, %v2057_v23 }
 0x9d7   : > { %v2211_v46 = vsel %vm767_vm1, %v2210_v43, 0.0 }
 0x9d8   : > { %2212 = vadd.xlane.f32.xlu0 %v2211_v46 }
 0xa65   : > { %v2213_v47 = vpop.xlane.xlu0 %2212 }
 0xa66   : > { %v2214_v48 = vmul.f32 0.03125, %v2213_v47 }
 0xa68   : > { %v2215_v49 = vsub.f32 %v2210_v43, %v2214_v48 }
 0xa6a   : > { %v2216_v50 = vmul.f32 %v2215_v49, %v2215_v49 }
 0xa6c   : > { %v2217_v51 = vsel %vm767_vm1, %v2216_v50, 0.0 }
 0xa6d   : > { %2218 = vadd.xlane.f32.xlu0 %v2217_v51 }
 0xafa   : > { %v2219_v41 = vpop.xlane.xlu0 %2218 }
 0xafb   : > { %v2220_v52 = vmul.f32 0.03125, %v2219_v41 }
 0xafd   : > { %v2221_v45 = vadd.f32 1e-05, %v2220_v52 }
 0xaff   : > { %2798 = vrsqrt.f32 %v2221_v45 }
 0xb09   : > { %v2799_v55 = vpop.eup %2798 }
 0xb0a   : > { %v2223_v56 = vmul.f32 %v2799_v55, %v2215_v49 }
 0xb0c   : > { %v2231_v35 = vmul.f32 %v2491_v44, %v2223_v56 }
 0xb0e   : > { %v2239_v58 = vadd.f32 %v2492_v57, %v2231_v35 }
 0xb10   : > { %2240 = vst.msk [vmem:[%s726_s27] sm:$0xff] %vm767_vm1, %v2239_v58 }
 0xb11   : > { %3037 = shalt.err (!%p3034_p4)
}
 0xb12   : > { %s3038_s29 = scalar_lea.hbm %s3743_s25, 128  ;;  %s3042_s28 = scalar_lea.hbm %s3866_s26, 256 }
 0xb13   : > { %p3039_p12 = scmp.ne.s32.totalorder %s3743_s25, %s3038_s29  ;;  %p3043_p11 = scmp.lt.u32.totalorder %s3743_s25, %s3866_s26 }
 0xb14   : > { %p3044_p13 = scmp.lt.u32.totalorder %s3042_s28, %s3038_s29  ;;  %p3046_p6 = scmp.lt.u32.totalorder %s3038_s29, %s3743_s25 }
 0xb15   : > { %p3040_p7 = pnand %p3039_p12, %p3867_p9 }
 0xb16   : > { %p3045_p1 = por %p3044_p13, %p3043_p11 }
 0xb17   : > { %p3041_p8 = pneg %p3040_p7 }
 0xb18   : > { %p3047_p5 = por %p3046_p6, %p3045_p1 }
 0xb1a   : > { %p3048_p10 = pnand %p3047_p5, %p3041_p8 }
 0xb1c   : > { %3051 = shalt.err (!%p3048_p10)
}
 0xb1d   : > { %2665 = dma.vmem_to_hbm [thread:$0]  (%p3867_p9), %s3745_s18, 128, %s3743_s25, %s2242_s21  }
 0xb1e PF: > { %s3868_s27 = sld [smem:[#allocation26_spill]]  ;;  %s3869_s30 = sld [smem:[#allocation23_spill]] }
 0xb1f   : > { %s3870_s5 = sld [smem:[#allocation30_spill]] }
 0xb24   : > { %p2712_p0 = scmp.ge.s32.totalorder %s3868_s27, 2  ;;  %s2267_s20 = sand.u32 1, %s3869_s30  }
 0xb25   : > { %p3871_p2 = scmp.ne.s32.totalorder %s3870_s5, 0  ;;  %s2268_s1 = scalar_lea.sflag [#allocation4], %s2267_s20 }
 0xb27   : > { %p2693_p3 = pnand %p2712_p0, %p3871_p2 }
 0xb29   : > { %3089 = dma.done.wait (!%p2693_p3), %s2268_s1, 128  }
 0xb2a   : > { %3091 = vsyncadd (!%p2693_p3), %s2268_s1, 4294967168  ;;  %s3872_s21 = sld [smem:[#allocation27_spill]]  ;;  %s3873_s0 = sld [smem:[#allocation24_spill]] }
 0xb2b   : > { %s3874_s30 = sld [smem:[#allocation25_spill]]  ;;  %s3875_s20 = sld [smem:[#allocation28_spill]] }
 0xb30   : > { %p34_p4 = scmp.ge.s32.totalorder %s3872_s21, 4  }
 0xb32   :  { %36 = sbr.rel (!%p34_p4) target bundleno = 17 (0x11), region = 170 }
 0xb39   :  { %2273 = vsyncpa [#allocation3], 1 }
 0xb3a   :  { %2275 = vsyncpa [#allocation3 + $0x1], 1 }
 0xb3b   :  { %2276 = vsyncpa [#allocation6], 1 }
 0xb3c   :  { %2277 = vsyncpa [#allocation9], 1 }
 0xb3d   :  { %2278 = vsyncpa [#allocation12], 1 }
 0xb3e   :  { %2279 = vsyncpa [#allocation15], 1 }
 0xb3f   :  { %2280 = vsyncpa [#allocation4], 1 }
 0xb40   :  { %2282 = vsyncpa [#allocation4 + $0x1], 1 }

</bundles_post_ra>
